<compile_context>
chip_gen: v7x
topology: tpu7x:2x2x1
jax: 0.10.0
libtpu: 0.0.40
codegen_flags: <defaults>
</compile_context>

<pallas_src>
import functools

import numpy as np
import jax
import jax.numpy as jnp
from jax import lax
from jax.experimental import pallas as pl
from jax.experimental.pallas import tpu as pltpu

# ---- module config (defaults of TextPromptNetwork.__init__) ----
D_MODEL = 768
NUM_HEADS = 8
Q_LORA_RANK = 64
KV_LORA_RANK = 64
QK_ROPE_HEAD_DIM = 64
QK_NOPE_HEAD_DIM = D_MODEL // NUM_HEADS - QK_ROPE_HEAD_DIM   # 32
V_HEAD_DIM = D_MODEL // NUM_HEADS                            # 96
Q_HEAD_DIM = QK_NOPE_HEAD_DIM + QK_ROPE_HEAD_DIM             # 96
HEAD_LATENT = KV_LORA_RANK + QK_ROPE_HEAD_DIM                # 128 per-head latent query width
Q_LATENT_ALL = NUM_HEADS * HEAD_LATENT                       # 1024
KV_A_OUT = KV_LORA_RANK + QK_ROPE_HEAD_DIM                   # 128
DOWN_OUT = KV_A_OUT + Q_LORA_RANK                            # 192 (fused kv_a + q_a down-proj)
CTX_ALL = NUM_HEADS * KV_LORA_RANK                           # 512
SOFTMAX_SCALE = Q_HEAD_DIM ** -0.5
RMS_EPS = 1e-6
ROPE_THETA = 10000.0


# ---------------------------------------------------------------------------
# in-kernel helpers (all f32 elementwise math; matmul inputs bf16)
# ---------------------------------------------------------------------------
def _rms_normalize(x, gamma, eps):
    var = jnp.mean(x * x, axis=-1, keepdims=True)
    return (x * lax.rsqrt(var + eps)) * gamma


def _rope_apply(x, cos_t, sin_lo, sin_hi):
    """out = x*cos + rotate_half(x)*sin with signs/masks pre-baked into the tables.

    Works for the 64-wide k_pe (raw tables) and for a 128-wide [nope|rope] head chunk
    (tables padded with [1|cos], [0|sin_*] so the nope half passes through unchanged).
    Half-rotation is two static lane rolls (slice + concat); no activation gather.
    """
    h = QK_ROPE_HEAD_DIM // 2                                       # 32
    w = x.shape[-1]
    left = jnp.concatenate([x[:, h:], x[:, :h]], axis=-1)           # x[(j+32) mod w]
    right = jnp.concatenate([x[:, w - h:], x[:, :w - h]], axis=-1)  # x[(j-32) mod w]
    return x * cos_t + left * sin_lo + right * sin_hi


# ---------------------------------------------------------------------------
# Kernel A: fused (kv_a|q_a) down-proj + RMSNorms + q_b(with absorb folded) + RoPE
# row-tiled over B*S
# ---------------------------------------------------------------------------
def _qkv_proj_kernel(x_ref, wa_ref, gkv_ref, gq_ref, wqb_ref,
                     cos_ref, slo_ref, shi_ref, q_out_ref, kv_out_ref, *, eps):
    cn = (((1,), (1,)), ((), ()))      # contract last dims: x @ W^T for PyTorch (out, in) weights
    x = x_ref[...].astype(jnp.bfloat16)

    # fused down projection: columns [kv_a(128) | q_a(64)] -> split on a 128-lane boundary
    a = lax.dot_general(x, wa_ref[...], cn, preferred_element_type=jnp.float32)   # (Tr, 192)
    kv = a[:, :KV_A_OUT]
    qa_in = a[:, KV_A_OUT:]

    cos = cos_ref[...]
    slo = slo_ref[...]
    shi = shi_ref[...]

    # ---- compressed_kv: RMSNorm(latent) | RoPE(k_pe) ----
    latent = _rms_normalize(kv[:, :KV_LORA_RANK], gkv_ref[...], eps)
    k_pe = _rope_apply(kv[:, KV_LORA_RANK:], cos, slo, shi)
    kv_out_ref[...] = jnp.concatenate([latent, k_pe], axis=-1).astype(kv_out_ref.dtype)

    # ---- query path: RMSNorm -> q_b (absorb + softmax scale + de-interleave folded in weights) ----
    qa = _rms_normalize(qa_in, gq_ref[...], eps).astype(jnp.bfloat16)
    q = lax.dot_general(qa, wqb_ref[...], cn, preferred_element_type=jnp.float32)  # (Tr, 1024)

    # per-head chunks [abs_nope(64) | rope(64)]: RoPE on the rope half via masked 128-wide tables
    ones = jnp.ones_like(cos)
    zeros = jnp.zeros_like(cos)
    cos_c = jnp.concatenate([ones, cos], axis=-1)     # (Tr, 128) - built once per grid step
    slo_c = jnp.concatenate([zeros, slo], axis=-1)
    shi_c = jnp.concatenate([zeros, shi], axis=-1)
    for h in range(NUM_HEADS):                        # static unroll, 128-lane-aligned slices/stores
        chunk = q[:, h * HEAD_LATENT:(h + 1) * HEAD_LATENT]
        chunk = _rope_apply(chunk, cos_c, slo_c, shi_c)
        q_out_ref[:, h * HEAD_LATENT:(h + 1) * HEAD_LATENT] = chunk.astype(q_out_ref.dtype)


# ---------------------------------------------------------------------------
# Kernel B: MLA attention core + o_proj (with W_UV folded) + residual + final RMSNorm
# grid over (batch, query-row tiles); full KV per program
# ---------------------------------------------------------------------------
def _mla_core_kernel(q_ref, kv_ref, x_ref, wvo_ref, g_ref, o_ref, *, eps):
    q = q_ref[...]                       # (tq, 1024) bf16: per head [abs_nope(64)|roped rope(64)]
    kv = kv_ref[...]                     # (S, 128)  bf16: [latent(64)|roped k_pe(64)]
    latent = kv[:, :KV_LORA_RANK]
    kv_t = kv.T                          # (128, S): transpose hoisted out of the per-head loop

    ctx_chunks = []
    pair = []
    for h in range(NUM_HEADS):           # static unroll; all q slices 128-lane aligned
        qc_h = q[:, h * HEAD_LATENT:(h + 1) * HEAD_LATENT]                       # (tq, 128)
        s = jnp.dot(qc_h, kv_t, preferred_element_type=jnp.float32)              # (tq, S)
        m = jnp.max(s, axis=-1, keepdims=True)
        p = jnp.exp(s - m)
        denom = jnp.sum(p, axis=-1, keepdims=True)
        ctx_h = jnp.dot(p.astype(latent.dtype), latent,
                        preferred_element_type=jnp.float32)                      # (tq, 64)
        pair.append(ctx_h * pl.reciprocal(denom, approx=True))                   # fold 1/sum
        if h % 2 == 1:                   # pair adjacent heads -> 128-lane-aligned ctx pieces
            ctx_chunks.append(jnp.concatenate(pair, axis=-1))
            pair = []
    ctx = jnp.concatenate(ctx_chunks, axis=-1).astype(jnp.bfloat16)              # (tq, 512)

    # fused W_UV^T @ o_proj^T (dense 512x768) + residual + RMSNorm epilogue
    src2 = jnp.dot(ctx, wvo_ref[...], preferred_element_type=jnp.float32)        # (tq, 768)
    h_res = x_ref[...].astype(jnp.float32) + src2            # dropout == identity (eval mode)
    var = jnp.mean(h_res * h_res, axis=-1, keepdims=True)
    o_ref[...] = ((h_res * lax.rsqrt(var + eps)) * g_ref[...]).astype(o_ref.dtype)


# ---------------------------------------------------------------------------
# plain-JAX glue: RoPE tables (tiny), spec helpers, VMEM gating
# ---------------------------------------------------------------------------
def _rope_tables(batch, seq_len):
    inv_freq = 1.0 / (ROPE_THETA ** (
        jnp.arange(0, QK_ROPE_HEAD_DIM, 2, dtype=jnp.float32) / QK_ROPE_HEAD_DIM))
    t = jnp.arange(seq_len, dtype=jnp.float32)            # position_ids == arange(seq_len)
    freqs = jnp.outer(t, inv_freq)                        # (S, 32)
    cos = jnp.cos(freqs)
    sin = jnp.sin(freqs)
    zero = jnp.zeros_like(sin)
    cos_t = jnp.concatenate([cos, cos], axis=-1)          # (S, 64)
    sin_lo = jnp.concatenate([-sin, zero], axis=-1)       # multiplies roll(x, +32 lanes)
    sin_hi = jnp.concatenate([zero, sin], axis=-1)        # multiplies roll(x, -32 lanes)
    tile = lambda a: jnp.tile(a, (batch, 1))              # rows ordered (b, s) row-major
    return tile(cos_t), tile(sin_lo), tile(sin_hi)


def _row_spec(tile_rows, width):
    return pl.BlockSpec((tile_rows, width), lambda i: (i, 0))


def _bcast_spec(shape):
    zeros = (0,) * len(shape)
    return pl.BlockSpec(shape, lambda *_: zeros)


@functools.lru_cache(maxsize=None)
def _vmem_limit_bytes():
    try:
        cap = int(pltpu.get_tpu_info().vmem_capacity_bytes)
    except Exception:                      # conservative fallback (safe on every generation)
        cap = 64 * 1024 * 1024
    return min(cap * 3 // 4, 96 * 1024 * 1024)


# ---------------------------------------------------------------------------
# Forward pass of TextPromptNetwork
# ---------------------------------------------------------------------------
def text_prompt_network_forward(params, src):
    B, S, D = src.shape
    assert D == D_MODEL
    BS = B * S
    x2d = src.reshape(BS, D)
    cos_t, sin_lo, sin_hi = _rope_tables(B, S)

    vmem_limit = _vmem_limit_bytes()
    big_vmem = vmem_limit >= 64 * 1024 * 1024          # v5e/v6e (128 MiB) vs v7x (64 MiB)

    # ---- kernel A: fused projections + RMSNorms + RoPE (row-tiled over B*S) ----
    row_target = 1024 if big_vmem else 512
    rows = BS if BS <= row_target else row_target
    n_row_blocks = pl.cdiv(BS, rows)

    q_buf, kv_buf = pl.pallas_call(
        functools.partial(_qkv_proj_kernel, eps=RMS_EPS),
        out_shape=(jax.ShapeDtypeStruct((BS, Q_LATENT_ALL), jnp.bfloat16),
                   jax.ShapeDtypeStruct((BS, HEAD_LATENT), jnp.bfloat16)),
        grid=(n_row_blocks,),
        in_specs=[
            _row_spec(rows, D_MODEL),
            _bcast_spec((DOWN_OUT, D_MODEL)),
            _bcast_spec((1, KV_LORA_RANK)),
            _bcast_spec((1, Q_LORA_RANK)),
            _bcast_spec((Q_LATENT_ALL, Q_LORA_RANK)),
            _row_spec(rows, QK_ROPE_HEAD_DIM),
            _row_spec(rows, QK_ROPE_HEAD_DIM),
            _row_spec(rows, QK_ROPE_HEAD_DIM),
        ],
        out_specs=(_row_spec(rows, Q_LATENT_ALL), _row_spec(rows, HEAD_LATENT)),
        compiler_params=pltpu.CompilerParams(dimension_semantics=("parallel",),
                                             vmem_limit_bytes=vmem_limit),
    )(x2d, params["w_a"], params["kv_a_gamma"], params["q_a_gamma"], params["w_qb"],
      cos_t, sin_lo, sin_hi)

    # ---- kernel B: MLA core + o_proj + residual + final RMSNorm ----
    # TODO(synk): scores use the whole KV per program; very long S would need flash-style
    #             online-softmax tiling over the KV axis as well.
    tq_target = 512 if big_vmem else 256
    tq = S if S <= tq_target else tq_target
    nq = pl.cdiv(S, tq)

    out = pl.pallas_call(
        functools.partial(_mla_core_kernel, eps=RMS_EPS),
        out_shape=jax.ShapeDtypeStruct((B, S, D_MODEL), src.dtype),
        grid=(B, nq),
        in_specs=[
            pl.BlockSpec((None, tq, Q_LATENT_ALL), lambda b, i: (b, i, 0)),
            pl.BlockSpec((None, S, HEAD_LATENT), lambda b, i: (b, 0, 0)),
            pl.BlockSpec((None, tq, D_MODEL), lambda b, i: (b, i, 0)),
            _bcast_spec((CTX_ALL, D_MODEL)),
            _bcast_spec((1, D_MODEL)),
        ],
        out_specs=pl.BlockSpec((None, tq, D_MODEL), lambda b, i: (b, i, 0)),
        compiler_params=pltpu.CompilerParams(dimension_semantics=("parallel", "parallel"),
                                             vmem_limit_bytes=vmem_limit),
    )(q_buf.reshape(B, S, Q_LATENT_ALL), kv_buf.reshape(B, S, HEAD_LATENT),
      src, params["w_vo"], params["norm_gamma"])

    return out


# ---------------------------------------------------------------------------
# One-time weight prep (pure JAX/numpy, outside the kernels)
# ---------------------------------------------------------------------------
def prepare_params(raw):
    """Fold (a) the DeepSeek RoPE de-interleave permutation, (b) the softmax scale, (c) the W_UK
    absorb, and (d) W_UV^T @ o_proj^T into the weights; fuse the kv_a/q_a down-projections.
    Keeps PyTorch (out, in) layouts so kernels contract last-dims (no runtime transposes)."""
    deint = np.concatenate([np.arange(0, QK_ROPE_HEAD_DIM, 2),
                            np.arange(1, QK_ROPE_HEAD_DIM, 2)])        # [0,2,...,62,1,3,...,63]

    # fused down projection: rows = [kv_a latent(64) | kv_a rope(64, de-interleaved) | q_a(64)]
    wkva = raw["kv_a_proj"]
    wkva = jnp.concatenate([wkva[:KV_LORA_RANK], wkva[KV_LORA_RANK:][deint]], axis=0)
    w_a = jnp.concatenate([wkva, raw["q_a_proj"]], axis=0).astype(jnp.bfloat16)   # (192, 768)

    # q_b with the nope->latent absorb folded: per head rows [W_UK^T @ wqb_nope (64) | rope(64)]
    wqb = raw["q_b_proj"]                                                          # (768, 64)
    kvb = raw["kv_b_proj"].reshape(NUM_HEADS, QK_NOPE_HEAD_DIM + V_HEAD_DIM, KV_LORA_RANK)
    w_uk = kvb[:, :QK_NOPE_HEAD_DIM, :]                      # (H, 32, 64)
    w_uv = kvb[:, QK_NOPE_HEAD_DIM:, :]                      # (H, 96, 64)
    rows = []
    for h in range(NUM_HEADS):
        w_nope_h = wqb[h * Q_HEAD_DIM: h * Q_HEAD_DIM + QK_NOPE_HEAD_DIM]         # (32, 64)
        w_rope_h = wqb[h * Q_HEAD_DIM + QK_NOPE_HEAD_DIM: (h + 1) * Q_HEAD_DIM]   # (64, 64)
        rows.append(jnp.matmul(w_uk[h].T, w_nope_h))         # absorbed nope -> latent (64, 64)
        rows.append(w_rope_h[deint])                         # rope, de-interleave folded
    w_qb = (jnp.concatenate(rows, axis=0) * SOFTMAX_SCALE).astype(jnp.bfloat16)   # (1024, 64)

    # W_UV^h^T folded into o_proj: dense (H*c, d_model) so src2 = ctx @ w_vo
    o_proj = raw["o_proj"]                                                         # (768, 768)
    blocks = []
    for h in range(NUM_HEADS):
        o_h = o_proj[:, h * V_HEAD_DIM:(h + 1) * V_HEAD_DIM]                      # (768, 96)
        blocks.append(jnp.matmul(w_uv[h].T, o_h.T))                               # (64, 768)
    w_vo = jnp.concatenate(blocks, axis=0).astype(jnp.bfloat16)                   # (512, 768)

    return {
        "w_a": w_a,
        "kv_a_gamma": raw["kv_a_layernorm"].reshape(1, -1).astype(jnp.float32),
        "q_a_gamma": raw["q_a_layernorm"].reshape(1, -1).astype(jnp.float32),
        "w_qb": w_qb,
        "w_vo": w_vo,
        "norm_gamma": raw["norm_weight"].reshape(1, -1).astype(jnp.float32),
    }


# ---------------------------------------------------------------------------
# Deterministic parameter init (PyTorch-like: Linear uniform range, RMSNorm ones)
# ---------------------------------------------------------------------------
def init_params(key):
    ks = jax.random.split(key, 5)

    def lin(k, out_f, in_f):
        bound = 1.0 / (in_f ** 0.5)
        return jax.random.uniform(k, (out_f, in_f), jnp.float32, -bound, bound)

    return {
        "q_a_proj": lin(ks[0], Q_LORA_RANK, D_MODEL),
        "q_a_layernorm": jnp.ones((Q_LORA_RANK,), jnp.float32),
        "q_b_proj": lin(ks[1], NUM_HEADS * Q_HEAD_DIM, Q_LORA_RANK),
        "kv_a_proj": lin(ks[2], KV_LORA_RANK + QK_ROPE_HEAD_DIM, D_MODEL),
        "kv_a_layernorm": jnp.ones((KV_LORA_RANK,), jnp.float32),
        "kv_b_proj": lin(ks[3], NUM_HEADS * (QK_NOPE_HEAD_DIM + V_HEAD_DIM), KV_LORA_RANK),
        "o_proj": lin(ks[4], D_MODEL, NUM_HEADS * V_HEAD_DIM),
        "norm_weight": jnp.ones((D_MODEL,), jnp.float32),
    }


if __name__ == "__main__":
    key = jax.random.PRNGKey(0)
    pkey, xkey = jax.random.split(key)
    raw_params = init_params(pkey)
    params = prepare_params(raw_params)    # one-time folding: permutation, scale, absorb, W_UV.o_proj

    B, S = 2, 8
    src = jax.random.normal(xkey, (B, S, D_MODEL), jnp.float32)

    fwd = jax.jit(text_prompt_network_forward)
    out = jax.block_until_ready(fwd(params, src))

    assert out.shape == (B, S, D_MODEL), out.shape
    assert bool(jnp.isfinite(out).all())
    print("KERNEL_OK")
</pallas_src>

<mosaic_0001>
module attributes {stable_mosaic.version = 11 : i64} {
  func.func @_mla_core_kernel(%arg0: i32, %arg1: i32, %arg2: memref<1x8x1024xbf16, #tpu.memory_space<vmem>>, %arg3: memref<1x8x128xbf16, #tpu.memory_space<vmem>>, %arg4: memref<1x8x768xf32, #tpu.memory_space<vmem>>, %arg5: memref<512x768xbf16, #tpu.memory_space<vmem>>, %arg6: memref<1x768xf32, #tpu.memory_space<vmem>>, %arg7: memref<1x8x768xf32, #tpu.memory_space<vmem>>) attributes {dimension_semantics = [#tpu.dimension_semantics<parallel>, #tpu.dimension_semantics<parallel>], iteration_bounds = array<i64: 2, 1>, scalar_prefetch = 0 : i64, scratch_operands = 0 : i64, tpu.core_type = #tpu.core_type<tc>, window_params = [{transform_indices = @transform_0, window_bounds = array<i64: 1, 8, 1024>}, {transform_indices = @transform_1, window_bounds = array<i64: 1, 8, 128>}, {transform_indices = @transform_2, window_bounds = array<i64: 1, 8, 768>}, {pipeline_mode = #tpu.pipeline_mode<synchronous>, transform_indices = @transform_3, window_bounds = array<i64: 512, 768>}, {pipeline_mode = #tpu.pipeline_mode<synchronous>, transform_indices = @transform_4, window_bounds = array<i64: 1, 768>}, {transform_indices = @transform_5, window_bounds = array<i64: 1, 8, 768>}]} {
    %c0 = arith.constant 0 : index
    %c0_0 = arith.constant 0 : index
    %c0_1 = arith.constant 0 : index
    %0 = vector.load %arg2[%c0, %c0_0, %c0_1] : memref<1x8x1024xbf16, #tpu.memory_space<vmem>>, vector<1x8x1024xbf16>
    %1 = vector.shape_cast %0 : vector<1x8x1024xbf16> to vector<8x1024xbf16>
    %c0_2 = arith.constant 0 : index
    %c0_3 = arith.constant 0 : index
    %c0_4 = arith.constant 0 : index
    %2 = vector.load %arg3[%c0_2, %c0_3, %c0_4] : memref<1x8x128xbf16, #tpu.memory_space<vmem>>, vector<1x8x128xbf16>
    %3 = vector.shape_cast %2 : vector<1x8x128xbf16> to vector<8x128xbf16>
    %4 = vector.extract_strided_slice %3 {offsets = [0, 0], sizes = [8, 64], strides = [1, 1]} : vector<8x128xbf16> to vector<8x64xbf16>
    %5 = tpu.transpose %3, [1, 0] : vector<8x128xbf16> -> vector<128x8xbf16>
    %6 = vector.extract_strided_slice %1 {offsets = [0, 0], sizes = [8, 128], strides = [1, 1]} : vector<8x1024xbf16> to vector<8x128xbf16>
    %cst = arith.constant dense<0.000000e+00> : vector<8x8xf32>
    %7 = tpu.matmul %6, %5, %cst {dimension_numbers = #tpu.dot_dimension_numbers<[1], [0], [0], [1], [0, 0, 1, 1], [], []>} : vector<8x128xbf16>, vector<128x8xbf16>, vector<8x8xf32> -> vector<8x8xf32>
    %cst_5 = arith.constant dense<0xFF800000> : vector<8xf32>
    %8 = vector.multi_reduction <maximumf>, %7, %cst_5 [1] : vector<8x8xf32> to vector<8xf32>
    %9 = vector.shape_cast %8 : vector<8xf32> to vector<8x1xf32>
    %10 = vector.broadcast %9 : vector<8x1xf32> to vector<8x8xf32>
    %11 = arith.subf %7, %10 : vector<8x8xf32>
    %12 = math.exp %11 : vector<8x8xf32>
    %cst_6 = arith.constant dense<0.000000e+00> : vector<8xf32>
    %13 = vector.multi_reduction <add>, %12, %cst_6 [1] : vector<8x8xf32> to vector<8xf32>
    %14 = vector.shape_cast %13 : vector<8xf32> to vector<8x1xf32>
    %15 = arith.truncf %12 : vector<8x8xf32> to vector<8x8xbf16>
    %cst_7 = arith.constant dense<0.000000e+00> : vector<8x64xf32>
    %16 = tpu.matmul %15, %4, %cst_7 {dimension_numbers = #tpu.dot_dimension_numbers<[1], [0], [0], [1], [0, 0, 1, 1], [], []>} : vector<8x8xbf16>, vector<8x64xbf16>, vector<8x64xf32> -> vector<8x64xf32>
    %17 = tpu.reciprocal %14 {approx = true} : vector<8x1xf32> -> vector<8x1xf32>
    %18 = vector.broadcast %17 : vector<8x1xf32> to vector<8x64xf32>
    %19 = arith.mulf %16, %18 : vector<8x64xf32>
    %20 = vector.extract_strided_slice %1 {offsets = [0, 128], sizes = [8, 128], strides = [1, 1]} : vector<8x1024xbf16> to vector<8x128xbf16>
    %cst_8 = arith.constant dense<0.000000e+00> : vector<8x8xf32>
    %21 = tpu.matmul %20, %5, %cst_8 {dimension_numbers = #tpu.dot_dimension_numbers<[1], [0], [0], [1], [0, 0, 1, 1], [], []>} : vector<8x128xbf16>, vector<128x8xbf16>, vector<8x8xf32> -> vector<8x8xf32>
    %cst_9 = arith.constant dense<0xFF800000> : vector<8xf32>
    %22 = vector.multi_reduction <maximumf>, %21, %cst_9 [1] : vector<8x8xf32> to vector<8xf32>
    %23 = vector.shape_cast %22 : vector<8xf32> to vector<8x1xf32>
    %24 = vector.broadcast %23 : vector<8x1xf32> to vector<8x8xf32>
    %25 = arith.subf %21, %24 : vector<8x8xf32>
    %26 = math.exp %25 : vector<8x8xf32>
    %cst_10 = arith.constant dense<0.000000e+00> : vector<8xf32>
    %27 = vector.multi_reduction <add>, %26, %cst_10 [1] : vector<8x8xf32> to vector<8xf32>
    %28 = vector.shape_cast %27 : vector<8xf32> to vector<8x1xf32>
    %29 = arith.truncf %26 : vector<8x8xf32> to vector<8x8xbf16>
    %cst_11 = arith.constant dense<0.000000e+00> : vector<8x64xf32>
    %30 = tpu.matmul %29, %4, %cst_11 {dimension_numbers = #tpu.dot_dimension_numbers<[1], [0], [0], [1], [0, 0, 1, 1], [], []>} : vector<8x8xbf16>, vector<8x64xbf16>, vector<8x64xf32> -> vector<8x64xf32>
    %31 = tpu.reciprocal %28 {approx = true} : vector<8x1xf32> -> vector<8x1xf32>
    %32 = vector.broadcast %31 : vector<8x1xf32> to vector<8x64xf32>
    %33 = arith.mulf %30, %32 : vector<8x64xf32>
    %34 = tpu.concatenate %19, %33 in 1 : vector<8x64xf32>, vector<8x64xf32> -> vector<8x128xf32>
    %35 = vector.extract_strided_slice %1 {offsets = [0, 256], sizes = [8, 128], strides = [1, 1]} : vector<8x1024xbf16> to vector<8x128xbf16>
    %cst_12 = arith.constant dense<0.000000e+00> : vector<8x8xf32>
    %36 = tpu.matmul %35, %5, %cst_12 {dimension_numbers = #tpu.dot_dimension_numbers<[1], [0], [0], [1], [0, 0, 1, 1], [], []>} : vector<8x128xbf16>, vector<128x8xbf16>, vector<8x8xf32> -> vector<8x8xf32>
    %cst_13 = arith.constant dense<0xFF800000> : vector<8xf32>
    %37 = vector.multi_reduction <maximumf>, %36, %cst_13 [1] : vector<8x8xf32> to vector<8xf32>
    %38 = vector.shape_cast %37 : vector<8xf32> to vector<8x1xf32>
    %39 = vector.broadcast %38 : vector<8x1xf32> to vector<8x8xf32>
    %40 = arith.subf %36, %39 : vector<8x8xf32>
    %41 = math.exp %40 : vector<8x8xf32>
    %cst_14 = arith.constant dense<0.000000e+00> : vector<8xf32>
    %42 = vector.multi_reduction <add>, %41, %cst_14 [1] : vector<8x8xf32> to vector<8xf32>
    %43 = vector.shape_cast %42 : vector<8xf32> to vector<8x1xf32>
    %44 = arith.truncf %41 : vector<8x8xf32> to vector<8x8xbf16>
    %cst_15 = arith.constant dense<0.000000e+00> : vector<8x64xf32>
    %45 = tpu.matmul %44, %4, %cst_15 {dimension_numbers = #tpu.dot_dimension_numbers<[1], [0], [0], [1], [0, 0, 1, 1], [], []>} : vector<8x8xbf16>, vector<8x64xbf16>, vector<8x64xf32> -> vector<8x64xf32>
    %46 = tpu.reciprocal %43 {approx = true} : vector<8x1xf32> -> vector<8x1xf32>
    %47 = vector.broadcast %46 : vector<8x1xf32> to vector<8x64xf32>
    %48 = arith.mulf %45, %47 : vector<8x64xf32>
    %49 = vector.extract_strided_slice %1 {offsets = [0, 384], sizes = [8, 128], strides = [1, 1]} : vector<8x1024xbf16> to vector<8x128xbf16>
    %cst_16 = arith.constant dense<0.000000e+00> : vector<8x8xf32>
    %50 = tpu.matmul %49, %5, %cst_16 {dimension_numbers = #tpu.dot_dimension_numbers<[1], [0], [0], [1], [0, 0, 1, 1], [], []>} : vector<8x128xbf16>, vector<128x8xbf16>, vector<8x8xf32> -> vector<8x8xf32>
    %cst_17 = arith.constant dense<0xFF800000> : vector<8xf32>
    %51 = vector.multi_reduction <maximumf>, %50, %cst_17 [1] : vector<8x8xf32> to vector<8xf32>
    %52 = vector.shape_cast %51 : vector<8xf32> to vector<8x1xf32>
    %53 = vector.broadcast %52 : vector<8x1xf32> to vector<8x8xf32>
    %54 = arith.subf %50, %53 : vector<8x8xf32>
    %55 = math.exp %54 : vector<8x8xf32>
    %cst_18 = arith.constant dense<0.000000e+00> : vector<8xf32>
    %56 = vector.multi_reduction <add>, %55, %cst_18 [1] : vector<8x8xf32> to vector<8xf32>
    %57 = vector.shape_cast %56 : vector<8xf32> to vector<8x1xf32>
    %58 = arith.truncf %55 : vector<8x8xf32> to vector<8x8xbf16>
    %cst_19 = arith.constant dense<0.000000e+00> : vector<8x64xf32>
    %59 = tpu.matmul %58, %4, %cst_19 {dimension_numbers = #tpu.dot_dimension_numbers<[1], [0], [0], [1], [0, 0, 1, 1], [], []>} : vector<8x8xbf16>, vector<8x64xbf16>, vector<8x64xf32> -> vector<8x64xf32>
    %60 = tpu.reciprocal %57 {approx = true} : vector<8x1xf32> -> vector<8x1xf32>
    %61 = vector.broadcast %60 : vector<8x1xf32> to vector<8x64xf32>
    %62 = arith.mulf %59, %61 : vector<8x64xf32>
    %63 = tpu.concatenate %48, %62 in 1 : vector<8x64xf32>, vector<8x64xf32> -> vector<8x128xf32>
    %64 = vector.extract_strided_slice %1 {offsets = [0, 512], sizes = [8, 128], strides = [1, 1]} : vector<8x1024xbf16> to vector<8x128xbf16>
    %cst_20 = arith.constant dense<0.000000e+00> : vector<8x8xf32>
    %65 = tpu.matmul %64, %5, %cst_20 {dimension_numbers = #tpu.dot_dimension_numbers<[1], [0], [0], [1], [0, 0, 1, 1], [], []>} : vector<8x128xbf16>, vector<128x8xbf16>, vector<8x8xf32> -> vector<8x8xf32>
    %cst_21 = arith.constant dense<0xFF800000> : vector<8xf32>
    %66 = vector.multi_reduction <maximumf>, %65, %cst_21 [1] : vector<8x8xf32> to vector<8xf32>
    %67 = vector.shape_cast %66 : vector<8xf32> to vector<8x1xf32>
    %68 = vector.broadcast %67 : vector<8x1xf32> to vector<8x8xf32>
    %69 = arith.subf %65, %68 : vector<8x8xf32>
    %70 = math.exp %69 : vector<8x8xf32>
    %cst_22 = arith.constant dense<0.000000e+00> : vector<8xf32>
    %71 = vector.multi_reduction <add>, %70, %cst_22 [1] : vector<8x8xf32> to vector<8xf32>
    %72 = vector.shape_cast %71 : vector<8xf32> to vector<8x1xf32>
    %73 = arith.truncf %70 : vector<8x8xf32> to vector<8x8xbf16>
    %cst_23 = arith.constant dense<0.000000e+00> : vector<8x64xf32>
    %74 = tpu.matmul %73, %4, %cst_23 {dimension_numbers = #tpu.dot_dimension_numbers<[1], [0], [0], [1], [0, 0, 1, 1], [], []>} : vector<8x8xbf16>, vector<8x64xbf16>, vector<8x64xf32> -> vector<8x64xf32>
    %75 = tpu.reciprocal %72 {approx = true} : vector<8x1xf32> -> vector<8x1xf32>
    %76 = vector.broadcast %75 : vector<8x1xf32> to vector<8x64xf32>
    %77 = arith.mulf %74, %76 : vector<8x64xf32>
    %78 = vector.extract_strided_slice %1 {offsets = [0, 640], sizes = [8, 128], strides = [1, 1]} : vector<8x1024xbf16> to vector<8x128xbf16>
    %cst_24 = arith.constant dense<0.000000e+00> : vector<8x8xf32>
    %79 = tpu.matmul %78, %5, %cst_24 {dimension_numbers = #tpu.dot_dimension_numbers<[1], [0], [0], [1], [0, 0, 1, 1], [], []>} : vector<8x128xbf16>, vector<128x8xbf16>, vector<8x8xf32> -> vector<8x8xf32>
    %cst_25 = arith.constant dense<0xFF800000> : vector<8xf32>
    %80 = vector.multi_reduction <maximumf>, %79, %cst_25 [1] : vector<8x8xf32> to vector<8xf32>
    %81 = vector.shape_cast %80 : vector<8xf32> to vector<8x1xf32>
    %82 = vector.broadcast %81 : vector<8x1xf32> to vector<8x8xf32>
    %83 = arith.subf %79, %82 : vector<8x8xf32>
    %84 = math.exp %83 : vector<8x8xf32>
    %cst_26 = arith.constant dense<0.000000e+00> : vector<8xf32>
    %85 = vector.multi_reduction <add>, %84, %cst_26 [1] : vector<8x8xf32> to vector<8xf32>
    %86 = vector.shape_cast %85 : vector<8xf32> to vector<8x1xf32>
    %87 = arith.truncf %84 : vector<8x8xf32> to vector<8x8xbf16>
    %cst_27 = arith.constant dense<0.000000e+00> : vector<8x64xf32>
    %88 = tpu.matmul %87, %4, %cst_27 {dimension_numbers = #tpu.dot_dimension_numbers<[1], [0], [0], [1], [0, 0, 1, 1], [], []>} : vector<8x8xbf16>, vector<8x64xbf16>, vector<8x64xf32> -> vector<8x64xf32>
    %89 = tpu.reciprocal %86 {approx = true} : vector<8x1xf32> -> vector<8x1xf32>
    %90 = vector.broadcast %89 : vector<8x1xf32> to vector<8x64xf32>
    %91 = arith.mulf %88, %90 : vector<8x64xf32>
    %92 = tpu.concatenate %77, %91 in 1 : vector<8x64xf32>, vector<8x64xf32> -> vector<8x128xf32>
    %93 = vector.extract_strided_slice %1 {offsets = [0, 768], sizes = [8, 128], strides = [1, 1]} : vector<8x1024xbf16> to vector<8x128xbf16>
    %cst_28 = arith.constant dense<0.000000e+00> : vector<8x8xf32>
    %94 = tpu.matmul %93, %5, %cst_28 {dimension_numbers = #tpu.dot_dimension_numbers<[1], [0], [0], [1], [0, 0, 1, 1], [], []>} : vector<8x128xbf16>, vector<128x8xbf16>, vector<8x8xf32> -> vector<8x8xf32>
    %cst_29 = arith.constant dense<0xFF800000> : vector<8xf32>
    %95 = vector.multi_reduction <maximumf>, %94, %cst_29 [1] : vector<8x8xf32> to vector<8xf32>
    %96 = vector.shape_cast %95 : vector<8xf32> to vector<8x1xf32>
    %97 = vector.broadcast %96 : vector<8x1xf32> to vector<8x8xf32>
    %98 = arith.subf %94, %97 : vector<8x8xf32>
    %99 = math.exp %98 : vector<8x8xf32>
    %cst_30 = arith.constant dense<0.000000e+00> : vector<8xf32>
    %100 = vector.multi_reduction <add>, %99, %cst_30 [1] : vector<8x8xf32> to vector<8xf32>
    %101 = vector.shape_cast %100 : vector<8xf32> to vector<8x1xf32>
    %102 = arith.truncf %99 : vector<8x8xf32> to vector<8x8xbf16>
    %cst_31 = arith.constant dense<0.000000e+00> : vector<8x64xf32>
    %103 = tpu.matmul %102, %4, %cst_31 {dimension_numbers = #tpu.dot_dimension_numbers<[1], [0], [0], [1], [0, 0, 1, 1], [], []>} : vector<8x8xbf16>, vector<8x64xbf16>, vector<8x64xf32> -> vector<8x64xf32>
    %104 = tpu.reciprocal %101 {approx = true} : vector<8x1xf32> -> vector<8x1xf32>
    %105 = vector.broadcast %104 : vector<8x1xf32> to vector<8x64xf32>
    %106 = arith.mulf %103, %105 : vector<8x64xf32>
    %107 = vector.extract_strided_slice %1 {offsets = [0, 896], sizes = [8, 128], strides = [1, 1]} : vector<8x1024xbf16> to vector<8x128xbf16>
    %cst_32 = arith.constant dense<0.000000e+00> : vector<8x8xf32>
    %108 = tpu.matmul %107, %5, %cst_32 {dimension_numbers = #tpu.dot_dimension_numbers<[1], [0], [0], [1], [0, 0, 1, 1], [], []>} : vector<8x128xbf16>, vector<128x8xbf16>, vector<8x8xf32> -> vector<8x8xf32>
    %cst_33 = arith.constant dense<0xFF800000> : vector<8xf32>
    %109 = vector.multi_reduction <maximumf>, %108, %cst_33 [1] : vector<8x8xf32> to vector<8xf32>
    %110 = vector.shape_cast %109 : vector<8xf32> to vector<8x1xf32>
    %111 = vector.broadcast %110 : vector<8x1xf32> to vector<8x8xf32>
    %112 = arith.subf %108, %111 : vector<8x8xf32>
    %113 = math.exp %112 : vector<8x8xf32>
    %cst_34 = arith.constant dense<0.000000e+00> : vector<8xf32>
    %114 = vector.multi_reduction <add>, %113, %cst_34 [1] : vector<8x8xf32> to vector<8xf32>
    %115 = vector.shape_cast %114 : vector<8xf32> to vector<8x1xf32>
    %116 = arith.truncf %113 : vector<8x8xf32> to vector<8x8xbf16>
    %cst_35 = arith.constant dense<0.000000e+00> : vector<8x64xf32>
    %117 = tpu.matmul %116, %4, %cst_35 {dimension_numbers = #tpu.dot_dimension_numbers<[1], [0], [0], [1], [0, 0, 1, 1], [], []>} : vector<8x8xbf16>, vector<8x64xbf16>, vector<8x64xf32> -> vector<8x64xf32>
    %118 = tpu.reciprocal %115 {approx = true} : vector<8x1xf32> -> vector<8x1xf32>
    %119 = vector.broadcast %118 : vector<8x1xf32> to vector<8x64xf32>
    %120 = arith.mulf %117, %119 : vector<8x64xf32>
    %121 = tpu.concatenate %106, %120 in 1 : vector<8x64xf32>, vector<8x64xf32> -> vector<8x128xf32>
    %122 = tpu.concatenate %34, %63, %92, %121 in 1 : vector<8x128xf32>, vector<8x128xf32>, vector<8x128xf32>, vector<8x128xf32> -> vector<8x512xf32>
    %123 = arith.truncf %122 : vector<8x512xf32> to vector<8x512xbf16>
    %c0_36 = arith.constant 0 : index
    %c0_37 = arith.constant 0 : index
    %124 = vector.load %arg5[%c0_36, %c0_37] : memref<512x768xbf16, #tpu.memory_space<vmem>>, vector<512x768xbf16>
    %cst_38 = arith.constant dense<0.000000e+00> : vector<8x768xf32>
    %125 = tpu.matmul %123, %124, %cst_38 {dimension_numbers = #tpu.dot_dimension_numbers<[1], [0], [0], [1], [0, 0, 1, 1], [], []>} : vector<8x512xbf16>, vector<512x768xbf16>, vector<8x768xf32> -> vector<8x768xf32>
    %c0_39 = arith.constant 0 : index
    %c0_40 = arith.constant 0 : index
    %c0_41 = arith.constant 0 : index
    %126 = vector.load %arg4[%c0_39, %c0_40, %c0_41] : memref<1x8x768xf32, #tpu.memory_space<vmem>>, vector<1x8x768xf32>
    %127 = vector.shape_cast %126 : vector<1x8x768xf32> to vector<8x768xf32>
    %128 = arith.addf %127, %125 : vector<8x768xf32>
    %129 = arith.mulf %128, %128 : vector<8x768xf32>
    %cst_42 = arith.constant dense<0.000000e+00> : vector<8xf32>
    %130 = vector.multi_reduction <add>, %129, %cst_42 [1] : vector<8x768xf32> to vector<8xf32>
    %131 = vector.shape_cast %130 : vector<8xf32> to vector<8x1xf32>
    %cst_43 = arith.constant 7.680000e+02 : f32
    %132 = vector.broadcast %cst_43 : f32 to vector<8x1xf32>
    %133 = arith.divf %131, %132 : vector<8x1xf32>
    %cst_44 = arith.constant 9.99999997E-7 : f32
    %134 = vector.broadcast %cst_44 : f32 to vector<8x1xf32>
    %135 = arith.addf %133, %134 : vector<8x1xf32>
    %136 = math.rsqrt %135 : vector<8x1xf32>
    %137 = vector.broadcast %136 : vector<8x1xf32> to vector<8x768xf32>
    %138 = arith.mulf %128, %137 : vector<8x768xf32>
    %c0_45 = arith.constant 0 : index
    %c0_46 = arith.constant 0 : index
    %139 = vector.load %arg6[%c0_45, %c0_46] : memref<1x768xf32, #tpu.memory_space<vmem>>, vector<1x768xf32>
    %140 = vector.broadcast %139 : vector<1x768xf32> to vector<8x768xf32>
    %141 = arith.mulf %138, %140 : vector<8x768xf32>
    %c0_47 = arith.constant 0 : index
    %c0_48 = arith.constant 0 : index
    %c0_49 = arith.constant 0 : index
    %142 = vector.load %arg7[%c0_47, %c0_48, %c0_49] : memref<1x8x768xf32, #tpu.memory_space<vmem>>, vector<1x8x768xf32>
    %143 = vector.shape_cast %142 : vector<1x8x768xf32> to vector<8x768xf32>
    %144 = vector.shape_cast %141 : vector<8x768xf32> to vector<1x8x768xf32>
    tpu.vector_store %arg7[%c0_47, %c0_48, %c0_49], %144 {strides = array<i32>} : memref<1x8x768xf32, #tpu.memory_space<vmem>>, vector<1x8x768xf32>,
    return
  }
  func.func @transform_0(%arg0: i32, %arg1: i32) -> (i32, i32, i32) {
    %c0_i32 = arith.constant 0 : i32
    %c0_i32_0 = arith.constant 0 : i32
    return %arg0, %arg1, %c0_i32 : i32, i32, i32
  }
  func.func @transform_1(%arg0: i32, %arg1: i32) -> (i32, i32, i32) {
    %c0_i32 = arith.constant 0 : i32
    %c0_i32_0 = arith.constant 0 : i32
    %c0_i32_1 = arith.constant 0 : i32
    return %arg0, %c0_i32, %c0_i32_0 : i32, i32, i32
  }
  func.func @transform_2(%arg0: i32, %arg1: i32) -> (i32, i32, i32) {
    %c0_i32 = arith.constant 0 : i32
    %c0_i32_0 = arith.constant 0 : i32
    return %arg0, %arg1, %c0_i32 : i32, i32, i32
  }
  func.func @transform_3(%arg0: i32, %arg1: i32) -> (i32, i32) {
    %c0_i32 = arith.constant 0 : i32
    %c0_i32_0 = arith.constant 0 : i32
    %c0_i32_1 = arith.constant 0 : i32
    return %c0_i32, %c0_i32_0 : i32, i32
  }
  func.func @transform_4(%arg0: i32, %arg1: i32) -> (i32, i32) {
    %c0_i32 = arith.constant 0 : i32
    %c0_i32_0 = arith.constant 0 : i32
    %c0_i32_1 = arith.constant 0 : i32
    return %c0_i32, %c0_i32_0 : i32, i32
  }
  func.func @transform_5(%arg0: i32, %arg1: i32) -> (i32, i32, i32) {
    %c0_i32 = arith.constant 0 : i32
    %c0_i32_0 = arith.constant 0 : i32
    return %arg0, %arg1, %c0_i32 : i32, i32, i32
  }
}

module attributes {stable_mosaic.version = 11 : i64} {
  func.func @_qkv_proj_kernel(%arg0: i32, %arg1: memref<16x768xf32, #tpu.memory_space<vmem>>, %arg2: memref<192x768xbf16, #tpu.memory_space<vmem>>, %arg3: memref<1x64xf32, #tpu.memory_space<vmem>>, %arg4: memref<1x64xf32, #tpu.memory_space<vmem>>, %arg5: memref<1024x64xbf16, #tpu.memory_space<vmem>>, %arg6: memref<16x64xf32, #tpu.memory_space<vmem>>, %arg7: memref<16x64xf32, #tpu.memory_space<vmem>>, %arg8: memref<16x64xf32, #tpu.memory_space<vmem>>, %arg9: memref<16x1024xbf16, #tpu.memory_space<vmem>>, %arg10: memref<16x128xbf16, #tpu.memory_space<vmem>>) attributes {dimension_semantics = [#tpu.dimension_semantics<parallel>], iteration_bounds = array<i64: 1>, scalar_prefetch = 0 : i64, scratch_operands = 0 : i64, tpu.core_type = #tpu.core_type<tc>, window_params = [{transform_indices = @transform_0, window_bounds = array<i64: 16, 768>}, {pipeline_mode = #tpu.pipeline_mode<synchronous>, transform_indices = @transform_1, window_bounds = array<i64: 192, 768>}, {pipeline_mode = #tpu.pipeline_mode<synchronous>, transform_indices = @transform_2, window_bounds = array<i64: 1, 64>}, {pipeline_mode = #tpu.pipeline_mode<synchronous>, transform_indices = @transform_3, window_bounds = array<i64: 1, 64>}, {pipeline_mode = #tpu.pipeline_mode<synchronous>, transform_indices = @transform_4, window_bounds = array<i64: 1024, 64>}, {transform_indices = @transform_5, window_bounds = array<i64: 16, 64>}, {transform_indices = @transform_6, window_bounds = array<i64: 16, 64>}, {transform_indices = @transform_7, window_bounds = array<i64: 16, 64>}, {transform_indices = @transform_8, window_bounds = array<i64: 16, 1024>}, {transform_indices = @transform_9, window_bounds = array<i64: 16, 128>}]} {
    %c0 = arith.constant 0 : index
    %c0_0 = arith.constant 0 : index
    %0 = vector.load %arg1[%c0, %c0_0] : memref<16x768xf32, #tpu.memory_space<vmem>>, vector<16x768xf32>
    %1 = arith.truncf %0 : vector<16x768xf32> to vector<16x768xbf16>
    %c0_1 = arith.constant 0 : index
    %c0_2 = arith.constant 0 : index
    %2 = vector.load %arg2[%c0_1, %c0_2] : memref<192x768xbf16, #tpu.memory_space<vmem>>, vector<192x768xbf16>
    %cst = arith.constant dense<0.000000e+00> : vector<16x192xf32>
    %3 = tpu.matmul %1, %2, %cst {dimension_numbers = #tpu.dot_dimension_numbers<[1], [1], [0], [0], [0, 0, 1, 0], [], []>} : vector<16x768xbf16>, vector<192x768xbf16>, vector<16x192xf32> -> vector<16x192xf32>
    %4 = vector.extract_strided_slice %3 {offsets = [0, 0], sizes = [16, 128], strides = [1, 1]} : vector<16x192xf32> to vector<16x128xf32>
    %5 = vector.extract_strided_slice %3 {offsets = [0, 128], sizes = [16, 64], strides = [1, 1]} : vector<16x192xf32> to vector<16x64xf32>
    %c0_3 = arith.constant 0 : index
    %c0_4 = arith.constant 0 : index
    %6 = vector.load %arg6[%c0_3, %c0_4] : memref<16x64xf32, #tpu.memory_space<vmem>>, vector<16x64xf32>
    %c0_5 = arith.constant 0 : index
    %c0_6 = arith.constant 0 : index
    %7 = vector.load %arg7[%c0_5, %c0_6] : memref<16x64xf32, #tpu.memory_space<vmem>>, vector<16x64xf32>
    %c0_7 = arith.constant 0 : index
    %c0_8 = arith.constant 0 : index
    %8 = vector.load %arg8[%c0_7, %c0_8] : memref<16x64xf32, #tpu.memory_space<vmem>>, vector<16x64xf32>
    %9 = vector.extract_strided_slice %4 {offsets = [0, 0], sizes = [16, 64], strides = [1, 1]} : vector<16x128xf32> to vector<16x64xf32>
    %c0_9 = arith.constant 0 : index
    %c0_10 = arith.constant 0 : index
    %10 = vector.load %arg3[%c0_9, %c0_10] : memref<1x64xf32, #tpu.memory_space<vmem>>, vector<1x64xf32>
    %11 = arith.mulf %9, %9 : vector<16x64xf32>
    %cst_11 = arith.constant dense<0.000000e+00> : vector<16xf32>
    %12 = vector.multi_reduction <add>, %11, %cst_11 [1] : vector<16x64xf32> to vector<16xf32>
    %13 = vector.shape_cast %12 : vector<16xf32> to vector<16x1xf32>
    %cst_12 = arith.constant 6.400000e+01 : f32
    %14 = vector.broadcast %cst_12 : f32 to vector<16x1xf32>
    %15 = arith.divf %13, %14 : vector<16x1xf32>
    %cst_13 = arith.constant 9.99999997E-7 : f32
    %16 = vector.broadcast %cst_13 : f32 to vector<16x1xf32>
    %17 = arith.addf %15, %16 : vector<16x1xf32>
    %18 = math.rsqrt %17 : vector<16x1xf32>
    %19 = vector.broadcast %18 : vector<16x1xf32> to vector<16x64xf32>
    %20 = arith.mulf %9, %19 : vector<16x64xf32>
    %21 = vector.broadcast %10 : vector<1x64xf32> to vector<16x64xf32>
    %22 = arith.mulf %20, %21 : vector<16x64xf32>
    %23 = vector.extract_strided_slice %4 {offsets = [0, 64], sizes = [16, 64], strides = [1, 1]} : vector<16x128xf32> to vector<16x64xf32>
    %24 = vector.extract_strided_slice %23 {offsets = [0, 32], sizes = [16, 32], strides = [1, 1]} : vector<16x64xf32> to vector<16x32xf32>
    %25 = vector.extract_strided_slice %23 {offsets = [0, 0], sizes = [16, 32], strides = [1, 1]} : vector<16x64xf32> to vector<16x32xf32>
    %26 = tpu.concatenate %24, %25 in 1 : vector<16x32xf32>, vector<16x32xf32> -> vector<16x64xf32>
    %27 = vector.extract_strided_slice %23 {offsets = [0, 32], sizes = [16, 32], strides = [1, 1]} : vector<16x64xf32> to vector<16x32xf32>
    %28 = vector.extract_strided_slice %23 {offsets = [0, 0], sizes = [16, 32], strides = [1, 1]} : vector<16x64xf32> to vector<16x32xf32>
    %29 = tpu.concatenate %27, %28 in 1 : vector<16x32xf32>, vector<16x32xf32> -> vector<16x64xf32>
    %30 = arith.mulf %23, %6 : vector<16x64xf32>
    %31 = arith.mulf %26, %7 : vector<16x64xf32>
    %32 = arith.addf %30, %31 : vector<16x64xf32>
    %33 = arith.mulf %29, %8 : vector<16x64xf32>
    %34 = arith.addf %32, %33 : vector<16x64xf32>
    %35 = tpu.concatenate %22, %34 in 1 : vector<16x64xf32>, vector<16x64xf32> -> vector<16x128xf32>
    %36 = arith.truncf %35 : vector<16x128xf32> to vector<16x128xbf16>
    %c0_14 = arith.constant 0 : index
    %c0_15 = arith.constant 0 : index
    %37 = vector.load %arg10[%c0_14, %c0_15] : memref<16x128xbf16, #tpu.memory_space<vmem>>, vector<16x128xbf16>
    tpu.vector_store %arg10[%c0_14, %c0_15], %36 {strides = array<i32>} : memref<16x128xbf16, #tpu.memory_space<vmem>>, vector<16x128xbf16>,
    %c0_16 = arith.constant 0 : index
    %c0_17 = arith.constant 0 : index
    %38 = vector.load %arg4[%c0_16, %c0_17] : memref<1x64xf32, #tpu.memory_space<vmem>>, vector<1x64xf32>
    %39 = arith.mulf %5, %5 : vector<16x64xf32>
    %cst_18 = arith.constant dense<0.000000e+00> : vector<16xf32>
    %40 = vector.multi_reduction <add>, %39, %cst_18 [1] : vector<16x64xf32> to vector<16xf32>
    %41 = vector.shape_cast %40 : vector<16xf32> to vector<16x1xf32>
    %cst_19 = arith.constant 6.400000e+01 : f32
    %42 = vector.broadcast %cst_19 : f32 to vector<16x1xf32>
    %43 = arith.divf %41, %42 : vector<16x1xf32>
    %cst_20 = arith.constant 9.99999997E-7 : f32
    %44 = vector.broadcast %cst_20 : f32 to vector<16x1xf32>
    %45 = arith.addf %43, %44 : vector<16x1xf32>
    %46 = math.rsqrt %45 : vector<16x1xf32>
    %47 = vector.broadcast %46 : vector<16x1xf32> to vector<16x64xf32>
    %48 = arith.mulf %5, %47 : vector<16x64xf32>
    %49 = vector.broadcast %38 : vector<1x64xf32> to vector<16x64xf32>
    %50 = arith.mulf %48, %49 : vector<16x64xf32>
    %51 = arith.truncf %50 : vector<16x64xf32> to vector<16x64xbf16>
    %c0_21 = arith.constant 0 : index
    %c0_22 = arith.constant 0 : index
    %52 = vector.load %arg5[%c0_21, %c0_22] : memref<1024x64xbf16, #tpu.memory_space<vmem>>, vector<1024x64xbf16>
    %cst_23 = arith.constant dense<0.000000e+00> : vector<16x1024xf32>
    %53 = tpu.matmul %51, %52, %cst_23 {dimension_numbers = #tpu.dot_dimension_numbers<[1], [1], [0], [0], [0, 0, 1, 0], [], []>} : vector<16x64xbf16>, vector<1024x64xbf16>, vector<16x1024xf32> -> vector<16x1024xf32>
    %cst_24 = arith.constant 1.000000e+00 : f32
    %54 = vector.broadcast %cst_24 : f32 to vector<16x64xf32>
    %cst_25 = arith.constant 0.000000e+00 : f32
    %55 = vector.broadcast %cst_25 : f32 to vector<16x64xf32>
    %56 = tpu.concatenate %54, %6 in 1 : vector<16x64xf32>, vector<16x64xf32> -> vector<16x128xf32>
    %57 = tpu.concatenate %55, %7 in 1 : vector<16x64xf32>, vector<16x64xf32> -> vector<16x128xf32>
    %58 = tpu.concatenate %55, %8 in 1 : vector<16x64xf32>, vector<16x64xf32> -> vector<16x128xf32>
    %59 = vector.extract_strided_slice %53 {offsets = [0, 0], sizes = [16, 128], strides = [1, 1]} : vector<16x1024xf32> to vector<16x128xf32>
    %60 = vector.extract_strided_slice %59 {offsets = [0, 32], sizes = [16, 96], strides = [1, 1]} : vector<16x128xf32> to vector<16x96xf32>
    %61 = vector.extract_strided_slice %59 {offsets = [0, 0], sizes = [16, 32], strides = [1, 1]} : vector<16x128xf32> to vector<16x32xf32>
    %62 = tpu.concatenate %60, %61 in 1 : vector<16x96xf32>, vector<16x32xf32> -> vector<16x128xf32>
    %63 = vector.extract_strided_slice %59 {offsets = [0, 96], sizes = [16, 32], strides = [1, 1]} : vector<16x128xf32> to vector<16x32xf32>
    %64 = vector.extract_strided_slice %59 {offsets = [0, 0], sizes = [16, 96], strides = [1, 1]} : vector<16x128xf32> to vector<16x96xf32>
    %65 = tpu.concatenate %63, %64 in 1 : vector<16x32xf32>, vector<16x96xf32> -> vector<16x128xf32>
    %66 = arith.mulf %59, %56 : vector<16x128xf32>
    %67 = arith.mulf %62, %57 : vector<16x128xf32>
    %68 = arith.addf %66, %67 : vector<16x128xf32>
    %69 = arith.mulf %65, %58 : vector<16x128xf32>
    %70 = arith.addf %68, %69 : vector<16x128xf32>
    %71 = arith.truncf %70 : vector<16x128xf32> to vector<16x128xbf16>
    %c0_26 = arith.constant 0 : index
    %c0_27 = arith.constant 0 : index
    %72 = vector.load %arg9[%c0_26, %c0_27] : memref<16x1024xbf16, #tpu.memory_space<vmem>>, vector<16x128xbf16>
    tpu.vector_store %arg9[%c0_26, %c0_27], %71 {strides = array<i32>} : memref<16x1024xbf16, #tpu.memory_space<vmem>>, vector<16x128xbf16>,
    %73 = vector.extract_strided_slice %53 {offsets = [0, 128], sizes = [16, 128], strides = [1, 1]} : vector<16x1024xf32> to vector<16x128xf32>
    %74 = vector.extract_strided_slice %73 {offsets = [0, 32], sizes = [16, 96], strides = [1, 1]} : vector<16x128xf32> to vector<16x96xf32>
    %75 = vector.extract_strided_slice %73 {offsets = [0, 0], sizes = [16, 32], strides = [1, 1]} : vector<16x128xf32> to vector<16x32xf32>
    %76 = tpu.concatenate %74, %75 in 1 : vector<16x96xf32>, vector<16x32xf32> -> vector<16x128xf32>
    %77 = vector.extract_strided_slice %73 {offsets = [0, 96], sizes = [16, 32], strides = [1, 1]} : vector<16x128xf32> to vector<16x32xf32>
    %78 = vector.extract_strided_slice %73 {offsets = [0, 0], sizes = [16, 96], strides = [1, 1]} : vector<16x128xf32> to vector<16x96xf32>
    %79 = tpu.concatenate %77, %78 in 1 : vector<16x32xf32>, vector<16x96xf32> -> vector<16x128xf32>
    %80 = arith.mulf %73, %56 : vector<16x128xf32>
    %81 = arith.mulf %76, %57 : vector<16x128xf32>
    %82 = arith.addf %80, %81 : vector<16x128xf32>
    %83 = arith.mulf %79, %58 : vector<16x128xf32>
    %84 = arith.addf %82, %83 : vector<16x128xf32>
    %85 = arith.truncf %84 : vector<16x128xf32> to vector<16x128xbf16>
    %c0_28 = arith.constant 0 : index
    %c128 = arith.constant 128 : index
    %86 = vector.load %arg9[%c0_28, %c128] : memref<16x1024xbf16, #tpu.memory_space<vmem>>, vector<16x128xbf16>
    tpu.vector_store %arg9[%c0_28, %c128], %85 {strides = array<i32>} : memref<16x1024xbf16, #tpu.memory_space<vmem>>, vector<16x128xbf16>,
    %87 = vector.extract_strided_slice %53 {offsets = [0, 256], sizes = [16, 128], strides = [1, 1]} : vector<16x1024xf32> to vector<16x128xf32>
    %88 = vector.extract_strided_slice %87 {offsets = [0, 32], sizes = [16, 96], strides = [1, 1]} : vector<16x128xf32> to vector<16x96xf32>
    %89 = vector.extract_strided_slice %87 {offsets = [0, 0], sizes = [16, 32], strides = [1, 1]} : vector<16x128xf32> to vector<16x32xf32>
    %90 = tpu.concatenate %88, %89 in 1 : vector<16x96xf32>, vector<16x32xf32> -> vector<16x128xf32>
    %91 = vector.extract_strided_slice %87 {offsets = [0, 96], sizes = [16, 32], strides = [1, 1]} : vector<16x128xf32> to vector<16x32xf32>
    %92 = vector.extract_strided_slice %87 {offsets = [0, 0], sizes = [16, 96], strides = [1, 1]} : vector<16x128xf32> to vector<16x96xf32>
    %93 = tpu.concatenate %91, %92 in 1 : vector<16x32xf32>, vector<16x96xf32> -> vector<16x128xf32>
    %94 = arith.mulf %87, %56 : vector<16x128xf32>
    %95 = arith.mulf %90, %57 : vector<16x128xf32>
    %96 = arith.addf %94, %95 : vector<16x128xf32>
    %97 = arith.mulf %93, %58 : vector<16x128xf32>
    %98 = arith.addf %96, %97 : vector<16x128xf32>
    %99 = arith.truncf %98 : vector<16x128xf32> to vector<16x128xbf16>
    %c0_29 = arith.constant 0 : index
    %c256 = arith.constant 256 : index
    %100 = vector.load %arg9[%c0_29, %c256] : memref<16x1024xbf16, #tpu.memory_space<vmem>>, vector<16x128xbf16>
    tpu.vector_store %arg9[%c0_29, %c256], %99 {strides = array<i32>} : memref<16x1024xbf16, #tpu.memory_space<vmem>>, vector<16x128xbf16>,
    %101 = vector.extract_strided_slice %53 {offsets = [0, 384], sizes = [16, 128], strides = [1, 1]} : vector<16x1024xf32> to vector<16x128xf32>
    %102 = vector.extract_strided_slice %101 {offsets = [0, 32], sizes = [16, 96], strides = [1, 1]} : vector<16x128xf32> to vector<16x96xf32>
    %103 = vector.extract_strided_slice %101 {offsets = [0, 0], sizes = [16, 32], strides = [1, 1]} : vector<16x128xf32> to vector<16x32xf32>
    %104 = tpu.concatenate %102, %103 in 1 : vector<16x96xf32>, vector<16x32xf32> -> vector<16x128xf32>
    %105 = vector.extract_strided_slice %101 {offsets = [0, 96], sizes = [16, 32], strides = [1, 1]} : vector<16x128xf32> to vector<16x32xf32>
    %106 = vector.extract_strided_slice %101 {offsets = [0, 0], sizes = [16, 96], strides = [1, 1]} : vector<16x128xf32> to vector<16x96xf32>
    %107 = tpu.concatenate %105, %106 in 1 : vector<16x32xf32>, vector<16x96xf32> -> vector<16x128xf32>
    %108 = arith.mulf %101, %56 : vector<16x128xf32>
    %109 = arith.mulf %104, %57 : vector<16x128xf32>
    %110 = arith.addf %108, %109 : vector<16x128xf32>
    %111 = arith.mulf %107, %58 : vector<16x128xf32>
    %112 = arith.addf %110, %111 : vector<16x128xf32>
    %113 = arith.truncf %112 : vector<16x128xf32> to vector<16x128xbf16>
    %c0_30 = arith.constant 0 : index
    %c384 = arith.constant 384 : index
    %114 = vector.load %arg9[%c0_30, %c384] : memref<16x1024xbf16, #tpu.memory_space<vmem>>, vector<16x128xbf16>
    tpu.vector_store %arg9[%c0_30, %c384], %113 {strides = array<i32>} : memref<16x1024xbf16, #tpu.memory_space<vmem>>, vector<16x128xbf16>,
    %115 = vector.extract_strided_slice %53 {offsets = [0, 512], sizes = [16, 128], strides = [1, 1]} : vector<16x1024xf32> to vector<16x128xf32>
    %116 = vector.extract_strided_slice %115 {offsets = [0, 32], sizes = [16, 96], strides = [1, 1]} : vector<16x128xf32> to vector<16x96xf32>
    %117 = vector.extract_strided_slice %115 {offsets = [0, 0], sizes = [16, 32], strides = [1, 1]} : vector<16x128xf32> to vector<16x32xf32>
    %118 = tpu.concatenate %116, %117 in 1 : vector<16x96xf32>, vector<16x32xf32> -> vector<16x128xf32>
    %119 = vector.extract_strided_slice %115 {offsets = [0, 96], sizes = [16, 32], strides = [1, 1]} : vector<16x128xf32> to vector<16x32xf32>
    %120 = vector.extract_strided_slice %115 {offsets = [0, 0], sizes = [16, 96], strides = [1, 1]} : vector<16x128xf32> to vector<16x96xf32>
    %121 = tpu.concatenate %119, %120 in 1 : vector<16x32xf32>, vector<16x96xf32> -> vector<16x128xf32>
    %122 = arith.mulf %115, %56 : vector<16x128xf32>
    %123 = arith.mulf %118, %57 : vector<16x128xf32>
    %124 = arith.addf %122, %123 : vector<16x128xf32>
    %125 = arith.mulf %121, %58 : vector<16x128xf32>
    %126 = arith.addf %124, %125 : vector<16x128xf32>
    %127 = arith.truncf %126 : vector<16x128xf32> to vector<16x128xbf16>
    %c0_31 = arith.constant 0 : index
    %c512 = arith.constant 512 : index
    %128 = vector.load %arg9[%c0_31, %c512] : memref<16x1024xbf16, #tpu.memory_space<vmem>>, vector<16x128xbf16>
    tpu.vector_store %arg9[%c0_31, %c512], %127 {strides = array<i32>} : memref<16x1024xbf16, #tpu.memory_space<vmem>>, vector<16x128xbf16>,
    %129 = vector.extract_strided_slice %53 {offsets = [0, 640], sizes = [16, 128], strides = [1, 1]} : vector<16x1024xf32> to vector<16x128xf32>
    %130 = vector.extract_strided_slice %129 {offsets = [0, 32], sizes = [16, 96], strides = [1, 1]} : vector<16x128xf32> to vector<16x96xf32>
    %131 = vector.extract_strided_slice %129 {offsets = [0, 0], sizes = [16, 32], strides = [1, 1]} : vector<16x128xf32> to vector<16x32xf32>
    %132 = tpu.concatenate %130, %131 in 1 : vector<16x96xf32>, vector<16x32xf32> -> vector<16x128xf32>
    %133 = vector.extract_strided_slice %129 {offsets = [0, 96], sizes = [16, 32], strides = [1, 1]} : vector<16x128xf32> to vector<16x32xf32>
    %134 = vector.extract_strided_slice %129 {offsets = [0, 0], sizes = [16, 96], strides = [1, 1]} : vector<16x128xf32> to vector<16x96xf32>
    %135 = tpu.concatenate %133, %134 in 1 : vector<16x32xf32>, vector<16x96xf32> -> vector<16x128xf32>
    %136 = arith.mulf %129, %56 : vector<16x128xf32>
    %137 = arith.mulf %132, %57 : vector<16x128xf32>
    %138 = arith.addf %136, %137 : vector<16x128xf32>
    %139 = arith.mulf %135, %58 : vector<16x128xf32>
    %140 = arith.addf %138, %139 : vector<16x128xf32>
    %141 = arith.truncf %140 : vector<16x128xf32> to vector<16x128xbf16>
    %c0_32 = arith.constant 0 : index
    %c640 = arith.constant 640 : index
    %142 = vector.load %arg9[%c0_32, %c640] : memref<16x1024xbf16, #tpu.memory_space<vmem>>, vector<16x128xbf16>
    tpu.vector_store %arg9[%c0_32, %c640], %141 {strides = array<i32>} : memref<16x1024xbf16, #tpu.memory_space<vmem>>, vector<16x128xbf16>,
    %143 = vector.extract_strided_slice %53 {offsets = [0, 768], sizes = [16, 128], strides = [1, 1]} : vector<16x1024xf32> to vector<16x128xf32>
    %144 = vector.extract_strided_slice %143 {offsets = [0, 32], sizes = [16, 96], strides = [1, 1]} : vector<16x128xf32> to vector<16x96xf32>
    %145 = vector.extract_strided_slice %143 {offsets = [0, 0], sizes = [16, 32], strides = [1, 1]} : vector<16x128xf32> to vector<16x32xf32>
    %146 = tpu.concatenate %144, %145 in 1 : vector<16x96xf32>, vector<16x32xf32> -> vector<16x128xf32>
    %147 = vector.extract_strided_slice %143 {offsets = [0, 96], sizes = [16, 32], strides = [1, 1]} : vector<16x128xf32> to vector<16x32xf32>
    %148 = vector.extract_strided_slice %143 {offsets = [0, 0], sizes = [16, 96], strides = [1, 1]} : vector<16x128xf32> to vector<16x96xf32>
    %149 = tpu.concatenate %147, %148 in 1 : vector<16x32xf32>, vector<16x96xf32> -> vector<16x128xf32>
    %150 = arith.mulf %143, %56 : vector<16x128xf32>
    %151 = arith.mulf %146, %57 : vector<16x128xf32>
    %152 = arith.addf %150, %151 : vector<16x128xf32>
    %153 = arith.mulf %149, %58 : vector<16x128xf32>
    %154 = arith.addf %152, %153 : vector<16x128xf32>
    %155 = arith.truncf %154 : vector<16x128xf32> to vector<16x128xbf16>
    %c0_33 = arith.constant 0 : index
    %c768 = arith.constant 768 : index
    %156 = vector.load %arg9[%c0_33, %c768] : memref<16x1024xbf16, #tpu.memory_space<vmem>>, vector<16x128xbf16>
    tpu.vector_store %arg9[%c0_33, %c768], %155 {strides = array<i32>} : memref<16x1024xbf16, #tpu.memory_space<vmem>>, vector<16x128xbf16>,
    %157 = vector.extract_strided_slice %53 {offsets = [0, 896], sizes = [16, 128], strides = [1, 1]} : vector<16x1024xf32> to vector<16x128xf32>
    %158 = vector.extract_strided_slice %157 {offsets = [0, 32], sizes = [16, 96], strides = [1, 1]} : vector<16x128xf32> to vector<16x96xf32>
    %159 = vector.extract_strided_slice %157 {offsets = [0, 0], sizes = [16, 32], strides = [1, 1]} : vector<16x128xf32> to vector<16x32xf32>
    %160 = tpu.concatenate %158, %159 in 1 : vector<16x96xf32>, vector<16x32xf32> -> vector<16x128xf32>
    %161 = vector.extract_strided_slice %157 {offsets = [0, 96], sizes = [16, 32], strides = [1, 1]} : vector<16x128xf32> to vector<16x32xf32>
    %162 = vector.extract_strided_slice %157 {offsets = [0, 0], sizes = [16, 96], strides = [1, 1]} : vector<16x128xf32> to vector<16x96xf32>
    %163 = tpu.concatenate %161, %162 in 1 : vector<16x32xf32>, vector<16x96xf32> -> vector<16x128xf32>
    %164 = arith.mulf %157, %56 : vector<16x128xf32>
    %165 = arith.mulf %160, %57 : vector<16x128xf32>
    %166 = arith.addf %164, %165 : vector<16x128xf32>
    %167 = arith.mulf %163, %58 : vector<16x128xf32>
    %168 = arith.addf %166, %167 : vector<16x128xf32>
    %169 = arith.truncf %168 : vector<16x128xf32> to vector<16x128xbf16>
    %c0_34 = arith.constant 0 : index
    %c896 = arith.constant 896 : index
    %170 = vector.load %arg9[%c0_34, %c896] : memref<16x1024xbf16, #tpu.memory_space<vmem>>, vector<16x128xbf16>
    tpu.vector_store %arg9[%c0_34, %c896], %169 {strides = array<i32>} : memref<16x1024xbf16, #tpu.memory_space<vmem>>, vector<16x128xbf16>,
    return
  }
  func.func @transform_0(%arg0: i32) -> (i32, i32) {
    %c0_i32 = arith.constant 0 : i32
    %c0_i32_0 = arith.constant 0 : i32
    return %arg0, %c0_i32 : i32, i32
  }
  func.func @transform_1(%arg0: i32) -> (i32, i32) {
    %c0_i32 = arith.constant 0 : i32
    %c0_i32_0 = arith.constant 0 : i32
    %c0_i32_1 = arith.constant 0 : i32
    return %c0_i32, %c0_i32_0 : i32, i32
  }
  func.func @transform_2(%arg0: i32) -> (i32, i32) {
    %c0_i32 = arith.constant 0 : i32
    %c0_i32_0 = arith.constant 0 : i32
    %c0_i32_1 = arith.constant 0 : i32
    return %c0_i32, %c0_i32_0 : i32, i32
  }
  func.func @transform_3(%arg0: i32) -> (i32, i32) {
    %c0_i32 = arith.constant 0 : i32
    %c0_i32_0 = arith.constant 0 : i32
    %c0_i32_1 = arith.constant 0 : i32
    return %c0_i32, %c0_i32_0 : i32, i32
  }
  func.func @transform_4(%arg0: i32) -> (i32, i32) {
    %c0_i32 = arith.constant 0 : i32
    %c0_i32_0 = arith.constant 0 : i32
    %c0_i32_1 = arith.constant 0 : i32
    return %c0_i32, %c0_i32_0 : i32, i32
  }
  func.func @transform_5(%arg0: i32) -> (i32, i32) {
    %c0_i32 = arith.constant 0 : i32
    %c0_i32_0 = arith.constant 0 : i32
    return %arg0, %c0_i32 : i32, i32
  }
  func.func @transform_6(%arg0: i32) -> (i32, i32) {
    %c0_i32 = arith.constant 0 : i32
    %c0_i32_0 = arith.constant 0 : i32
    return %arg0, %c0_i32 : i32, i32
  }
  func.func @transform_7(%arg0: i32) -> (i32, i32) {
    %c0_i32 = arith.constant 0 : i32
    %c0_i32_0 = arith.constant 0 : i32
    return %arg0, %c0_i32 : i32, i32
  }
  func.func @transform_8(%arg0: i32) -> (i32, i32) {
    %c0_i32 = arith.constant 0 : i32
    %c0_i32_0 = arith.constant 0 : i32
    return %arg0, %c0_i32 : i32, i32
  }
  func.func @transform_9(%arg0: i32) -> (i32, i32) {
    %c0_i32 = arith.constant 0 : i32
    %c0_i32_0 = arith.constant 0 : i32
    return %arg0, %c0_i32 : i32, i32
  }
}

</mosaic_0001>

<bundles_post_ra>
// kernel: text_prompt_network_forward.2
= control target key start
LH: loop header
LB: loop body
LE: loop exit
PB: predicated region body
PF: predicated region fallthrough
CT: control target
= control target key end

     0   :  { %15 = vsyncpa [#allocation3], 0  ;;  %s3160_s0 = inlined_call_operand.hbm [shape: f32[16,768], index: 0, kind: input, shape index: {}]   ;;  %s3161_s1 = inlined_call_operand.hbm [shape: bf16[192,768], index: 1, kind: input, shape index: {}]   ;;  %s3162_s2 = inlined_call_operand.hbm [shape: f32[1,64], index: 2, kind: input, shape index: {}]   ;;  %s3163_s3 = inlined_call_operand.hbm [shape: f32[1,64], index: 3, kind: input, shape index: {}]   ;;  %s3164_s4 = inlined_call_operand.vmem [shape: bf16[1024,64], index: 4, kind: input, shape index: {}]   ;;  %s3165_s5 = inlined_call_operand.vmem [shape: f32[16,64], index: 5, kind: input, shape index: {}]   ;;  %s3166_s6 = inlined_call_operand.vmem [shape: f32[16,64], index: 6, kind: input, shape index: {}]   ;;  %s3167_s7 = inlined_call_operand.vmem [shape: f32[16,64], index: 7, kind: input, shape index: {}]   ;;  %s3168_s8 = inlined_call_operand.vmem [shape: bf16[16,1024], index: 8, kind: output, shape index: {0}]   ;;  %s3169_s9 = inlined_call_operand.vmem [shape: bf16[16,128], index: 9, kind: output, shape index: {1}]  }
   0x1   :  { %16 = vsyncpa [#allocation5], 0 }
   0x2   :  { %17 = vsyncpa [#allocation8], 0  ;;  %s2484_s30 = smov [#allocation4]   ;;  %s2390_s13 = scalar_lea.hbm %s3161_s1, 9216 }
   0x3   :  { %s35_s10 = sshll.u32 %s2484_s30, 4  ;;  %p2391_p0 = scmp.ne.s32.totalorder %s3161_s1, %s2390_s13  ;;  %s36_s10 = int_to_ptr.vmem [resolvable:$true] %s35_s10 }
   0x4   :  { %p2394_p1 = scmp.lt.u32.totalorder %s2390_s13, %s3161_s1 }
   0x6   :  { %p2396_p2 = pnand %p2394_p1, %p2391_p0 }
   0x8   :  { %2399 = shalt.err (!%p2396_p2)
}
   0x9   :  { %s2400_s18 = scalar_lea.vmem %s36_s10, 9216  ;;  %p2405_p4 = scmp.lt.s32.totalorder %s36_s10, %s36_s10 }
   0xa   :  { %p2401_p3 = scmp.ne.s32.totalorder %s36_s10, %s2400_s18  ;;  %p2406_p5 = scmp.lt.s32.totalorder %s2400_s18, %s2400_s18 }
   0xc   :  { %p2407_p6 = por %p2406_p5, %p2405_p4 }
   0xe   :  { %p2408_p7 = pnand %p2407_p6, %p2401_p3 }
  0x10   :  { %2411 = shalt.err (!%p2408_p7)
}
  0x11   :  { %s2485_s19 = smov 384   ;;  %s2486_s20 = smov 24  }
  0x12   :  { %41 = dma.hbm_to_vmem [thread:$0]  %s3161_s1, 9216, %s36_s10, [#allocation5], %s2485_s19, %s2485_s19, %s2486_s20  }
  0x13   :  { %s2487_s23 = smov [#allocation2]   ;;  %s2412_s27 = scalar_lea.hbm %s3160_s0, 1536 }
  0x14   :  { %s23_s24 = sshll.u32 %s2487_s23, 4  ;;  %p2413_p8 = scmp.ne.s32.totalorder %s3160_s0, %s2412_s27  ;;  %s24_s24 = int_to_ptr.vmem [resolvable:$true] %s23_s24 }
  0x15   :  { %p2416_p9 = scmp.lt.u32.totalorder %s2412_s27, %s3160_s0 }
  0x17   :  { %p2418_p10 = pnand %p2416_p9, %p2413_p8 }
  0x19   :  { %2421 = shalt.err (!%p2418_p10)
}
  0x1a   :  { %s2422_s12 = scalar_lea.vmem %s24_s24, 1536  ;;  %p2427_p12 = scmp.lt.s32.totalorder %s24_s24, %s24_s24 }
  0x1b   :  { %p2423_p11 = scmp.ne.s32.totalorder %s24_s24, %s2422_s12  ;;  %p2428_p13 = scmp.lt.s32.totalorder %s2422_s12, %s2422_s12 }
  0x1d   :  { %p2429_p0 = por %p2428_p13, %p2427_p12 }
  0x1f   :  { %p2430_p1 = pnand %p2429_p0, %p2423_p11 }
  0x21   :  { %2433 = shalt.err (!%p2430_p1)
}
  0x22   :  { %s2488_s1 = smov 768   ;;  %s2489_s10 = smov 48  }
  0x23   :  { %29 = dma.hbm_to_vmem [thread:$0]  %s3160_s0, 1536, %s24_s24, [#allocation3], %s2488_s1, %s2488_s1, %s2489_s10  }
  0x24   :  { %s2490_s15 = smov [#allocation6]   ;;  %s2491_s17 = smov [#allocation7]  }
  0x25   :  { %s48_s16 = sshll.u32 %s2490_s15, 4  ;;  %s58_s18 = sshll.u32 %s2491_s17, 4  ;;  %s49_s16 = int_to_ptr.vmem [resolvable:$true] %s48_s16  ;;  %s59_s18 = int_to_ptr.vmem [resolvable:$true] %s58_s18 }
  0x26   :  { %s2434_s21 = scalar_lea.hbm %s3162_s2, 16 }
  0x27   :  { %p2435_p2 = scmp.ne.s32.totalorder %s3162_s2, %s2434_s21  ;;  %p2438_p3 = scmp.lt.u32.totalorder %s2434_s21, %s3162_s2 }
  0x29   :  { %p2440_p4 = pnand %p2438_p3, %p2435_p2 }
  0x2b   :  { %2443 = shalt.err (!%p2440_p4)
}
  0x2c   :  { %s2444_s0 = scalar_lea.vmem %s49_s16, 16  ;;  %s2448_s24 = scalar_lea.vmem %s49_s16, 32 }
  0x2d   :  { %p2445_p5 = scmp.ne.s32.totalorder %s49_s16, %s2444_s0  ;;  %p2449_p6 = scmp.lt.s32.totalorder %s49_s16, %s49_s16 }
  0x2e   :  { %p2450_p7 = scmp.lt.s32.totalorder %s2448_s24, %s2444_s0 }
  0x30   :  { %p2451_p8 = por %p2450_p7, %p2449_p6 }
  0x32   :  { %p2452_p9 = pnand %p2451_p8, %p2445_p5 }
  0x34   :  { %2455 = shalt.err (!%p2452_p9)
}
  0x35   :  { %51 = dma.hbm_to_vmem [thread:$0]  %s3162_s2, 16, %s49_s16, [#allocation5]  }
  0x36   :  { %s2456_s11 = scalar_lea.hbm %s3163_s3, 16 }
  0x37   :  { %p2457_p10 = scmp.ne.s32.totalorder %s3163_s3, %s2456_s11  ;;  %p2460_p11 = scmp.lt.u32.totalorder %s2456_s11, %s3163_s3 }
  0x39   :  { %p2462_p12 = pnand %p2460_p11, %p2457_p10 }
  0x3b   :  { %2465 = shalt.err (!%p2462_p12)
}
  0x3c   :  { %s2466_s14 = scalar_lea.vmem %s59_s18, 16  ;;  %s2470_s15 = scalar_lea.vmem %s59_s18, 32 }
  0x3d   :  { %p2467_p13 = scmp.ne.s32.totalorder %s59_s18, %s2466_s14  ;;  %p2471_p0 = scmp.lt.s32.totalorder %s59_s18, %s59_s18 }
  0x3e   :  { %p2472_p1 = scmp.lt.s32.totalorder %s2470_s15, %s2466_s14 }
  0x40   :  { %p2473_p2 = por %p2472_p1, %p2471_p0 }
  0x42   :  { %p2474_p3 = pnand %p2473_p2, %p2467_p13 }
  0x44   :  { %2477 = shalt.err (!%p2474_p3)
}
  0x45   :  { %61 = dma.hbm_to_vmem [thread:$0]  %s3163_s3, 16, %s59_s18, [#allocation8]  }
  0x46   :  { %2478 = dma.done.wait [#allocation3], 1536  }
  0x47   :  { %2479 = vsyncadd [#allocation3], 4294965760 }
  0x48   :  { %2480 = dma.done.wait [#allocation5], 9232  }
  0x49   :  { %2481 = vsyncadd [#allocation5], 4294958064 }
  0x4a   :  { %2482 = dma.done.wait [#allocation8], 16  }
  0x4b   :  { %2483 = vsyncadd [#allocation8], 4294967280  ;;  %v2210_v0 = vld [vmem:[#allocation4 + $0x4] ss:$24 sps:$4 sm:$0xff]   ;;  %v2212_v1 = vld [vmem:[#allocation4] ss:$24 sps:$4 sm:$0xff]  }
  0x4c   :  { %533 = vmatprep.subr.bf16.mxu0 %v2210_v0  ;;  %v2213_v2 = vld [vmem:[#allocation4 + $0x34] ss:$24 sps:$4 sm:$0xff]   ;;  %v2215_v3 = vld [vmem:[#allocation4 + $0x30] ss:$24 sps:$4 sm:$0xff]   ;;  %v2216_v4 = vld [vmem:[#allocation4 + $0x64] ss:$24 sps:$4 sm:$0xff]  }
  0x4d   :  { %534 = vmatpush1.bf16.xpose.msra.mxu0 %v2212_v1  ;;  %v2218_v5 = vld [vmem:[#allocation4 + $0x60] ss:$24 sps:$4 sm:$0xff]   ;;  %v2219_v6 = vld [vmem:[#allocation4 + $0x94] ss:$24 sps:$4 sm:$0xff]   ;;  %v2221_v10 = vld [vmem:[#allocation4 + $0x90] ss:$24 sps:$4 sm:$0xff]  }
  0x4e   :  { %535 = vmatprep.subr.bf16.mxu0 %v2213_v2  ;;  %v84_v7 = vld [vmem:[#allocation2 + $0x8] sm:$0xff]  ;;  %v90_v8 = vld [vmem:[#allocation2 + $0x38] sm:$0xff]  ;;  %v83_v28 = vld [vmem:[#allocation2] sm:$0xff]  ;;  %vm671_vm0 = vcmask 523264   ;;  %s2492_s16 = smov 32   ;;  %s2493_s3 = smov 96  }
  0x4f   :  { %v96_v9 = vpack.c.bf16 %v90_v8, %v84_v7  ;;  %v2222_v11 = vld [vmem:[#allocation4 + $0xc4] ss:$24 sps:$4 sm:$0xff]   ;;  %v2224_v12 = vld [vmem:[#allocation4 + $0xc0] ss:$24 sps:$4 sm:$0xff]   ;;  %v2225_v13 = vld [vmem:[#allocation4 + $0xf4] ss:$24 sps:$4 sm:$0xff]  }
  0x50   :  { %v2227_v14 = vld [vmem:[#allocation4 + $0xf0] ss:$24 sps:$4 sm:$0xff]   ;;  %v2228_v15 = vld [vmem:[#allocation4 + $0x124] ss:$24 sps:$4 sm:$0xff]   ;;  %v2230_v16 = vld [vmem:[#allocation4 + $0x120] ss:$24 sps:$4 sm:$0xff]  }
  0x51   :  { %565 = vmatprep.mubr.bf16.mxu0 %v96_v9  ;;  %v2231_v17 = vld [vmem:[#allocation4 + $0x154] ss:$24 sps:$4 sm:$0xff]   ;;  %v2233_v18 = vld [vmem:[#allocation4 + $0x150] ss:$24 sps:$4 sm:$0xff]   ;;  %v2234_v19 = vld [vmem:[#allocation4 + $0x184] ss:$24 sps:$4 sm:$0xff]  }
  0x52   :  { %v2236_v20 = vld [vmem:[#allocation4 + $0x180] ss:$24 sps:$4 sm:$0xff]   ;;  %v2237_v21 = vld [vmem:[#allocation4 + $0x1b4] ss:$24 sps:$4 sm:$0xff]   ;;  %v2239_v22 = vld [vmem:[#allocation4 + $0x1b0] ss:$24 sps:$4 sm:$0xff]  }
  0x53   :  { %v2240_v23 = vld [vmem:[#allocation4 + $0x1e4] ss:$24 sps:$4 sm:$0xff]   ;;  %v2242_v24 = vld [vmem:[#allocation4 + $0x1e0] ss:$24 sps:$4 sm:$0xff]   ;;  %v2243_v25 = vld [vmem:[#allocation4 + $0x214] ss:$24 sps:$4 sm:$0xff]  }
  0x54   :  { %v2245_v26 = vld [vmem:[#allocation4 + $0x210] ss:$24 sps:$4 sm:$0xff]   ;;  %v2248_v27 = vld [vmem:[#allocation4 + $0xc] ss:$24 sps:$4 sm:$0xff]   ;;  %v86_v30 = vld [vmem:[#allocation2 + $0x18] sm:$0xff]  ;;  %s2494_s24 = smov 64  }
  0x55   :  { %536 = vmatpush1.bf16.xpose.msra.mxu0 %v2215_v3  ;;  %v89_v29 = vld [vmem:[#allocation2 + $0x30] sm:$0xff]  ;;  %v92_v31 = vld [vmem:[#allocation2 + $0x48] sm:$0xff]  ;;  %v91_v59 = vld [vmem:[#allocation2 + $0x40] sm:$0xff]  ;;  %vm709_vm1 = vcmask 261120  }
  0x56   :  { %537 = vmatprep.subr.bf16.mxu0 %v2216_v4  ;;  %v95_v32 = vpack.c.bf16 %v89_v29, %v83_v28  ;;  %v2246_v33 = vld [vmem:[#allocation4 + $0x8] ss:$24 sps:$4 sm:$0xff]   ;;  %v98_v34 = vpack.c.bf16 %v92_v31, %v86_v30  ;;  %v2251_v35 = vld [vmem:[#allocation4 + $0x3c] ss:$24 sps:$4 sm:$0xff]   ;;  %v2249_v36 = vld [vmem:[#allocation4 + $0x38] ss:$24 sps:$4 sm:$0xff]  }
  0x57   :  { %v2254_v37 = vld [vmem:[#allocation4 + $0x6c] ss:$24 sps:$4 sm:$0xff]   ;;  %v2252_v38 = vld [vmem:[#allocation4 + $0x68] ss:$24 sps:$4 sm:$0xff]   ;;  %v2257_v39 = vld [vmem:[#allocation4 + $0x9c] ss:$24 sps:$4 sm:$0xff]  }
  0x58   :  { %v2255_v40 = vld [vmem:[#allocation4 + $0x98] ss:$24 sps:$4 sm:$0xff]   ;;  %v2260_v41 = vld [vmem:[#allocation4 + $0xcc] ss:$24 sps:$4 sm:$0xff]   ;;  %v2258_v42 = vld [vmem:[#allocation4 + $0xc8] ss:$24 sps:$4 sm:$0xff]  }
  0x59   :  { %v2263_v43 = vld [vmem:[#allocation4 + $0xfc] ss:$24 sps:$4 sm:$0xff]   ;;  %v2261_v44 = vld [vmem:[#allocation4 + $0xf8] ss:$24 sps:$4 sm:$0xff]   ;;  %v2266_v45 = vld [vmem:[#allocation4 + $0x12c] ss:$24 sps:$4 sm:$0xff]  }
  0x5a   :  { %v2264_v46 = vld [vmem:[#allocation4 + $0x128] ss:$24 sps:$4 sm:$0xff]   ;;  %v2269_v47 = vld [vmem:[#allocation4 + $0x15c] ss:$24 sps:$4 sm:$0xff]   ;;  %v2267_v48 = vld [vmem:[#allocation4 + $0x158] ss:$24 sps:$4 sm:$0xff]  }
  0x5b   :  { %v2272_v49 = vld [vmem:[#allocation4 + $0x18c] ss:$24 sps:$4 sm:$0xff]   ;;  %v2270_v50 = vld [vmem:[#allocation4 + $0x188] ss:$24 sps:$4 sm:$0xff]   ;;  %v2275_v51 = vld [vmem:[#allocation4 + $0x1bc] ss:$24 sps:$4 sm:$0xff]  }
  0x5c   :  { %v2273_v52 = vld [vmem:[#allocation4 + $0x1b8] ss:$24 sps:$4 sm:$0xff]   ;;  %v2278_v53 = vld [vmem:[#allocation4 + $0x1ec] ss:$24 sps:$4 sm:$0xff]   ;;  %v2276_v54 = vld [vmem:[#allocation4 + $0x1e8] ss:$24 sps:$4 sm:$0xff]  }
  0x5d   :  { %538 = vmatpush1.bf16.xpose.msra.mxu0 %v2218_v5  ;;  %v2281_v55 = vld [vmem:[#allocation4 + $0x21c] ss:$24 sps:$4 sm:$0xff]   ;;  %v2279_v56 = vld [vmem:[#allocation4 + $0x218] ss:$24 sps:$4 sm:$0xff]   ;;  %v88_v60 = vld [vmem:[#allocation2 + $0x28] sm:$0xff] }
  0x5e   :  { %539 = vmatprep.subr.bf16.mxu0 %v2219_v6  ;;  %v2284_v57 = vld [vmem:[#allocation4 + $0x14] ss:$24 sps:$4 sm:$0xff]   ;;  %v94_v61 = vld [vmem:[#allocation2 + $0x58] sm:$0xff]  ;;  %v2282_v63 = vld [vmem:[#allocation4 + $0x10] ss:$24 sps:$4 sm:$0xff]  }
  0x5f   :  { %v85_v58 = vld [vmem:[#allocation2 + $0x10] sm:$0xff]  ;;  %v100_v0 = vpack.c.bf16 %v94_v61, %v88_v60  ;;  %v2287_v1 = vld [vmem:[#allocation4 + $0x44] ss:$24 sps:$4 sm:$0xff]   ;;  %v2285_v2 = vld [vmem:[#allocation4 + $0x40] ss:$24 sps:$4 sm:$0xff]  }
  0x60   :  { %v97_v62 = vpack.c.bf16 %v91_v59, %v85_v58  ;;  %v2290_v3 = vld [vmem:[#allocation4 + $0x74] ss:$24 sps:$4 sm:$0xff]   ;;  %v2288_v4 = vld [vmem:[#allocation4 + $0x70] ss:$24 sps:$4 sm:$0xff]   ;;  %v2293_v5 = vld [vmem:[#allocation4 + $0xa4] ss:$24 sps:$4 sm:$0xff]  }
  0x61   :  { %v2291_v6 = vld [vmem:[#allocation4 + $0xa0] ss:$24 sps:$4 sm:$0xff]   ;;  %v2296_v7 = vld [vmem:[#allocation4 + $0xd4] ss:$24 sps:$4 sm:$0xff]   ;;  %v2294_v8 = vld [vmem:[#allocation4 + $0xd0] ss:$24 sps:$4 sm:$0xff]  }
  0x62   :  { %v2299_v9 = vld [vmem:[#allocation4 + $0x104] ss:$24 sps:$4 sm:$0xff]   ;;  %v2320_v28 = vld [vmem:[%s3164_s4 + $0x48] sm:$0xff]  }
  0x63   :  { %v2321_v30 = vld [vmem:[%s3164_s4 + $0x8] sm:$0xff]   ;;  %v2332_v58 = vld [vmem:[%s3164_s4 + $0x78] sm:$0xff]  }
  0x64   :  { %v1239_v31 = vsel %vm671_vm0, %v2321_v30, 0  ;;  %v2333_v59 = vld [vmem:[%s3164_s4 + $0x38] sm:$0xff]   ;;  %v663_v60 = vld [vmem:[%s3165_s5 + $0x8] sm:$0xff] }
  0x65   :  { %540 = vmatpush1.bf16.xpose.msra.mxu0 %v2221_v10  ;;  %v2297_v10 = vld [vmem:[#allocation4 + $0x100] ss:$24 sps:$4 sm:$0xff]   ;;  %v1257_v61 = vsel %vm671_vm0, %v2333_v59, 0 }
  0x66   :  { %541 = vmatprep.subr.bf16.mxu0 %v2222_v11  ;;  %v2302_v11 = vld [vmem:[#allocation4 + $0x134] ss:$24 sps:$4 sm:$0xff]   ;;  %v2350_v59 = vld [vmem:[%s3164_s4 + $0x140] sm:$0xff]  }
  0x6d   :  { %542 = vmatpush1.bf16.xpose.msra.mxu0 %v2224_v12  ;;  %v2300_v12 = vld [vmem:[#allocation4 + $0x130] ss:$24 sps:$4 sm:$0xff]  }
  0x6e   :  { %543 = vmatprep.subr.bf16.mxu0 %v2225_v13  ;;  %v2305_v13 = vld [vmem:[#allocation4 + $0x164] ss:$24 sps:$4 sm:$0xff]  }
  0x75   :  { %544 = vmatpush1.bf16.xpose.msra.mxu0 %v2227_v14  ;;  %v2303_v14 = vld [vmem:[#allocation4 + $0x160] ss:$24 sps:$4 sm:$0xff]  }
  0x76   :  { %545 = vmatprep.subr.bf16.mxu0 %v2228_v15  ;;  %v2308_v15 = vld [vmem:[#allocation4 + $0x194] ss:$24 sps:$4 sm:$0xff]  }
  0x7d   :  { %546 = vmatpush1.bf16.xpose.msra.mxu0 %v2230_v16  ;;  %v2306_v16 = vld [vmem:[#allocation4 + $0x190] ss:$24 sps:$4 sm:$0xff]  }
  0x7e   :  { %547 = vmatprep.subr.bf16.mxu0 %v2231_v17  ;;  %v2311_v17 = vld [vmem:[#allocation4 + $0x1c4] ss:$24 sps:$4 sm:$0xff]  }
  0x85   :  { %548 = vmatpush1.bf16.xpose.msra.mxu0 %v2233_v18  ;;  %v2309_v18 = vld [vmem:[#allocation4 + $0x1c0] ss:$24 sps:$4 sm:$0xff]  }
  0x86   :  { %549 = vmatprep.subr.bf16.mxu0 %v2234_v19  ;;  %v2314_v19 = vld [vmem:[#allocation4 + $0x1f4] ss:$24 sps:$4 sm:$0xff]  }
  0x8d   :  { %550 = vmatpush1.bf16.xpose.msra.mxu0 %v2236_v20  ;;  %v2312_v20 = vld [vmem:[#allocation4 + $0x1f0] ss:$24 sps:$4 sm:$0xff]  }
  0x8e   :  { %551 = vmatprep.subr.bf16.mxu0 %v2237_v21  ;;  %v2317_v21 = vld [vmem:[#allocation4 + $0x224] ss:$24 sps:$4 sm:$0xff]  }
  0x95   :  { %552 = vmatpush1.bf16.xpose.msra.mxu0 %v2239_v22  ;;  %v2315_v22 = vld [vmem:[#allocation4 + $0x220] ss:$24 sps:$4 sm:$0xff]  }
  0x96   :  { %553 = vmatprep.subr.bf16.mxu0 %v2240_v23  ;;  %v87_v23 = vld [vmem:[#allocation2 + $0x20] sm:$0xff] }
  0x9d   :  { %554 = vmatpush1.bf16.xpose.msra.mxu0 %v2242_v24  ;;  %v93_v24 = vld [vmem:[#allocation2 + $0x50] sm:$0xff] }
  0x9e   :  { %555 = vmatprep.subr.bf16.mxu0 %v2243_v25  ;;  %v99_v25 = vpack.c.bf16 %v93_v24, %v87_v23 }
  0xa5   :  { %556 = vmatpush1.bf16.xpose.msra.mxu0 %v2245_v26  ;;  %v2318_v26 = vld [vmem:[%s3164_s4 + $0x40] sm:$0xff]  }
  0xa6   :  { %576 = vmatprep.subr.bf16.mxu0 %v2248_v27  ;;  %v2319_v27 = vld [vmem:[%s3164_s4] sm:$0xff]   ;;  %2167 = vmatprep.subr.msk.bf16.mxu1 %vm671_vm0, %v2318_v26 }
  0xa7   :  { %v1236_v29 = vsel %vm671_vm0, %v2319_v27, 0 }
  0xa8   :  { %2088 = vmatpush3.bf16.xpose.msra.mxu1 %v1236_v29 }
  0xa9   :  { %2168 = vmatprep.subr.msk.bf16.mxu1 %vm671_vm0, %v2320_v28  ;;  %v1979_v28 = vld [vmem:[#allocation7] ss:$0 sm:$0xff] }
  0xac   :  { %566 = vmatmul.mubr.bf16.vlgmr.msra.gmra.mrb[0].mxu0 %v95_v32  ;;  %v2322_v32 = vld [vmem:[%s3164_s4 + $0x50] sm:$0xff]  }
  0xad   :  { %577 = vmatpush1.bf16.xpose.msra.mxu0 %v2246_v33  ;;  %608 = vmatprep.mubr.bf16.mxu0 %v98_v34  ;;  %v2323_v33 = vld [vmem:[%s3164_s4 + $0x10] sm:$0xff]  }
  0xae   :  { %578 = vmatprep.subr.bf16.mxu0 %v2251_v35  ;;  %v1242_v34 = vsel %vm671_vm0, %v2323_v33, 0  ;;  %v2324_v35 = vld [vmem:[%s3164_s4 + $0x58] sm:$0xff]  }
  0xb0   :  { %2090 = vmatpush3.bf16.xpose.msra.mxu1 %v1239_v31  ;;  %v2335_v31 = vld [vmem:[%s3164_s4 + $0x80] sm:$0xff]  }
  0xb1   :  { %2169 = vmatprep.subr.msk.bf16.mxu1 %vm671_vm0, %v2322_v32 }
  0xb5   :  { %579 = vmatpush1.bf16.xpose.msra.mxu0 %v2249_v36  ;;  %v2325_v36 = vld [vmem:[%s3164_s4 + $0x18] sm:$0xff]  }
  0xb6   :  { %580 = vmatprep.subr.bf16.mxu0 %v2254_v37  ;;  %v1245_v37 = vsel %vm671_vm0, %v2325_v36, 0  ;;  %v2336_v36 = vld [vmem:[%s3164_s4 + $0xc8] sm:$0xff]  }
  0xb8   :  { %2092 = vmatpush3.bf16.xpose.msra.mxu1 %v1242_v34 }
  0xb9   :  { %2170 = vmatprep.subr.msk.bf16.mxu1 %vm671_vm0, %v2324_v35  ;;  %v1284_v35 = vsel %vm671_vm0, %v2335_v31, 0 }
  0xbd   :  { %581 = vmatpush1.bf16.xpose.msra.mxu0 %v2252_v38  ;;  %v2326_v38 = vld [vmem:[%s3164_s4 + $0x60] sm:$0xff]  }
  0xbe   :  { %582 = vmatprep.subr.bf16.mxu0 %v2257_v39  ;;  %v2327_v39 = vld [vmem:[%s3164_s4 + $0x20] sm:$0xff]  }
  0xc0   :  { %2094 = vmatpush3.bf16.xpose.msra.mxu1 %v1245_v37  ;;  %v2337_v37 = vld [vmem:[%s3164_s4 + $0x88] sm:$0xff]  }
  0xc1   :  { %2171 = vmatprep.subr.msk.bf16.mxu1 %vm671_vm0, %v2326_v38  ;;  %v1287_v38 = vsel %vm671_vm0, %v2337_v37, 0 }
  0xc5   :  { %583 = vmatpush1.bf16.xpose.msra.mxu0 %v2255_v40  ;;  %v1248_v40 = vsel %vm671_vm0, %v2327_v39, 0  ;;  %v2338_v39 = vld [vmem:[%s3164_s4 + $0xd0] sm:$0xff]  }
  0xc6   :  { %584 = vmatprep.subr.bf16.mxu0 %v2260_v41 }
  0xc8   :  { %2096 = vmatpush3.bf16.xpose.msra.mxu1 %v1248_v40  ;;  %v2339_v40 = vld [vmem:[%s3164_s4 + $0x90] sm:$0xff]  }
  0xcd   :  { %585 = vmatpush1.bf16.xpose.msra.mxu0 %v2258_v42 }
  0xce   :  { %586 = vmatprep.subr.bf16.mxu0 %v2263_v43 }
  0xd5   :  { %587 = vmatpush1.bf16.xpose.msra.mxu0 %v2261_v44 }
  0xd6   :  { %588 = vmatprep.subr.bf16.mxu0 %v2266_v45 }
  0xdd   :  { %589 = vmatpush1.bf16.xpose.msra.mxu0 %v2264_v46 }
  0xde   :  { %590 = vmatprep.subr.bf16.mxu0 %v2269_v47 }
  0xe5   :  { %591 = vmatpush1.bf16.xpose.msra.mxu0 %v2267_v48 }
  0xe6   :  { %592 = vmatprep.subr.bf16.mxu0 %v2272_v49 }
  0xed   :  { %593 = vmatpush1.bf16.xpose.msra.mxu0 %v2270_v50 }
  0xee   :  { %594 = vmatprep.subr.bf16.mxu0 %v2275_v51  ;;  %v2328_v51 = vld [vmem:[%s3164_s4 + $0x68] sm:$0xff]  }
  0xef   :  { %2172 = vmatprep.subr.msk.bf16.mxu1 %vm671_vm0, %v2328_v51  ;;  %v2345_v51 = vld [vmem:[%s3164_s4 + $0xa8] sm:$0xff]  }
  0xf5   :  { %595 = vmatpush1.bf16.xpose.msra.mxu0 %v2273_v52  ;;  %v2329_v52 = vld [vmem:[%s3164_s4 + $0x28] sm:$0xff]  }
  0xf6   :  { %596 = vmatprep.subr.bf16.mxu0 %v2278_v53  ;;  %v1251_v53 = vsel %vm671_vm0, %v2329_v52, 0  ;;  %v1299_v52 = vsel %vm671_vm0, %v2345_v51, 0 }
  0xf7   :  { %2098 = vmatpush3.bf16.xpose.msra.mxu1 %v1251_v53  ;;  %v2346_v53 = vld [vmem:[%s3164_s4 + $0xf0] sm:$0xff]  }
  0xfd   :  { %597 = vmatpush1.bf16.xpose.msra.mxu0 %v2276_v54  ;;  %v2330_v54 = vld [vmem:[%s3164_s4 + $0x70] sm:$0xff]  }
  0xfe   :  { %598 = vmatprep.subr.bf16.mxu0 %v2281_v55  ;;  %v2331_v55 = vld [vmem:[%s3164_s4 + $0x30] sm:$0xff]   ;;  %2173 = vmatprep.subr.msk.bf16.mxu1 %vm671_vm0, %v2330_v54 }
  0xff   :  { %v2347_v54 = vld [vmem:[%s3164_s4 + $0xb0] sm:$0xff]  }
 0x105   :  { %599 = vmatpush1.bf16.xpose.msra.mxu0 %v2279_v56  ;;  %v1254_v56 = vsel %vm671_vm0, %v2331_v55, 0  ;;  %v1302_v55 = vsel %vm671_vm0, %v2347_v54, 0 }
 0x106   :  { %619 = vmatprep.subr.bf16.mxu0 %v2284_v57  ;;  %2100 = vmatpush3.bf16.xpose.msra.mxu1 %v1254_v56  ;;  %v662_v57 = vld [vmem:[%s3165_s5] sm:$0xff]  ;;  %v2348_v56 = vld [vmem:[%s3164_s4 + $0xf8] sm:$0xff]  }
 0x107   :  { %2174 = vmatprep.subr.msk.bf16.mxu1 %vm671_vm0, %v2332_v58 }
 0x10c   :  { %609 = vmatmul.mubr.bf16.vlgmr.msra.gmra.mrb[0].mxu0 %v97_v62  ;;  %v664_v62 = vld [vmem:[%s3166_s6] sm:$0xff] }
 0x10d   :  { %620 = vmatpush1.bf16.xpose.msra.mxu0 %v2282_v63  ;;  %651 = vmatprep.mubr.bf16.mxu0 %v100_v0  ;;  %v2334_v63 = vld [vmem:[%s3164_s4 + $0xc0] sm:$0xff]   ;;  %v665_v0 = vld [vmem:[%s3166_s6 + $0x8] sm:$0xff] }
 0x10e   :  { %621 = vmatprep.subr.bf16.mxu0 %v2287_v1  ;;  %2102 = vmatpush3.bf16.xpose.msra.mxu1 %v1257_v61  ;;  %v666_v1 = vld [vmem:[%s3167_s7] sm:$0xff] }
 0x10f   :  { %2175 = vmatprep.subr.msk.bf16.mxu1 %vm671_vm0, %v2334_v63  ;;  %v2353_v63 = vld [vmem:[%s3164_s4 + $0x108] sm:$0xff]  }
 0x115   :  { %622 = vmatpush1.bf16.xpose.msra.mxu0 %v2285_v2 }
 0x116   :  { %623 = vmatprep.subr.bf16.mxu0 %v2290_v3 }
 0x11d   :  { %624 = vmatpush1.bf16.xpose.msra.mxu0 %v2288_v4  ;;  %v667_v4 = vld [vmem:[%s3167_s7 + $0x8] sm:$0xff] }
 0x11e   :  { %625 = vmatprep.subr.bf16.mxu0 %v2293_v5 }
 0x125   :  { %626 = vmatpush1.bf16.xpose.msra.mxu0 %v2291_v6 }
 0x126   :  { %627 = vmatprep.subr.bf16.mxu0 %v2296_v7 }
 0x12d   :  { %628 = vmatpush1.bf16.xpose.msra.mxu0 %v2294_v8 }
 0x12e   :  { %629 = vmatprep.subr.bf16.mxu0 %v2299_v9 }
 0x135   :  { %630 = vmatpush1.bf16.xpose.msra.mxu0 %v2297_v10 }
 0x136   :  { %631 = vmatprep.subr.bf16.mxu0 %v2302_v11 }
 0x13d   :  { %632 = vmatpush1.bf16.xpose.msra.mxu0 %v2300_v12 }
 0x13e   :  { %633 = vmatprep.subr.bf16.mxu0 %v2305_v13 }
 0x145   :  { %634 = vmatpush1.bf16.xpose.msra.mxu0 %v2303_v14 }
 0x146   :  { %635 = vmatprep.subr.bf16.mxu0 %v2308_v15 }
 0x14d   :  { %636 = vmatpush1.bf16.xpose.msra.mxu0 %v2306_v16 }
 0x14e   :  { %637 = vmatprep.subr.bf16.mxu0 %v2311_v17 }
 0x155   :  { %638 = vmatpush1.bf16.xpose.msra.mxu0 %v2309_v18 }
 0x156   :  { %639 = vmatprep.subr.bf16.mxu0 %v2314_v19 }
 0x15d   :  { %640 = vmatpush1.bf16.xpose.msra.mxu0 %v2312_v20 }
 0x15e   :  { %641 = vmatprep.subr.bf16.mxu0 %v2317_v21 }
 0x165   :  { %642 = vmatpush1.bf16.xpose.msra.mxu0 %v2315_v22 }
 0x16c   :  { %652 = vmatmul.mubr.bf16.vlgmr.msra.gmra.mrb[0].mxu0 %v99_v25 }
 0x23f   :  { %v2633_v41 = vpop.f32.mrb[0].mxu0 }
 0x240   :  { %v2635_v42 = vpop.f32.mrb[1].mxu0  ;;  %v669_v43 = vmul.f32 %v2633_v41, %v2633_v41 }
 0x241   :  { %v2639_v44 = vpop.f32.mrb[2].mxu0  ;;  %v759_v45 = vmul.f32 %v2635_v42, %v2635_v42 }
 0x242   :  { %v2643_v46 = vpop.f32.mrb[3].mxu0  ;;  %v672_v47 = vsel %vm671_vm0, %v669_v43, 0.0  ;;  %v670_v2 = vmul.f32 %v2639_v44, %v2639_v44  ;;  %v2340_v43 = vld [vmem:[%s3164_s4 + $0xd8] sm:$0xff]  }
 0x243   :  { %v760_v48 = vmul.f32 %v2643_v46, %v2643_v46  ;;  %673 = vadd.xlane.f32.xlu1 %v672_v47  ;;  %v761_v49 = vsel %vm671_vm0, %v759_v45, 0.0  ;;  %v2341_v45 = vld [vmem:[%s3164_s4 + $0x98] sm:$0xff]   ;;  %v2342_v47 = vld [vmem:[%s3164_s4 + $0xe0] sm:$0xff]  }
 0x244   :  { %762 = vadd.xlane.f32.xlu0 %v761_v49  ;;  %v675_v3 = vsel %vm671_vm0, %v670_v2, 0.0  ;;  %v2354_v2 = vld [vmem:[%s3164_s4 + $0x150] sm:$0xff]  }
 0x245   :  { %v764_v50 = vsel %vm671_vm0, %v760_v48, 0.0  ;;  %v2343_v48 = vld [vmem:[%s3164_s4 + $0xa0] sm:$0xff]  }
 0x246   :  { %v1296_v49 = vsel %vm671_vm0, %v2343_v48, 0 }
 0x248   :  { %765 = vadd.xlane.f32.xlu0 %v764_v50  ;;  %v2344_v50 = vld [vmem:[%s3164_s4 + $0xe8] sm:$0xff]  }
 0x254   :  { %697 = vrot.lane.b32.xlu1 %v2633_v41, %s2492_s16 }
 0x258   :  { %703 = vrot.lane.b32.xlu1 %v2633_v41, %s2493_s3 }
 0x25c   :  { %705 = vrot.lane.b32.xlu1 %v2639_v44, %s2493_s3 }
 0x25e   :  { %699 = vrot.lane.b32.xlu0 %v2639_v44, %s2492_s16 }
 0x262   :  { %714 = vrot.lane.b32.xlu0 %v662_v57, %s2494_s24  ;;  %v2349_v57 = vld [vmem:[%s3164_s4 + $0xb8] sm:$0xff]  }
 0x263   :  { %v1305_v58 = vsel %vm671_vm0, %v2349_v57, 0 }
 0x266   :  { %716 = vrot.lane.b32.xlu0 %v663_v60, %s2494_s24  ;;  %v2351_v60 = vld [vmem:[%s3164_s4 + $0x100] sm:$0xff]  }
 0x267   :  { %v1332_v61 = vsel %vm671_vm0, %v2351_v60, 0 }
 0x26a   :  { %1603 = vrot.lane.b32.xlu0 %v664_v62, %s2494_s24 }
 0x26e   :  { %1605 = vrot.lane.b32.xlu0 %v665_v0, %s2494_s24 }
 0x272   :  { %1613 = vrot.lane.b32.xlu0 %v666_v1, %s2494_s24 }
 0x280   :  { %676 = vadd.xlane.f32.xlu1 %v675_v3  ;;  %v2355_v3 = vld [vmem:[%s3164_s4 + $0x110] sm:$0xff]  }
 0x291   :  { %1615 = vrot.lane.b32.xlu1 %v667_v4, %s2494_s24 }
 0x2d0   :  { %v674_v5 = vpop.xlane.xlu1 %673 }
 0x2d1   :  { %v679_v6 = vmul.f32 0.015625, %v674_v5  ;;  %v763_v7 = vpop.xlane.xlu0 %762  ;;  %v1338_v5 = vsel %vm671_vm0, %v2355_v3, 0 }
 0x2d2   :  { %v767_v8 = vmul.f32 0.015625, %v763_v7 }
 0x2d3   :  { %v681_v9 = vadd.f32 1e-06, %v679_v6  ;;  %v2356_v6 = vld [vmem:[%s3164_s4 + $0x158] sm:$0xff]  }
 0x2d4   :  { %v769_v10 = vadd.f32 1e-06, %v767_v8  ;;  %v698_v11 = vpop.permute.xlu1 %697  ;;  %v2357_v8 = vld [vmem:[%s3164_s4 + $0x118] sm:$0xff]  }
 0x2d5   :  { %2382 = vrsqrt.f32 %v681_v9  ;;  %v766_v12 = vpop.xlane.xlu0 %765 }
 0x2d6   :  { %2384 = vrsqrt.f32 %v769_v10  ;;  %v768_v13 = vmul.f32 0.015625, %v766_v12 }
 0x2d8   :  { %v770_v14 = vadd.f32 1e-06, %v768_v13  ;;  %v704_v15 = vpop.permute.xlu1 %703  ;;  %v2358_v13 = vld [vmem:[%s3164_s4 + $0x160] sm:$0xff]  }
 0x2d9   :  { %v710_v16 = vsel %vm709_vm1, %v698_v11, %v704_v15  ;;  %v700_v20 = vpop.permute.xlu0 %699  ;;  %v1341_v11 = vsel %vm671_vm0, %v2357_v8, 0  ;;  %v2359_v15 = vld [vmem:[%s3164_s4 + $0x120] sm:$0xff]  }
 0x2da   :  { %2386 = vrsqrt.f32 %v770_v14  ;;  %v722_v17 = vmul.f32 %v710_v16, %v664_v62  ;;  %v734_v19 = vmul.f32 %v710_v16, %v666_v1  ;;  %v2352_v62 = vld [vmem:[%s3164_s4 + $0x148] sm:$0xff]   ;;  %v1335_v1 = vsel %vm671_vm0, %v2353_v63, 0 }
 0x2dc   :  { %v706_v18 = vpop.permute.xlu1 %705  ;;  %726 = vrot.lane.b32.xlu0 %v722_v17, %s2494_s24  ;;  %v1344_v17 = vsel %vm671_vm0, %v2359_v15, 0 }
 0x2dd   :  { %v711_v22 = vsel %vm709_vm1, %v700_v20, %v706_v18  ;;  %v2360_v18 = vld [vmem:[%s3164_s4 + $0x168] sm:$0xff]  }
 0x2de   :  { %v723_v25 = vmul.f32 %v711_v22, %v665_v0  ;;  %v735_v30 = vmul.f32 %v711_v22, %v667_v4  ;;  %v2809_v0 = vpop.permute.xlu0 %714  ;;  %v2361_v20 = vld [vmem:[%s3164_s4 + $0x128] sm:$0xff]   ;;  %v1976_v22 = vld [vmem:[#allocation6] ss:$0 sm:$0xff] }
 0x2df   :  { %v2383_v21 = vpop.eup %2382 }
 0x2e0   :  { %v2385_v23 = vpop.eup %2384  ;;  %738 = vrot.lane.b32.xlu0 %v734_v19, %s2494_s24  ;;  %v2716_v24 = vmul.f32 %v2383_v21, %v2633_v41  ;;  %v720_v21 = vmul.f32 %v2809_v0, %v2633_v41  ;;  %v2363_v41 = vld [vmem:[%s3164_s4 + $0x130] sm:$0xff]  }
 0x2e1   :  { %v773_v26 = vmul.f32 %v2385_v23, %v2635_v42  ;;  %v1290_v42 = vsel %vm671_vm0, %v2339_v40, 0 }
 0x2e2   :  { %v2819_v4 = vpop.permute.xlu0 %716 }
 0x2e3   :  { %v781_v32 = vmul.f32 %v1979_v28, %v773_v26  ;;  %v1347_v26 = vsel %vm671_vm0, %v2361_v20, 0 }
 0x2e4   :  { %v2387_v27 = vpop.eup %2386  ;;  %728 = vrot.lane.b32.xlu0 %v723_v25, %s2494_s24 }
 0x2e5   :  { %v774_v29 = vmul.f32 %v2387_v27, %v2643_v46  ;;  %v1293_v46 = vsel %vm671_vm0, %v2341_v45, 0  ;;  %v2362_v27 = vld [vmem:[%s3164_s4 + $0x170] sm:$0xff]  }
 0x2e6   :  { %v2825_v7 = vpop.permute.xlu0 %1603 }
 0x2e7   :  { %v782_v33 = vmul.f32 %v1979_v28, %v774_v29  ;;  %v693_v28 = vmul.f32 %v1976_v22, %v2716_v24  ;;  %v1350_v24 = vsel %vm671_vm0, %v2363_v41, 0  ;;  %v2987_v20 = vsel %vm671_vm0, 0.0, %v2825_v7 }
 0x2e8   :  { %740 = vrot.lane.b32.xlu0 %v735_v30, %s2494_s24 }
 0x2e9   :  { %v2725_v34 = vpack.c.bf16 %v782_v33, %v781_v32  ;;  %v721_v33 = vmul.f32 %v2819_v4, %v2639_v44 }
 0x2ea   :  { %v2832_v12 = vpop.permute.xlu0 %1605 }
 0x2eb   :  { %2103 = vmatprep.mubr.msk.bf16.mxu1 %vm671_vm0, %v2725_v34 }
 0x2ec   :  { %2104 = vmatmul.mubr.msk.bf16.vlgmr.msra.gmra.mrb[0].mxu1 %vm671_vm0, %v2725_v34 }
 0x2ed   :  { %2106 = vmatpush3.bf16.xpose.msra.mxu1 %v1284_v35  ;;  %2121 = vmatprep.mubr.msk.bf16.mxu1 %vm671_vm0, %v2725_v34 }
 0x2ee   :  { %2176 = vmatprep.subr.msk.bf16.mxu1 %vm671_vm0, %v2336_v36  ;;  %v2841_v16 = vpop.permute.xlu0 %1613 }
 0x2f5   :  { %2108 = vmatpush3.bf16.xpose.msra.mxu1 %v1287_v38  ;;  %v2364_v38 = vld [vmem:[%s3164_s4 + $0x178] sm:$0xff]  }
 0x2f6   :  { %2177 = vmatprep.subr.msk.bf16.mxu1 %vm671_vm0, %v2338_v39 }
 0x2fd   :  { %2110 = vmatpush3.bf16.xpose.msra.mxu1 %v1290_v42 }
 0x2fe   :  { %2178 = vmatprep.subr.msk.bf16.mxu1 %vm671_vm0, %v2340_v43 }
 0x305   :  { %2112 = vmatpush3.bf16.xpose.msra.mxu1 %v1293_v46  ;;  %v2366_v46 = vld [vmem:[%s3164_s4 + $0x1c0] sm:$0xff]  }
 0x306   :  { %2179 = vmatprep.subr.msk.bf16.mxu1 %vm671_vm0, %v2342_v47  ;;  %v2367_v47 = vld [vmem:[%s3164_s4 + $0x180] sm:$0xff]  }
 0x307   :  { %v1380_v48 = vsel %vm671_vm0, %v2367_v47, 0 }
 0x30d   :  { %2114 = vmatpush3.bf16.xpose.msra.mxu1 %v1296_v49  ;;  %v677_v9 = vpop.xlane.xlu1 %676  ;;  %v2368_v49 = vld [vmem:[%s3164_s4 + $0x1c8] sm:$0xff]  }
 0x30e   :  { %2180 = vmatprep.subr.msk.bf16.mxu1 %vm671_vm0, %v2344_v50  ;;  %v680_v10 = vmul.f32 0.015625, %v677_v9  ;;  %v2369_v50 = vld [vmem:[%s3164_s4 + $0x188] sm:$0xff]  }
 0x30f   :  { %v1383_v51 = vsel %vm671_vm0, %v2369_v50, 0 }
 0x310   :  { %v682_v14 = vadd.f32 1e-06, %v680_v10 }
 0x312   :  { %2388 = vrsqrt.f32 %v682_v14 }
 0x315   :  { %2116 = vmatpush3.bf16.xpose.msra.mxu1 %v1299_v52  ;;  %v2370_v52 = vld [vmem:[%s3164_s4 + $0x1d0] sm:$0xff]  }
 0x316   :  { %2181 = vmatprep.subr.msk.bf16.mxu1 %vm671_vm0, %v2346_v53  ;;  %v2371_v53 = vld [vmem:[%s3164_s4 + $0x190] sm:$0xff]  }
 0x317   :  { %v1386_v54 = vsel %vm671_vm0, %v2371_v53, 0 }
 0x31c   :  { %v2389_v30 = vpop.eup %2388 }
 0x31d   :  { %2118 = vmatpush3.bf16.xpose.msra.mxu1 %v1302_v55  ;;  %v686_v35 = vmul.f32 %v2389_v30, %v2639_v44  ;;  %v2365_v44 = vld [vmem:[%s3164_s4 + $0x138] sm:$0xff]  }
 0x31e   :  { %2182 = vmatprep.subr.msk.bf16.mxu1 %vm671_vm0, %v2348_v56  ;;  %v1353_v45 = vsel %vm671_vm0, %v2365_v44, 0  ;;  %v2372_v55 = vld [vmem:[%s3164_s4 + $0x1d8] sm:$0xff]  }
 0x31f   :  { %v694_v39 = vmul.f32 %v1976_v22, %v686_v35  ;;  %v2373_v56 = vld [vmem:[%s3164_s4 + $0x198] sm:$0xff]   ;;  %v3004_v35 = vsel %vm671_vm0, 1.0, %v2819_v4 }
 0x320   :  { %v1389_v57 = vsel %vm671_vm0, %v2373_v56, 0 }
 0x325   :  { %2120 = vmatpush3.bf16.xpose.msra.mxu1 %v1305_v58  ;;  %v2374_v58 = vld [vmem:[%s3164_s4 + $0x1e0] sm:$0xff]  }
 0x326   :  { %2183 = vmatprep.subr.msk.bf16.mxu1 %vm671_vm0, %v2350_v59  ;;  %v2375_v59 = vld [vmem:[%s3164_s4 + $0x1a0] sm:$0xff]  }
 0x327   :  { %v1392_v60 = vsel %vm671_vm0, %v2375_v59, 0 }
 0x32c   :  { %2122 = vmatmul.mubr.msk.bf16.vlgmr.msra.gmra.mrb[4].mxu1 %vm671_vm0, %v2725_v34 }
 0x32d   :  { %2124 = vmatpush3.bf16.xpose.msra.mxu1 %v1332_v61  ;;  %2139 = vmatprep.mubr.msk.bf16.mxu1 %vm671_vm0, %v2725_v34  ;;  %v2376_v61 = vld [vmem:[%s3164_s4 + $0x1e8] sm:$0xff]  }
 0x32e   :  { %2184 = vmatprep.subr.msk.bf16.mxu1 %vm671_vm0, %v2352_v62  ;;  %v2377_v62 = vld [vmem:[%s3164_s4 + $0x1a8] sm:$0xff]  }
 0x32f   :  { %v1395_v63 = vsel %vm671_vm0, %v2377_v62, 0 }
 0x335   :  { %2126 = vmatpush3.bf16.xpose.msra.mxu1 %v1335_v1  ;;  %v2378_v1 = vld [vmem:[%s3164_s4 + $0x1f0] sm:$0xff]  }
 0x336   :  { %2185 = vmatprep.subr.msk.bf16.mxu1 %vm671_vm0, %v2354_v2  ;;  %v2379_v2 = vld [vmem:[%s3164_s4 + $0x1b0] sm:$0xff]  }
 0x337   :  { %v1398_v3 = vsel %vm671_vm0, %v2379_v2, 0 }
 0x33d   :  { %2128 = vmatpush3.bf16.xpose.msra.mxu1 %v1338_v5  ;;  %v2380_v5 = vld [vmem:[%s3164_s4 + $0x1f8] sm:$0xff]  }
 0x33e   :  { %2186 = vmatprep.subr.msk.bf16.mxu1 %vm671_vm0, %v2356_v6  ;;  %v2381_v6 = vld [vmem:[%s3164_s4 + $0x1b8] sm:$0xff]  }
 0x33f   :  { %v1401_v8 = vsel %vm671_vm0, %v2381_v6, 0 }
 0x345   :  { %2130 = vmatpush3.bf16.xpose.msra.mxu1 %v1341_v11 }
 0x346   :  { %2187 = vmatprep.subr.msk.bf16.mxu1 %vm671_vm0, %v2358_v13 }
 0x34d   :  { %2132 = vmatpush3.bf16.xpose.msra.mxu1 %v1344_v17 }
 0x34e   :  { %v727_v19 = vpop.permute.xlu0 %726  ;;  %2188 = vmatprep.subr.msk.bf16.mxu1 %vm671_vm0, %v2360_v18  ;;  %v1616_v18 = vpop.permute.xlu1 %1615 }
 0x34f   :  { %v732_v23 = vadd.f32 %v727_v19, %v720_v21  ;;  %v2983_v19 = vsel %vm671_vm0, 1.0, %v2809_v0  ;;  %v2991_v21 = vsel %vm671_vm0, 0.0, %v2841_v16 }
 0x352   :  { %v739_v25 = vpop.permute.xlu0 %738 }
 0x353   :  { %v744_v29 = vadd.f32 %v739_v25, %v732_v23 }
 0x355   :  { %v746_v31 = vsel %vm671_vm0, %v693_v28, %v744_v29  ;;  %2134 = vmatpush3.bf16.xpose.msra.mxu1 %v1347_v26 }
 0x356   :  { %v729_v32 = vpop.permute.xlu0 %728  ;;  %2189 = vmatprep.subr.msk.bf16.mxu1 %vm671_vm0, %v2362_v27 }
 0x357   :  { %v733_v36 = vadd.f32 %v729_v32, %v721_v33 }
 0x35a   :  { %v741_v37 = vpop.permute.xlu0 %740 }
 0x35b   :  { %v745_v40 = vadd.f32 %v741_v37, %v733_v36  ;;  %v3008_v36 = vsel %vm671_vm0, 0.0, %v2832_v12 }
 0x35d   :  { %v747_v42 = vsel %vm671_vm0, %v694_v39, %v745_v40  ;;  %2136 = vmatpush3.bf16.xpose.msra.mxu1 %v1350_v24  ;;  %v3011_v24 = vsel %vm671_vm0, 0.0, %v1616_v18 }
 0x35e   :  { %v2085_v43 = vpack.c.bf16 %v747_v42, %v746_v31  ;;  %2190 = vmatprep.subr.msk.bf16.mxu1 %vm671_vm0, %v2364_v38 }
 0x360   :  { %2086 = vst [vmem:[%s3169_s9] sm:$0xff] %v2085_v43  }
 0x365   :  { %2138 = vmatpush3.bf16.xpose.msra.mxu1 %v1353_v45 }
 0x366   :  { %2191 = vmatprep.subr.msk.bf16.mxu1 %vm671_vm0, %v2366_v46 }
 0x36c   :  { %2140 = vmatmul.mubr.msk.bf16.vlgmr.msra.gmra.mrb[8].mxu1 %vm671_vm0, %v2725_v34 }
 0x36d   :  { %2142 = vmatpush3.bf16.xpose.msra.mxu1 %v1380_v48  ;;  %2157 = vmatprep.mubr.msk.bf16.mxu1 %vm671_vm0, %v2725_v34 }
 0x36e   :  { %2192 = vmatprep.subr.msk.bf16.mxu1 %vm671_vm0, %v2368_v49 }
 0x375   :  { %2144 = vmatpush3.bf16.xpose.msra.mxu1 %v1383_v51 }
 0x376   :  { %2193 = vmatprep.subr.msk.bf16.mxu1 %vm671_vm0, %v2370_v52 }
 0x37d   :  { %2146 = vmatpush3.bf16.xpose.msra.mxu1 %v1386_v54 }
 0x37e   :  { %2194 = vmatprep.subr.msk.bf16.mxu1 %vm671_vm0, %v2372_v55 }
 0x385   :  { %2148 = vmatpush3.bf16.xpose.msra.mxu1 %v1389_v57 }
 0x386   :  { %2195 = vmatprep.subr.msk.bf16.mxu1 %vm671_vm0, %v2374_v58 }
 0x38d   :  { %2150 = vmatpush3.bf16.xpose.msra.mxu1 %v1392_v60 }
 0x38e   :  { %2196 = vmatprep.subr.msk.bf16.mxu1 %vm671_vm0, %v2376_v61 }
 0x395   :  { %2152 = vmatpush3.bf16.xpose.msra.mxu1 %v1395_v63 }
 0x396   :  { %2197 = vmatprep.subr.msk.bf16.mxu1 %vm671_vm0, %v2378_v1 }
 0x39d   :  { %2154 = vmatpush3.bf16.xpose.msra.mxu1 %v1398_v3 }
 0x39e   :  { %2198 = vmatprep.subr.msk.bf16.mxu1 %vm671_vm0, %v2380_v5 }
 0x3a5   :  { %2156 = vmatpush3.bf16.xpose.msra.mxu1 %v1401_v8 }
 0x3ac   :  { %2158 = vmatmul.mubr.msk.bf16.vlgmr.msra.gmra.mrb[12].mxu1 %vm671_vm0, %v2725_v34 }
 0x3bf   :  { %v1461_v9 = vpop.f32.mrb[0].mxu1 }
 0x3c0   :  { %1623 = vrot.lane.b32.xlu1 %v1461_v9, %s2493_s3  ;;  %v1463_v10 = vpop.f32.mrb[1].mxu1  ;;  %1629 = vrot.lane.b32.xlu0 %v1461_v9, %s2492_s16  ;;  %v1635_v25 = vmul.f32 %v2983_v19, %v1461_v9 }
 0x3c1   :  { %v1465_v11 = vpop.f32.mrb[2].mxu1  ;;  %v1669_v7 = vmul.f32 %v2983_v19, %v1463_v10 }
 0x3c2   :  { %v1467_v13 = vpop.f32.mrb[3].mxu1  ;;  %v1636_v39 = vmul.f32 %v3004_v35, %v1465_v11 }
 0x3c3   :  { %v1670_v49 = vmul.f32 %v3004_v35, %v1467_v13 }
 0x3c4   :  { %1631 = vrot.lane.b32.xlu1 %v1465_v11, %s2492_s16  ;;  %1657 = vrot.lane.b32.xlu0 %v1463_v10, %s2493_s3 }
 0x3c8   :  { %1665 = vrot.lane.b32.xlu1 %v1467_v13, %s2492_s16  ;;  %1663 = vrot.lane.b32.xlu0 %v1463_v10, %s2492_s16 }
 0x3cc   :  { %1625 = vrot.lane.b32.xlu0 %v1465_v11, %s2493_s3 }
 0x3d0   :  { %1659 = vrot.lane.b32.xlu0 %v1467_v13, %s2493_s3 }
 0x3ff   :  { %v2957_v34 = vpop.f32.mrb[4].mxu1 }
 0x400   :  { %v2959_v14 = vpop.f32.mrb[5].mxu1  ;;  %1691 = vrot.lane.b32.xlu0 %v2957_v34, %s2493_s3  ;;  %v1703_v60 = vmul.f32 %v2983_v19, %v2957_v34 }
 0x401   :  { %1725 = vrot.lane.b32.xlu1 %v2959_v14, %s2493_s3  ;;  %v2965_v15 = vpop.f32.mrb[6].mxu1  ;;  %v1737_v2 = vmul.f32 %v2983_v19, %v2959_v14 }
 0x402   :  { %v2967_v17 = vpop.f32.mrb[7].mxu1 }
 0x404   :  { %1697 = vrot.lane.b32.xlu0 %v2957_v34, %s2492_s16  ;;  %v1704_v34 = vmul.f32 %v3004_v35, %v2965_v15 }
 0x405   :  { %1699 = vrot.lane.b32.xlu1 %v2965_v15, %s2492_s16 }
 0x408   :  { %1731 = vrot.lane.b32.xlu0 %v2959_v14, %s2492_s16 }
 0x409   :  { %1733 = vrot.lane.b32.xlu1 %v2967_v17, %s2492_s16 }
 0x40c   :  { %1693 = vrot.lane.b32.xlu0 %v2965_v15, %s2493_s3 }
 0x410   :  { %1727 = vrot.lane.b32.xlu0 %v2967_v17, %s2493_s3 }
 0x432   :  { %v1624_v22 = vpop.permute.xlu1 %1623  ;;  %v1630_v23 = vpop.permute.xlu0 %1629 }
 0x433   :  { %v1637_v26 = vmul.f32 %v1624_v22, %v2987_v20  ;;  %v1641_v28 = vmul.f32 %v1630_v23, %v2991_v21 }
 0x435   :  { %v1639_v27 = vadd.f32 %v1637_v26, %v1635_v25 }
 0x436   :  { %v1658_v29 = vpop.permute.xlu0 %1657  ;;  %v1632_v16 = vpop.permute.xlu1 %1631 }
 0x437   :  { %v1643_v0 = vadd.f32 %v1641_v28, %v1639_v27  ;;  %v1671_v30 = vmul.f32 %v1658_v29, %v2987_v20  ;;  %v1642_v12 = vmul.f32 %v1632_v16, %v3011_v24 }
 0x439   :  { %v2066_v31 = vpack.c.bf16 %v1643_v0, %v1643_v0  ;;  %v1673_v41 = vadd.f32 %v1671_v30, %v1669_v7  ;;  %v1738_v0 = vmul.f32 %v3004_v35, %v2967_v17 }
 0x43a   :  { %v1664_v32 = vpop.permute.xlu0 %1663  ;;  %v1666_v44 = vpop.permute.xlu1 %1665 }
 0x43b   :  { %1653 = vst [vmem:[%s3168_s8] sm:$0xf] %v2066_v31  ;;  %v1675_v33 = vmul.f32 %v1664_v32, %v2991_v21  ;;  %v1676_v52 = vmul.f32 %v1666_v44, %v3011_v24 }
 0x43d   :  { %v1677_v37 = vadd.f32 %v1675_v33, %v1673_v41 }
 0x43e   :  { %v1626_v38 = vpop.permute.xlu0 %1625 }
 0x43f   :  { %v2068_v40 = vpack.c.bf16 %v1677_v37, %v1677_v37  ;;  %v3014_v42 = vpop.f32.mrb[8].mxu1  ;;  %v1638_v43 = vmul.f32 %v1626_v38, %v3008_v36 }
 0x440   :  { %1759 = vrot.lane.b32.xlu1 %v3014_v42, %s2493_s3  ;;  %v3019_v4 = vpop.f32.mrb[9].mxu1  ;;  %1765 = vrot.lane.b32.xlu0 %v3014_v42, %s2492_s16  ;;  %v1771_v38 = vmul.f32 %v2983_v19, %v3014_v42 }
 0x441   :  { %1687 = vst [vmem:[%s3168_s8 + $0x4] sm:$0xf] %v2068_v40  ;;  %v1640_v45 = vadd.f32 %v1638_v43, %v1636_v39  ;;  %v3027_v46 = vpop.f32.mrb[10].mxu1 }
 0x442   :  { %v3029_v47 = vpop.f32.mrb[11].mxu1  ;;  %v1660_v48 = vpop.permute.xlu0 %1659  ;;  %v1772_v42 = vmul.f32 %v3004_v35, %v3027_v46 }
 0x443   :  { %v1644_v50 = vadd.f32 %v1642_v12, %v1640_v45  ;;  %v1672_v51 = vmul.f32 %v1660_v48, %v3008_v36  ;;  %v1805_v45 = vmul.f32 %v2983_v19, %v3019_v4 }
 0x444   :  { %1793 = vrot.lane.b32.xlu1 %v3019_v4, %s2493_s3  ;;  %1799 = vrot.lane.b32.xlu0 %v3019_v4, %s2492_s16 }
 0x445   :  { %v2067_v53 = vpack.c.bf16 %v1644_v50, %v1644_v50  ;;  %v1674_v54 = vadd.f32 %v1672_v51, %v1670_v49 }
 0x447   :  { %1654 = vst [vmem:[%s3168_s8 + $0x20] sm:$0xf] %v2067_v53  ;;  %v1678_v55 = vadd.f32 %v1676_v52, %v1674_v54 }
 0x448   :  { %1767 = vrot.lane.b32.xlu1 %v3027_v46, %s2492_s16  ;;  %1761 = vrot.lane.b32.xlu0 %v3027_v46, %s2493_s3 }
 0x449   :  { %v2069_v56 = vpack.c.bf16 %v1678_v55, %v1678_v55 }
 0x44b   :  { %1688 = vst [vmem:[%s3168_s8 + $0x24] sm:$0xf] %v2069_v56 }
 0x44c   :  { %1801 = vrot.lane.b32.xlu1 %v3029_v47, %s2492_s16  ;;  %1795 = vrot.lane.b32.xlu0 %v3029_v47, %s2493_s3 }
 0x472   :  { %v1692_v57 = vpop.permute.xlu0 %1691 }
 0x473   :  { %v1705_v58 = vmul.f32 %v1692_v57, %v2987_v20  ;;  %v1726_v59 = vpop.permute.xlu1 %1725 }
 0x474   :  { %v1739_v63 = vmul.f32 %v1726_v59, %v2987_v20 }
 0x475   :  { %v1707_v62 = vadd.f32 %v1705_v58, %v1703_v60 }
 0x476   :  { %v1698_v61 = vpop.permute.xlu0 %1697  ;;  %v1741_v6 = vadd.f32 %v1739_v63, %v1737_v2 }
 0x477   :  { %v1709_v1 = vmul.f32 %v1698_v61, %v2991_v21  ;;  %v1700_v9 = vpop.permute.xlu1 %1699  ;;  %v1806_v61 = vmul.f32 %v3004_v35, %v3029_v47 }
 0x478   :  { %v1710_v25 = vmul.f32 %v1700_v9, %v3011_v24 }
 0x479   :  { %v1711_v3 = vadd.f32 %v1709_v1, %v1707_v62 }
 0x47a   :  { %v1732_v5 = vpop.permute.xlu0 %1731 }
 0x47b   :  { %v2070_v8 = vpack.c.bf16 %v1711_v3, %v1711_v3  ;;  %v1743_v10 = vmul.f32 %v1732_v5, %v2991_v21  ;;  %v1734_v15 = vpop.permute.xlu1 %1733 }
 0x47c   :  { %v1744_v31 = vmul.f32 %v1734_v15, %v3011_v24 }
 0x47d   :  { %1721 = vst [vmem:[%s3168_s8 + $0x8] sm:$0xf] %v2070_v8  ;;  %v1745_v11 = vadd.f32 %v1743_v10, %v1741_v6 }
 0x47e   :  { %v1694_v13 = vpop.permute.xlu0 %1693 }
 0x47f   :  { %v2072_v18 = vpack.c.bf16 %v1745_v11, %v1745_v11  ;;  %v1706_v22 = vmul.f32 %v1694_v13, %v3008_v36  ;;  %v3066_v14 = vpop.f32.mrb[12].mxu1 }
 0x480   :  { %1827 = vrot.lane.b32.xlu1 %v3066_v14, %s2493_s3  ;;  %v3070_v23 = vpop.f32.mrb[13].mxu1  ;;  %1833 = vrot.lane.b32.xlu0 %v3066_v14, %s2492_s16  ;;  %v1839_v8 = vmul.f32 %v2983_v19, %v3066_v14 }
 0x481   :  { %1755 = vst [vmem:[%s3168_s8 + $0xc] sm:$0xf] %v2072_v18  ;;  %v1708_v26 = vadd.f32 %v1706_v22, %v1704_v34  ;;  %v3078_v27 = vpop.f32.mrb[14].mxu1 }
 0x482   :  { %v3080_v28 = vpop.f32.mrb[15].mxu1  ;;  %v1728_v29 = vpop.permute.xlu0 %1727 }
 0x483   :  { %v1712_v30 = vadd.f32 %v1710_v25, %v1708_v26  ;;  %v1740_v7 = vmul.f32 %v1728_v29, %v3008_v36  ;;  %v1840_v25 = vmul.f32 %v3004_v35, %v3078_v27 }
 0x484   :  { %1861 = vrot.lane.b32.xlu1 %v3070_v23, %s2493_s3  ;;  %1829 = vrot.lane.b32.xlu0 %v3078_v27, %s2493_s3 }
 0x485   :  { %v2071_v32 = vpack.c.bf16 %v1712_v30, %v1712_v30  ;;  %v1742_v16 = vadd.f32 %v1740_v7, %v1738_v0 }
 0x487   :  { %1722 = vst [vmem:[%s3168_s8 + $0x28] sm:$0xf] %v2071_v32  ;;  %v1746_v41 = vadd.f32 %v1744_v31, %v1742_v16  ;;  %v1873_v31 = vmul.f32 %v2983_v19, %v3070_v23 }
 0x488   :  { %1835 = vrot.lane.b32.xlu1 %v3078_v27, %s2492_s16  ;;  %1863 = vrot.lane.b32.xlu0 %v3080_v28, %s2493_s3  ;;  %v1874_v27 = vmul.f32 %v3004_v35, %v3080_v28 }
 0x489   :  { %v2073_v17 = vpack.c.bf16 %v1746_v41, %v1746_v41 }
 0x48b   :  { %1756 = vst [vmem:[%s3168_s8 + $0x2c] sm:$0xf] %v2073_v17 }
 0x48c   :  { %1869 = vrot.lane.b32.xlu1 %v3080_v28, %s2492_s16  ;;  %1867 = vrot.lane.b32.xlu0 %v3070_v23, %s2492_s16 }
 0x4b2   :  { %v1760_v33 = vpop.permute.xlu1 %1759  ;;  %v1766_v37 = vpop.permute.xlu0 %1765 }
 0x4b3   :  { %v1773_v39 = vmul.f32 %v1760_v33, %v2987_v20  ;;  %v1777_v43 = vmul.f32 %v1766_v37, %v2991_v21 }
 0x4b5   :  { %v1775_v40 = vadd.f32 %v1773_v39, %v1771_v38 }
 0x4b6   :  { %v1794_v12 = vpop.permute.xlu1 %1793  ;;  %v1800_v44 = vpop.permute.xlu0 %1799 }
 0x4b7   :  { %v1779_v48 = vadd.f32 %v1777_v43, %v1775_v40  ;;  %v1807_v49 = vmul.f32 %v1794_v12, %v2987_v20  ;;  %v1811_v52 = vmul.f32 %v1800_v44, %v2991_v21 }
 0x4b9   :  { %v2074_v50 = vpack.c.bf16 %v1779_v48, %v1779_v48  ;;  %v1809_v51 = vadd.f32 %v1807_v49, %v1805_v45 }
 0x4ba   :  { %v1768_v53 = vpop.permute.xlu1 %1767  ;;  %v1762_v54 = vpop.permute.xlu0 %1761 }
 0x4bb   :  { %1789 = vst [vmem:[%s3168_s8 + $0x10] sm:$0xf] %v2074_v50  ;;  %v1813_v55 = vadd.f32 %v1811_v52, %v1809_v51  ;;  %v1774_v56 = vmul.f32 %v1762_v54, %v3008_v36  ;;  %v1778_v57 = vmul.f32 %v1768_v53, %v3011_v24 }
 0x4bd   :  { %v2076_v4 = vpack.c.bf16 %v1813_v55, %v1813_v55  ;;  %v1776_v58 = vadd.f32 %v1774_v56, %v1772_v42 }
 0x4be   :  { %v1802_v59 = vpop.permute.xlu1 %1801  ;;  %v1796_v60 = vpop.permute.xlu0 %1795 }
 0x4bf   :  { %1823 = vst [vmem:[%s3168_s8 + $0x14] sm:$0xf] %v2076_v4  ;;  %v1780_v46 = vadd.f32 %v1778_v57, %v1776_v58  ;;  %v1808_v62 = vmul.f32 %v1796_v60, %v3008_v36  ;;  %v1812_v1 = vmul.f32 %v1802_v59, %v3011_v24 }
 0x4c1   :  { %v2075_v63 = vpack.c.bf16 %v1780_v46, %v1780_v46  ;;  %v1810_v2 = vadd.f32 %v1808_v62, %v1806_v61 }
 0x4c3   :  { %1790 = vst [vmem:[%s3168_s8 + $0x30] sm:$0xf] %v2075_v63  ;;  %v1814_v3 = vadd.f32 %v1812_v1, %v1810_v2 }
 0x4c5   :  { %v2077_v5 = vpack.c.bf16 %v1814_v3, %v1814_v3 }
 0x4c7   :  { %1824 = vst [vmem:[%s3168_s8 + $0x34] sm:$0xf] %v2077_v5 }
 0x4f2   :  { %v1828_v47 = vpop.permute.xlu1 %1827  ;;  %v1834_v6 = vpop.permute.xlu0 %1833 }
 0x4f3   :  { %v1841_v9 = vmul.f32 %v1828_v47, %v2987_v20  ;;  %v1845_v11 = vmul.f32 %v1834_v6, %v2991_v21 }
 0x4f5   :  { %v1843_v10 = vadd.f32 %v1841_v9, %v1839_v8 }
 0x4f6   :  { %v1862_v13 = vpop.permute.xlu1 %1861  ;;  %v1830_v34 = vpop.permute.xlu0 %1829 }
 0x4f7   :  { %v1847_v18 = vadd.f32 %v1845_v11, %v1843_v10  ;;  %v1842_v22 = vmul.f32 %v1830_v34, %v3008_v36  ;;  %v1875_v26 = vmul.f32 %v1862_v13, %v2987_v20 }
 0x4f9   :  { %v2078_v15 = vpack.c.bf16 %v1847_v18, %v1847_v18  ;;  %v1844_v14 = vadd.f32 %v1842_v22, %v1840_v25  ;;  %v1877_v16 = vadd.f32 %v1875_v26, %v1873_v31 }
 0x4fa   :  { %v1836_v29 = vpop.permute.xlu1 %1835  ;;  %v1864_v0 = vpop.permute.xlu0 %1863 }
 0x4fb   :  { %1857 = vst [vmem:[%s3168_s8 + $0x18] sm:$0xf] %v2078_v15  ;;  %v1846_v30 = vmul.f32 %v1836_v29, %v3011_v24  ;;  %v1876_v7 = vmul.f32 %v1864_v0, %v3008_v36 }
 0x4fd   :  { %v1848_v32 = vadd.f32 %v1846_v30, %v1844_v14  ;;  %v1878_v33 = vadd.f32 %v1876_v7, %v1874_v27 }
 0x4fe   :  { %v1870_v20 = vpop.permute.xlu1 %1869  ;;  %v1868_v41 = vpop.permute.xlu0 %1867 }
 0x4ff   :  { %v2079_v17 = vpack.c.bf16 %v1848_v32, %v1848_v32  ;;  %v1880_v37 = vmul.f32 %v1870_v20, %v3011_v24  ;;  %v1879_v38 = vmul.f32 %v1868_v41, %v2991_v21 }
 0x501   :  { %1858 = vst [vmem:[%s3168_s8 + $0x38] sm:$0xf] %v2079_v17  ;;  %v1882_v36 = vadd.f32 %v1880_v37, %v1878_v33  ;;  %v1881_v39 = vadd.f32 %v1879_v38, %v1877_v16 }
 0x503   :  { %v2081_v19 = vpack.c.bf16 %v1882_v36, %v1882_v36  ;;  %v2080_v23 = vpack.c.bf16 %v1881_v39, %v1881_v39 }
 0x505   :  { %1892 = vst [vmem:[%s3168_s8 + $0x3c] sm:$0xf] %v2081_v19  ;;  %1891 = vst [vmem:[%s3168_s8 + $0x1c] sm:$0xf] %v2080_v23 }
 0x506   :  { %1901 = vsyncpa [#allocation3], 1 }
 0x507   :  { %1902 = vsyncpa [#allocation5], 1 }
 0x508   :  { %1903 = vsyncpa [#allocation8], 1 }

// kernel: text_prompt_network_forward.3
= control target key start
LH: loop header
LB: loop body
LE: loop exit
PB: predicated region body
PF: predicated region fallthrough
CT: control target
= control target key end

     0   :  { %10 = vsyncpa [#allocation3], 0  ;;  %s4411_s0 = inlined_call_operand.vmem [shape: bf16[2,8,1024], index: 0, kind: input, shape index: {}]   ;;  %s4412_s1 = inlined_call_operand.vmem [shape: bf16[2,8,128], index: 1, kind: input, shape index: {}]   ;;  %s4413_s2 = inlined_call_operand.vmem [shape: f32[2,8,768], index: 2, kind: input, shape index: {}]   ;;  %s4414_s3 = inlined_call_operand.vmem [shape: bf16[512,768], index: 3, kind: input, shape index: {}]   ;;  %s4415_s4 = inlined_call_operand.vmem [shape: f32[1,768], index: 4, kind: input, shape index: {}]   ;;  %s4416_s5 = inlined_call_operand.hbm [shape: f32[2,8,768], index: 5, kind: output, shape index: {}]  }
   0x1   :  { %12 = vsyncpa [#allocation3 + $0x1], 0  ;;  %s3576_s18 = smov 0   ;;  %s3578_s19 = smov 0  }
   0x2   :  { %s3580_s20 = smov 0   ;;  %s3582_s21 = smov 0  }
   0x3   :  { %s3584_s22 = smov 0   ;;  %s3586_s23 = smov 0  }
   0x4 LB: > { %s2720_s24 = sadd.s32 4294967295, %s3540_s23   ;;  %s2721_s25 = sadd.s32 4294967294, %s3540_s23   ;;  %s3540_s23 = sphi %s3586_s23, %s18_s23   ;;  %s3536_s22 = sphi %s3584_s22, %s4423_s22   ;;  %s3532_s21 = sphi %s3582_s21, %s4422_s21   ;;  %s3528_s20 = sphi %s3580_s20, %s4421_s20   ;;  %s3524_s19 = sphi %s3578_s19, %s4420_s19   ;;  %s3520_s18 = sphi %s3576_s18, %s4419_s18  }
   0x5   : > { %s30_s26 = sadd.s32 1, %s3536_s22  ;;  %s163_s27 = sadd.s32 1, %s3528_s20 }
   0x6   : > { %p32_p0 = scmp.ge.s32.totalorder %s30_s26, 2  ;;  %p173_p1 = scmp.ne.s32.totalorder %s3528_s20, %s3524_s19 }
   0x7   : > { %p174_p2 = scmp.eq.s32.totalorder %s2720_s24, 1  ;;  %p179_p3 = scmp.ne.s32.totalorder %s3524_s19, %s3520_s18 }
   0x8   : > { %s4425_s26 = smov (%p32_p0, %s30_s26), 0  ;;  %p180_p5 = scmp.eq.s32.totalorder %s2721_s25, 1 }
   0x9   : > { %p3616_p4 = por %p174_p2, %p173_p1  ;;  %s158_s29 = ssub.s32 %s3536_s22, %s4425_s26 }
   0xa   : > { %p2724_p6 = scmp.ge.s32.totalorder %s3540_s23, 1  ;;  %p161_p7 = scmp.eq.s32.totalorder %s158_s29, 0 }
   0xb   : > { %p3623_p8 = por %p180_p5, %p179_p3  ;;  %p235_p9 = scmp.lt.s32.totalorder %s3540_s23, 3 }
   0xc   : > { %s3629_s6 = scalar_select %p161_p7, %s3528_s20, %s163_s27  }
   0xd   : > { %p236_p10 = pnand %p2724_p6, %p235_p9 }
   0xe   : > { %p280_p11 = scmp.lt.s32.totalorder (!%p236_p10), %s3532_s21, 1  ;;  %v3542_v0 = vmov (!%p236_p10), 0.0   ;;  %vm3543_vm0 = vmmov (!%p236_p10), 0   ;;  %vm348_vm1 = vcmask (!%p236_p10), 64512   ;;  %vm362_vm2 = vcmask (!%p236_p10), 1043456   ;;  %s3544_s10 = smov (!%p236_p10), 64  }
   0xf   : > { %239 = sbr.rel (%p236_p10) target bundleno = 1699 (0x6a3), region = 40  ;;  %2969 = vmatprep.subr.bf16.mxu0 (!%p236_p10), %v3542_v0  ;;  %2971 = vmatprep.mubr.msk.bf16.mxu0 (!%p236_p10), %vm3543_vm0, %v3542_v0  ;;  %vm511_vm3 = vcmask (!%p236_p10), 523264  }
  0x10   : > { %2975 = vmatprep.subr.bf16.mxu1 (!%p236_p10), %v3542_v0  ;;  %2977 = vmatprep.mubr.msk.bf16.mxu1 (!%p236_p10), %vm3543_vm0, %v3542_v0  ;;  %s3067_s16 = smul.u32 (!%p236_p10), 768, %s3532_s21 }
  0x16   : > { %s3636_s7 = scalar_select %p280_p11, %s3532_s21, 1 }
  0x17   : > { %s4362_s21 = scalar_lea.hbm %s4416_s5, %s3067_s16 }
  0x18   : > { %s2727_s8 = sshll.u32 %s3636_s7, 2  ;;  %s2936_s9 = sshll.u32 %s3636_s7, 5 }
  0x19   : > { %s292_s12 = scalar_lea.vmem %s4412_s1, %s2727_s8  ;;  %s3649_s15 = scalar_lea.vmem %s4411_s0, %s2936_s9 }
  0x1a   : > { %v307_v1 = vld [vmem:[%s292_s12] sm:$0xf]  ;;  %v304_v15 = vld [vmem:[%s3649_s15 + $0x8] sm:$0xff]  ;;  %v305_v17 = vld [vmem:[%s3649_s15 + $0x10] sm:$0xff]  ;;  %s3066_s9 = smul.u32 48, %s3636_s7  ;;  %s277_s7 = sand.u32 1, %s3524_s19  }
  0x1b   : > { %2970 = vmatpush3.bf16.xpose.msra.mxu0 %v307_v1  ;;  %v303_v2 = vld [vmem:[%s3649_s15] sm:$0xff]  ;;  %v3656_v8 = vsel %vm362_vm2, %v307_v1, 0  ;;  %v2733_v16 = vcombine.high %v304_v15, %v304_v15  ;;  %v2736_v18 = vcombine.high %v305_v17, %v305_v17  ;;  %v306_v19 = vld [vmem:[%s3649_s15 + $0x18] sm:$0xff]  ;;  %s3065_s13 = smul.u32 48, %s277_s7  ;;  %s2592_s29 = scalar_lea.sflag [#allocation3], %s277_s7 }
  0x1c   : > { %2987 = vmatprep.subr.bf16.mxu0 %v3542_v0  ;;  %2976 = vmatpush3.bf16.msra.mxu1 %v3656_v8  ;;  %v2730_v14 = vcombine.high %v303_v2, %v303_v2  ;;  %v2739_v20 = vcombine.high %v306_v19, %v306_v19  ;;  %s301_s12 = scalar_lea.vmem %s4413_s2, %s3066_s9  ;;  %s3545_s9 = smov [#allocation2]  }
  0x1d   : > { %2981 = vmatprep.subr.bf16.mxu1 %v3542_v0  ;;  %s279_s17 = scalar_lea.vmem [#allocation2], %s3065_s13 }
  0x1e   : > { %s2608_s24 = sshll.u32 %s279_s17, 4  ;;  %s4364_s24 = int_to_ptr.vmem [resolvable:$true] %s2608_s24 }
  0x1f   : > { %s3462_s8 = scalar_lea.vmem %s4364_s24, 768 }
  0x20   : > { %p3463_p12 = scmp.ne.s32.totalorder %s4364_s24, %s3462_s8 }
  0x22   : > { %2972 = vmatmul.mubr.bf16.vlgmr.msra.gmra.mrb[0].mxu0 %v303_v2  ;;  %p3464_p13 = pnand %p3463_p12, %p3616_p4 }
  0x23   : > { %2989 = vmatprep.mubr.msk.bf16.mxu0 %vm3543_vm0, %v3542_v0  ;;  %2988 = vmatpush3.bf16.msra.mxu0 %v3656_v8 }
  0x24   : > { %2999 = vmatprep.subr.bf16.mxu0 %v3542_v0  ;;  %p3465_p0 = pneg %p3464_p13 }
  0xf5   : > { %v342_v3 = vpop.f32.mrb[0].mxu0 }
  0xf6   : > { %v2973_v4 = vpop.f32.mrb[1].mxu0  ;;  %v349_v5 = vsel %vm348_vm1, %v342_v3, -inf }
  0xf7   : > { %350 = vmax.xlane.f32.xlu0 %v349_v5  ;;  %v345_v6 = vpop.f32.mrb[2].mxu0 }
  0xf8   : > { %v2974_v7 = vpop.f32.mrb[3].mxu0 }
 0x184   : > { %v351_v9 = vpop.xlane.xlu0 %350 }
 0x185   : > { %v352_v10 = vsub.f32 %v342_v3, %v351_v9 }
 0x187   : > { %v353_v11 = vmul.f32 1.442695, %v352_v10 }
 0x189   : > { %3428 = vpow2.f32 %v353_v11 }
 0x193   : > { %v3662_v12 = vpop.eup %3428 }
 0x194   : > { %v358_v13 = vpack.c.bf16 %v3662_v12, %v3662_v12 }
 0x196   : > { %2978 = vmatmul.mubr.msk.bf16.vlgmr.msra.gmra.mrb[0].mxu1 %vm348_vm1, %v358_v13 }
 0x197   : > { %2982 = vmatpush3.bf16.xpose.msra.mxu1 %v307_v1  ;;  %2983 = vmatprep.mubr.msk.bf16.mxu1 %vm3543_vm0, %v3542_v0 }
 0x198   : > { %2993 = vmatprep.subr.bf16.mxu1 %v3542_v0 }
 0x19e   : > { %2984 = vmatmul.mubr.bf16.vlgmr.msra.gmra.mrb[4].mxu1 %v2730_v14 }
 0x19f   : > { %2994 = vmatpush3.bf16.xpose.msra.mxu1 %v307_v1  ;;  %2995 = vmatprep.mubr.msk.bf16.mxu1 %vm3543_vm0, %v3542_v0 }
 0x1a0   : > { %3005 = vmatprep.subr.bf16.mxu1 %v3542_v0 }
 0x1a6   : > { %2996 = vmatmul.mubr.bf16.vlgmr.msra.gmra.mrb[8].mxu1 %v304_v15 }
 0x1a7   : > { %3006 = vmatpush3.bf16.xpose.msra.mxu1 %v307_v1  ;;  %3007 = vmatprep.mubr.msk.bf16.mxu1 %vm3543_vm0, %v3542_v0 }
 0x1a8   : > { %3017 = vmatprep.subr.bf16.mxu1 %v3542_v0 }
 0x1ae   : > { %3008 = vmatmul.mubr.bf16.vlgmr.msra.gmra.mrb[12].mxu1 %v2733_v16 }
 0x1af   : > { %3018 = vmatpush3.bf16.xpose.msra.mxu1 %v307_v1  ;;  %3019 = vmatprep.mubr.msk.bf16.mxu1 %vm3543_vm0, %v3542_v0 }
 0x1b0   : > { %3029 = vmatprep.subr.bf16.mxu1 %v3542_v0 }
 0x1b6   : > { %3020 = vmatmul.mubr.bf16.vlgmr.msra.gmra.mrb[16].mxu1 %v305_v17 }
 0x1b7   : > { %3030 = vmatpush3.bf16.xpose.msra.mxu1 %v307_v1  ;;  %3031 = vmatprep.mubr.msk.bf16.mxu1 %vm3543_vm0, %v3542_v0 }
 0x1b8   : > { %3041 = vmatprep.subr.bf16.mxu1 %v3542_v0 }
 0x1be   : > { %3032 = vmatmul.mubr.bf16.vlgmr.msra.gmra.mrb[20].mxu1 %v2736_v18 }
 0x1bf   : > { %3042 = vmatpush3.bf16.xpose.msra.mxu1 %v307_v1  ;;  %3043 = vmatprep.mubr.msk.bf16.mxu1 %vm3543_vm0, %v3542_v0 }
 0x1c0   : > { %3053 = vmatprep.subr.bf16.mxu1 %v3542_v0 }
 0x1c6   : > { %3044 = vmatmul.mubr.bf16.vlgmr.msra.gmra.mrb[24].mxu1 %v306_v19 }
 0x1c7   : > { %3054 = vmatpush3.bf16.xpose.msra.mxu1 %v307_v1  ;;  %3055 = vmatprep.mubr.msk.bf16.mxu1 %vm3543_vm0, %v3542_v0 }
 0x1ce   : > { %3056 = vmatmul.mubr.bf16.vlgmr.msra.gmra.mrb[28].mxu1 %v2739_v20 }
 0x269   : > { %v3690_v21 = vpop.f32.mrb[0].mxu1 }
 0x26a   : > { %v2979_v22 = vpop.f32.mrb[1].mxu1 }
 0x26b   : > { %v403_v23 = vpop.f32.mrb[2].mxu1 }
 0x26c   : > { %v2980_v24 = vpop.f32.mrb[3].mxu1 }
 0x271   : > { %v446_v25 = vpop.f32.mrb[4].mxu1 }
 0x272   : > { %v2985_v26 = vpop.f32.mrb[5].mxu1  ;;  %v452_v27 = vsel %vm348_vm1, %v446_v25, -inf }
 0x273   : > { %453 = vmax.xlane.f32.xlu0 %v452_v27  ;;  %v449_v28 = vpop.f32.mrb[6].mxu1 }
 0x274   : > { %v2986_v29 = vpop.f32.mrb[7].mxu1 }
 0x275   : > { %v355_v29 = vsel %vm348_vm1, %v3662_v12, 0.0 }
 0x279   : > { %v547_v30 = vpop.f32.mrb[8].mxu1 }
 0x27a   : > { %v2997_v31 = vpop.f32.mrb[9].mxu1  ;;  %v553_v32 = vsel %vm348_vm1, %v547_v30, -inf }
 0x27b   : > { %554 = vmax.xlane.f32.xlu1 %v553_v32  ;;  %v550_v33 = vpop.f32.mrb[10].mxu1 }
 0x27c   : > { %v2998_v34 = vpop.f32.mrb[11].mxu1 }
 0x281   : > { %v646_v35 = vpop.f32.mrb[12].mxu1 }
 0x282   : > { %v3009_v36 = vpop.f32.mrb[13].mxu1  ;;  %v652_v37 = vsel %vm348_vm1, %v646_v35, -inf }
 0x283   : > { %653 = vmax.xlane.f32.xlu1 %v652_v37  ;;  %v649_v38 = vpop.f32.mrb[14].mxu1 }
 0x284   : > { %v3010_v39 = vpop.f32.mrb[15].mxu1 }
 0x289   : > { %v746_v40 = vpop.f32.mrb[16].mxu1 }
 0x28a   : > { %v3021_v41 = vpop.f32.mrb[17].mxu1  ;;  %v752_v42 = vsel %vm348_vm1, %v746_v40, -inf }
 0x28b   : > { %753 = vmax.xlane.f32.xlu0 %v752_v42  ;;  %v749_v43 = vpop.f32.mrb[18].mxu1  ;;  %v3143_v42 = vld [vmem:[%s4414_s3 + $0x300] ss:$24 sps:$4 sm:$0xff]  }
 0x28c   : > { %v3022_v44 = vpop.f32.mrb[19].mxu1  ;;  %v3145_v43 = vld [vmem:[%s4414_s3 + $0x304] ss:$24 sps:$4 sm:$0xff]  }
 0x28d   : > { %v3148_v44 = vld [vmem:[%s4414_s3 + $0x34] ss:$24 sps:$4 sm:$0xff]  }
 0x291   : > { %v845_v45 = vpop.f32.mrb[20].mxu1 }
 0x292   : > { %v3033_v46 = vpop.f32.mrb[21].mxu1  ;;  %v851_v47 = vsel %vm348_vm1, %v845_v45, -inf }
 0x293   : > { %852 = vmax.xlane.f32.xlu1 %v851_v47  ;;  %v848_v48 = vpop.f32.mrb[22].mxu1  ;;  %v3146_v46 = vld [vmem:[%s4414_s3 + $0x30] ss:$24 sps:$4 sm:$0xff]  }
 0x294   : > { %v3034_v49 = vpop.f32.mrb[23].mxu1  ;;  %v3149_v47 = vld [vmem:[%s4414_s3 + $0x330] ss:$24 sps:$4 sm:$0xff]   ;;  %v3154_v48 = vld [vmem:[%s4414_s3 + $0x64] ss:$24 sps:$4 sm:$0xff]  }
 0x295   : > { %v3157_v49 = vld [vmem:[%s4414_s3 + $0x364] ss:$24 sps:$4 sm:$0xff]  }
 0x299   : > { %v945_v50 = vpop.f32.mrb[24].mxu1 }
 0x29a   : > { %v3045_v51 = vpop.f32.mrb[25].mxu1  ;;  %v951_v52 = vsel %vm348_vm1, %v945_v50, -inf }
 0x29b   : > { %952 = vmax.xlane.f32.xlu0 %v951_v52  ;;  %v948_v53 = vpop.f32.mrb[26].mxu1  ;;  %v3155_v51 = vld [vmem:[%s4414_s3 + $0x360] ss:$24 sps:$4 sm:$0xff]   ;;  %v3160_v52 = vld [vmem:[%s4414_s3 + $0x94] ss:$24 sps:$4 sm:$0xff]  }
 0x29c   : > { %v3046_v54 = vpop.f32.mrb[27].mxu1  ;;  %v3163_v53 = vld [vmem:[%s4414_s3 + $0x394] ss:$24 sps:$4 sm:$0xff]  }
 0x29d   : > { %v3158_v54 = vld [vmem:[%s4414_s3 + $0x90] ss:$24 sps:$4 sm:$0xff]  }
 0x2a1   : > { %v3698_v55 = vpop.f32.mrb[28].mxu1 }
 0x2a2   : > { %v3057_v56 = vpop.f32.mrb[29].mxu1  ;;  %v1050_v57 = vsel %vm348_vm1, %v3698_v55, -inf }
 0x2a3   : > { %1051 = vmax.xlane.f32.xlu1 %v1050_v57  ;;  %v1047_v58 = vpop.f32.mrb[30].mxu1  ;;  %v3166_v56 = vld [vmem:[%s4414_s3 + $0xc4] ss:$24 sps:$4 sm:$0xff]  }
 0x2a4   : > { %v3058_v59 = vpop.f32.mrb[31].mxu1  ;;  %v3169_v57 = vld [vmem:[%s4414_s3 + $0x3c4] ss:$24 sps:$4 sm:$0xff]   ;;  %v3164_v58 = vld [vmem:[%s4414_s3 + $0xc0] ss:$24 sps:$4 sm:$0xff]  }
 0x2a5   : > { %v3167_v59 = vld [vmem:[%s4414_s3 + $0x3c0] ss:$24 sps:$4 sm:$0xff]  }
 0x300   : > { %v454_v60 = vpop.xlane.xlu0 %453 }
 0x301   : > { %v455_v61 = vsub.f32 %v446_v25, %v454_v60  ;;  %v3172_v60 = vld [vmem:[%s4414_s3 + $0xf4] ss:$24 sps:$4 sm:$0xff]  }
 0x303   : > { %v456_v62 = vmul.f32 1.442695, %v455_v61  ;;  %v3175_v61 = vld [vmem:[%s4414_s3 + $0x3f4] ss:$24 sps:$4 sm:$0xff]  }
 0x305   : > { %3430 = vpow2.f32 %v456_v62  ;;  %v3170_v62 = vld [vmem:[%s4414_s3 + $0xf0] ss:$24 sps:$4 sm:$0xff]  }
 0x308   : > { %v555_v63 = vpop.xlane.xlu1 %554 }
 0x309   : > { %v556_v1 = vsub.f32 %v547_v30, %v555_v63  ;;  %v3173_v63 = vld [vmem:[%s4414_s3 + $0x3f0] ss:$24 sps:$4 sm:$0xff]  }
 0x30b   : > { %v557_v2 = vmul.f32 1.442695, %v556_v1  ;;  %v3178_v1 = vld [vmem:[%s4414_s3 + $0x124] ss:$24 sps:$4 sm:$0xff]  }
 0x30d   : > { %3432 = vpow2.f32 %v557_v2  ;;  %v3181_v2 = vld [vmem:[%s4414_s3 + $0x424] ss:$24 sps:$4 sm:$0xff]  }
 0x30f   : > { %v3431_v3 = vpop.eup %3430 }
 0x310   : > { %v654_v4 = vpop.xlane.xlu1 %653  ;;  %v461_v5 = vpack.c.bf16 %v3431_v3, %v3431_v3  ;;  %v458_v22 = vsel %vm348_vm1, %v3431_v3, 0.0  ;;  %v3176_v3 = vld [vmem:[%s4414_s3 + $0x120] ss:$24 sps:$4 sm:$0xff]  }
 0x311   : > { %v655_v6 = vsub.f32 %v646_v35, %v654_v4  ;;  %v3179_v4 = vld [vmem:[%s4414_s3 + $0x420] ss:$24 sps:$4 sm:$0xff]  }
 0x312   : > { %2990 = vmatmul.mubr.msk.bf16.vlgmr.msra.gmra.mrb[4].mxu0 %vm348_vm1, %v461_v5  ;;  %v3184_v5 = vld [vmem:[%s4414_s3 + $0x154] ss:$24 sps:$4 sm:$0xff]  }
 0x313   : > { %v656_v7 = vmul.f32 1.442695, %v655_v6  ;;  %3000 = vmatpush3.bf16.msra.mxu0 %v3656_v8  ;;  %3001 = vmatprep.mubr.msk.bf16.mxu0 %vm3543_vm0, %v3542_v0  ;;  %v3187_v6 = vld [vmem:[%s4414_s3 + $0x454] ss:$24 sps:$4 sm:$0xff]  }
 0x314   : > { %3011 = vmatprep.subr.bf16.mxu0 %v3542_v0 }
 0x315   : > { %3434 = vpow2.f32 %v656_v7  ;;  %v3182_v7 = vld [vmem:[%s4414_s3 + $0x150] ss:$24 sps:$4 sm:$0xff]  }
 0x317   : > { %v3433_v9 = vpop.eup %3432 }
 0x318   : > { %v754_v10 = vpop.xlane.xlu0 %753  ;;  %v562_v11 = vpack.c.bf16 %v3433_v9, %v3433_v9  ;;  %v559_v25 = vsel %vm348_vm1, %v3433_v9, 0.0  ;;  %v3185_v9 = vld [vmem:[%s4414_s3 + $0x450] ss:$24 sps:$4 sm:$0xff]  }
 0x319   : > { %v755_v13 = vsub.f32 %v746_v40, %v754_v10  ;;  %v3190_v10 = vld [vmem:[%s4414_s3 + $0x184] ss:$24 sps:$4 sm:$0xff]  }
 0x31a   : > { %3002 = vmatmul.mubr.msk.bf16.vlgmr.msra.gmra.mrb[8].mxu0 %vm348_vm1, %v562_v11  ;;  %v3193_v11 = vld [vmem:[%s4414_s3 + $0x484] ss:$24 sps:$4 sm:$0xff]  }
 0x31b   : > { %v756_v14 = vmul.f32 1.442695, %v755_v13  ;;  %3012 = vmatpush3.bf16.msra.mxu0 %v3656_v8  ;;  %3013 = vmatprep.mubr.msk.bf16.mxu0 %vm3543_vm0, %v3542_v0  ;;  %v3188_v13 = vld [vmem:[%s4414_s3 + $0x180] ss:$24 sps:$4 sm:$0xff]  }
 0x31c   : > { %3023 = vmatprep.subr.bf16.mxu0 %v3542_v0 }
 0x31d   : > { %3436 = vpow2.f32 %v756_v14  ;;  %v3191_v14 = vld [vmem:[%s4414_s3 + $0x480] ss:$24 sps:$4 sm:$0xff]  }
 0x31f   : > { %v3435_v15 = vpop.eup %3434 }
 0x320   : > { %v853_v16 = vpop.xlane.xlu1 %852  ;;  %v658_v17 = vsel %vm348_vm1, %v3435_v15, 0.0  ;;  %v661_v18 = vpack.c.bf16 %v3435_v15, %v3435_v15  ;;  %v3196_v15 = vld [vmem:[%s4414_s3 + $0x1b4] ss:$24 sps:$4 sm:$0xff]  }
 0x321   : > { %v854_v19 = vsub.f32 %v845_v45, %v853_v16  ;;  %659 = vadd.xlane.f32.xlu0 %v658_v17  ;;  %v3151_v45 = vld [vmem:[%s4414_s3 + $0x334] ss:$24 sps:$4 sm:$0xff]   ;;  %v3194_v17 = vld [vmem:[%s4414_s3 + $0x1b0] ss:$24 sps:$4 sm:$0xff]  }
 0x322   : > { %3014 = vmatmul.mubr.msk.bf16.vlgmr.msra.gmra.mrb[12].mxu0 %vm348_vm1, %v661_v18  ;;  %v3199_v16 = vld [vmem:[%s4414_s3 + $0x4b4] ss:$24 sps:$4 sm:$0xff]   ;;  %v3197_v18 = vld [vmem:[%s4414_s3 + $0x4b0] ss:$24 sps:$4 sm:$0xff]  }
 0x323   : > { %v855_v20 = vmul.f32 1.442695, %v854_v19  ;;  %3024 = vmatpush3.bf16.msra.mxu0 %v3656_v8  ;;  %3025 = vmatprep.mubr.msk.bf16.mxu0 %vm3543_vm0, %v3542_v0  ;;  %v3202_v19 = vld [vmem:[%s4414_s3 + $0x1e4] ss:$24 sps:$4 sm:$0xff]  }
 0x324   : > { %3035 = vmatprep.subr.bf16.mxu0 %v3542_v0 }
 0x325   : > { %3438 = vpow2.f32 %v855_v20  ;;  %459 = vadd.xlane.f32.xlu0 %v458_v22  ;;  %v3205_v20 = vld [vmem:[%s4414_s3 + $0x4e4] ss:$24 sps:$4 sm:$0xff]   ;;  %v3200_v22 = vld [vmem:[%s4414_s3 + $0x1e0] ss:$24 sps:$4 sm:$0xff]  }
 0x327   : > { %v3437_v23 = vpop.eup %3436 }
 0x328   : > { %v953_v24 = vpop.xlane.xlu0 %952  ;;  %v761_v26 = vpack.c.bf16 %v3437_v23, %v3437_v23  ;;  %v758_v41 = vsel %vm348_vm1, %v3437_v23, 0.0  ;;  %v3203_v23 = vld [vmem:[%s4414_s3 + $0x4e0] ss:$24 sps:$4 sm:$0xff]  }
 0x329   : > { %v954_v27 = vsub.f32 %v945_v50, %v953_v24  ;;  %560 = vadd.xlane.f32.xlu0 %v559_v25  ;;  %v3152_v50 = vld [vmem:[%s4414_s3 + $0x60] ss:$24 sps:$4 sm:$0xff]  }
 0x32a   : > { %3026 = vmatmul.mubr.msk.bf16.vlgmr.msra.gmra.mrb[16].mxu0 %vm348_vm1, %v761_v26 }
 0x32b   : > { %v955_v28 = vmul.f32 1.442695, %v954_v27  ;;  %3036 = vmatpush3.bf16.msra.mxu0 %v3656_v8  ;;  %3037 = vmatprep.mubr.msk.bf16.mxu0 %vm3543_vm0, %v3542_v0 }
 0x32c   : > { %3047 = vmatprep.subr.bf16.mxu0 %v3542_v0 }
 0x32d   : > { %3440 = vpow2.f32 %v955_v28  ;;  %356 = vadd.xlane.f32.xlu0 %v355_v29 }
 0x32f   : > { %v3439_v30 = vpop.eup %3438 }
 0x330   : > { %v1052_v31 = vpop.xlane.xlu1 %1051  ;;  %v860_v32 = vpack.c.bf16 %v3439_v30, %v3439_v30  ;;  %v857_v39 = vsel %vm348_vm1, %v3439_v30, 0.0 }
 0x331   : > { %v1053_v33 = vsub.f32 %v3698_v55, %v1052_v31  ;;  %v3161_v55 = vld [vmem:[%s4414_s3 + $0x390] ss:$24 sps:$4 sm:$0xff]  }
 0x332   : > { %3038 = vmatmul.mubr.msk.bf16.vlgmr.msra.gmra.mrb[20].mxu0 %vm348_vm1, %v860_v32 }
 0x333   : > { %v1054_v34 = vmul.f32 1.442695, %v1053_v33  ;;  %3048 = vmatpush3.bf16.msra.mxu0 %v3656_v8  ;;  %3049 = vmatprep.mubr.msk.bf16.mxu0 %vm3543_vm0, %v3542_v0 }
 0x334   : > { %3059 = vmatprep.subr.bf16.mxu0 %v3542_v0 }
 0x335   : > { %3442 = vpow2.f32 %v1054_v34 }
 0x337   : > { %v3441_v12 = vpop.eup %3440 }
 0x338   : > { %v960_v35 = vpack.c.bf16 %v3441_v12, %v3441_v12  ;;  %v957_v40 = vsel %vm348_vm1, %v3441_v12, 0.0 }
 0x33a   : > { %3050 = vmatmul.mubr.msk.bf16.vlgmr.msra.gmra.mrb[24].mxu0 %vm348_vm1, %v960_v35 }
 0x33b   : > { %3060 = vmatpush3.bf16.msra.mxu0 %v3656_v8  ;;  %3061 = vmatprep.mubr.msk.bf16.mxu0 %vm3543_vm0, %v3542_v0  ;;  %v3140_v0 = vld [vmem:[%s4414_s3] ss:$24 sps:$4 sm:$0xff]   ;;  %v3142_v8 = vld [vmem:[%s4414_s3 + $0x4] ss:$24 sps:$4 sm:$0xff]  }
 0x33c   : > { %2266 = vmatprep.subr.bf16.mxu1 %v3142_v8  ;;  %2307 = vmatprep.subr.bf16.mxu0 %v3145_v43  ;;  %v3209_v8 = vld [vmem:[%s4414_s3 + $0x510] ss:$24 sps:$4 sm:$0xff]  }
 0x33d   : > { %2267 = vmatpush1.bf16.msra.mxu1 %v3140_v0  ;;  %v3206_v0 = vld [vmem:[%s4414_s3 + $0x210] ss:$24 sps:$4 sm:$0xff]  }
 0x33e   : > { %2268 = vmatprep.subr.bf16.mxu1 %v3148_v44 }
 0x33f   : > { %v3443_v36 = vpop.eup %3442 }
 0x340   : > { %v1056_v37 = vsel %vm348_vm1, %v3443_v36, 0.0  ;;  %v1059_v38 = vpack.c.bf16 %v3443_v36, %v3443_v36 }
 0x341   : > { %1057 = vadd.xlane.f32.xlu1 %v1056_v37  ;;  %2269 = vmatpush1.bf16.msra.mxu1 %v3146_v46  ;;  %v3214_v46 = vld [vmem:[%s4414_s3 + $0x244] ss:$24 sps:$4 sm:$0xff]  }
 0x342   : > { %3062 = vmatmul.mubr.msk.bf16.vlgmr.msra.gmra.mrb[28].mxu0 %vm348_vm1, %v1059_v38  ;;  %2270 = vmatprep.subr.bf16.mxu1 %v3154_v48  ;;  %v3217_v48 = vld [vmem:[%s4414_s3 + $0x544] ss:$24 sps:$4 sm:$0xff]  }
 0x343   : > { %2308 = vmatpush1.bf16.msra.mxu0 %v3143_v42 }
 0x344   : > { %2309 = vmatprep.subr.bf16.mxu0 %v3151_v45  ;;  %v3212_v45 = vld [vmem:[%s4414_s3 + $0x240] ss:$24 sps:$4 sm:$0xff]  }
 0x345   : > { %858 = vadd.xlane.f32.xlu1 %v857_v39  ;;  %2271 = vmatpush1.bf16.msra.mxu1 %v3152_v50  ;;  %v3208_v39 = vld [vmem:[%s4414_s3 + $0x214] ss:$24 sps:$4 sm:$0xff]  }
 0x346   : > { %2272 = vmatprep.subr.bf16.mxu1 %v3160_v52  ;;  %v3223_v50 = vld [vmem:[%s4414_s3 + $0x574] ss:$24 sps:$4 sm:$0xff]  }
 0x347   : > { %2310 = vmatpush1.bf16.msra.mxu0 %v3149_v47  ;;  %v3215_v47 = vld [vmem:[%s4414_s3 + $0x540] ss:$24 sps:$4 sm:$0xff]  }
 0x348   : > { %2311 = vmatprep.subr.bf16.mxu0 %v3157_v49  ;;  %v3220_v49 = vld [vmem:[%s4414_s3 + $0x274] ss:$24 sps:$4 sm:$0xff]  }
 0x349   : > { %958 = vadd.xlane.f32.xlu1 %v957_v40  ;;  %2273 = vmatpush1.bf16.msra.mxu1 %v3158_v54  ;;  %v3211_v40 = vld [vmem:[%s4414_s3 + $0x514] ss:$24 sps:$4 sm:$0xff]   ;;  %v3226_v54 = vld [vmem:[%s4414_s3 + $0x2a4] ss:$24 sps:$4 sm:$0xff]  }
 0x34a   : > { %2274 = vmatprep.subr.bf16.mxu1 %v3166_v56 }
 0x34b   : > { %2312 = vmatpush1.bf16.msra.mxu0 %v3155_v51  ;;  %v3218_v51 = vld [vmem:[%s4414_s3 + $0x270] ss:$24 sps:$4 sm:$0xff]  }
 0x34c   : > { %2313 = vmatprep.subr.bf16.mxu0 %v3163_v53  ;;  %v3221_v53 = vld [vmem:[%s4414_s3 + $0x570] ss:$24 sps:$4 sm:$0xff]  }
 0x34d   : > { %759 = vadd.xlane.f32.xlu1 %v758_v41  ;;  %2275 = vmatpush1.bf16.msra.mxu1 %v3164_v58 }
 0x34e   : > { %2276 = vmatprep.subr.bf16.mxu1 %v3172_v60 }
 0x34f   : > { %2314 = vmatpush1.bf16.msra.mxu0 %v3161_v55 }
 0x350   : > { %2315 = vmatprep.subr.bf16.mxu0 %v3169_v57  ;;  %v3229_v57 = vld [vmem:[%s4414_s3 + $0x5a4] ss:$24 sps:$4 sm:$0xff]  }
 0x351   : > { %2277 = vmatpush1.bf16.msra.mxu1 %v3170_v62  ;;  %v3224_v62 = vld [vmem:[%s4414_s3 + $0x2a0] ss:$24 sps:$4 sm:$0xff]  }
 0x352   : > { %2278 = vmatprep.subr.bf16.mxu1 %v3178_v1 }
 0x353   : > { %2316 = vmatpush1.bf16.msra.mxu0 %v3167_v59 }
 0x354   : > { %2317 = vmatprep.subr.bf16.mxu0 %v3175_v61 }
 0x355   : > { %2279 = vmatpush1.bf16.msra.mxu1 %v3176_v3  ;;  %v3232_v3 = vld [vmem:[%s4414_s3 + $0x2d4] ss:$24 sps:$4 sm:$0xff]  }
 0x356   : > { %2280 = vmatprep.subr.bf16.mxu1 %v3184_v5 }
 0x357   : > { %2318 = vmatpush1.bf16.msra.mxu0 %v3173_v63 }
 0x358   : > { %2319 = vmatprep.subr.bf16.mxu0 %v3181_v2  ;;  %v3227_v2 = vld [vmem:[%s4414_s3 + $0x5a0] ss:$24 sps:$4 sm:$0xff]  }
 0x359   : > { %2281 = vmatpush1.bf16.msra.mxu1 %v3182_v7  ;;  %v3233_v7 = vld [vmem:[%s4414_s3 + $0x5d0] ss:$24 sps:$4 sm:$0xff]  }
 0x35a   : > { %2282 = vmatprep.subr.bf16.mxu1 %v3190_v10 }
 0x35b   : > { %2320 = vmatpush1.bf16.msra.mxu0 %v3179_v4  ;;  %v3235_v4 = vld [vmem:[%s4414_s3 + $0x5d4] ss:$24 sps:$4 sm:$0xff]  }
 0x35c   : > { %2321 = vmatprep.subr.bf16.mxu0 %v3187_v6  ;;  %v3230_v6 = vld [vmem:[%s4414_s3 + $0x2d0] ss:$24 sps:$4 sm:$0xff]  }
 0x35d   : > { %2283 = vmatpush1.bf16.msra.mxu1 %v3188_v13  ;;  %v3238_v13 = vld [vmem:[%s4414_s3 + $0xc] ss:$24 sps:$4 sm:$0xff]  }
 0x35e   : > { %2284 = vmatprep.subr.bf16.mxu1 %v3196_v15 }
 0x35f   : > { %2322 = vmatpush1.bf16.msra.mxu0 %v3185_v9 }
 0x360   : > { %2323 = vmatprep.subr.bf16.mxu0 %v3193_v11 }
 0x361   : > { %2285 = vmatpush1.bf16.msra.mxu1 %v3194_v17 }
 0x362   : > { %2286 = vmatprep.subr.bf16.mxu1 %v3202_v19 }
 0x363   : > { %2324 = vmatpush1.bf16.msra.mxu0 %v3191_v14  ;;  %v3241_v14 = vld [vmem:[%s4414_s3 + $0x30c] ss:$24 sps:$4 sm:$0xff]  }
 0x364   : > { %2325 = vmatprep.subr.bf16.mxu0 %v3199_v16 }
 0x365   : > { %2287 = vmatpush1.bf16.msra.mxu1 %v3200_v22 }
 0x366   : > { %2288 = vmatprep.subr.bf16.mxu1 %v3208_v39 }
 0x367   : > { %2326 = vmatpush1.bf16.msra.mxu0 %v3197_v18 }
 0x368   : > { %2327 = vmatprep.subr.bf16.mxu0 %v3205_v20 }
 0x369   : > { %2289 = vmatpush1.bf16.msra.mxu1 %v3206_v0 }
 0x36a   : > { %2290 = vmatprep.subr.bf16.mxu1 %v3214_v46 }
 0x36b   : > { %2328 = vmatpush1.bf16.msra.mxu0 %v3203_v23 }
 0x36c   : > { %2329 = vmatprep.subr.bf16.mxu0 %v3211_v40 }
 0x36d   : > { %2291 = vmatpush1.bf16.msra.mxu1 %v3212_v45 }
 0x36e   : > { %2292 = vmatprep.subr.bf16.mxu1 %v3220_v49  ;;  %v3244_v49 = vld [vmem:[%s4414_s3 + $0x3c] ss:$24 sps:$4 sm:$0xff]  }
 0x36f   : > { %2330 = vmatpush1.bf16.msra.mxu0 %v3209_v8 }
 0x370   : > { %2331 = vmatprep.subr.bf16.mxu0 %v3217_v48 }
 0x371   : > { %2293 = vmatpush1.bf16.msra.mxu1 %v3218_v51  ;;  %v3242_v51 = vld [vmem:[%s4414_s3 + $0x38] ss:$24 sps:$4 sm:$0xff]  }
 0x372   : > { %2294 = vmatprep.subr.bf16.mxu1 %v3226_v54  ;;  %v3253_v54 = vld [vmem:[%s4414_s3 + $0x36c] ss:$24 sps:$4 sm:$0xff]  }
 0x373   : > { %2332 = vmatpush1.bf16.msra.mxu0 %v3215_v47 }
 0x374   : > { %2333 = vmatprep.subr.bf16.mxu0 %v3223_v50  ;;  %v3247_v50 = vld [vmem:[%s4414_s3 + $0x33c] ss:$24 sps:$4 sm:$0xff]  }
 0x375   : > { %2295 = vmatpush1.bf16.msra.mxu1 %v3224_v62  ;;  %v3265_v62 = vld [vmem:[%s4414_s3 + $0x3cc] ss:$24 sps:$4 sm:$0xff]  }
 0x376   : > { %2296 = vmatprep.subr.bf16.mxu1 %v3232_v3  ;;  %v3271_v3 = vld [vmem:[%s4414_s3 + $0x3fc] ss:$24 sps:$4 sm:$0xff]  }
 0x377   : > { %2334 = vmatpush1.bf16.msra.mxu0 %v3221_v53  ;;  %v3250_v53 = vld [vmem:[%s4414_s3 + $0x6c] ss:$24 sps:$4 sm:$0xff]  }
 0x378   : > { %2335 = vmatprep.subr.bf16.mxu0 %v3229_v57  ;;  %v3256_v57 = vld [vmem:[%s4414_s3 + $0x9c] ss:$24 sps:$4 sm:$0xff]  }
 0x379   : > { %2297 = vmatpush1.bf16.msra.mxu1 %v3230_v6  ;;  %v3274_v6 = vld [vmem:[%s4414_s3 + $0x12c] ss:$24 sps:$4 sm:$0xff]  }
 0x37a   : > { %2348 = vmatprep.subr.bf16.mxu1 %v3238_v13  ;;  %v3283_v13 = vld [vmem:[%s4414_s3 + $0x45c] ss:$24 sps:$4 sm:$0xff]  }
 0x37b   : > { %2336 = vmatpush1.bf16.msra.mxu0 %v3227_v2  ;;  %v3268_v2 = vld [vmem:[%s4414_s3 + $0xfc] ss:$24 sps:$4 sm:$0xff]  }
 0x37c   : > { %2337 = vmatprep.subr.bf16.mxu0 %v3235_v4  ;;  %v3266_v4 = vld [vmem:[%s4414_s3 + $0xf8] ss:$24 sps:$4 sm:$0xff]  }
 0x37f   : > { %2338 = vmatpush1.bf16.msra.mxu0 %v3233_v7  ;;  %v3277_v7 = vld [vmem:[%s4414_s3 + $0x42c] ss:$24 sps:$4 sm:$0xff]  }
 0x380   : > { %2389 = vmatprep.subr.bf16.mxu0 %v3241_v14  ;;  %v3278_v14 = vld [vmem:[%s4414_s3 + $0x158] ss:$24 sps:$4 sm:$0xff]  }
 0x3ae   : > { %v660_v32 = vpop.xlane.xlu0 %659 }
 0x3b2   : > { %v460_v35 = vpop.xlane.xlu0 %459 }
 0x3b3   : > { %3444 = vrcp.f32 %v460_v35 }
 0x3bd   : > { %v3445_v52 = vpop.eup %3444 }
 0x3ce   : > { %v1058_v33 = vpop.xlane.xlu1 %1057 }
 0x3d2   : > { %v859_v37 = vpop.xlane.xlu1 %858 }
 0x3d3   : > { %3446 = vrcp.f32 %v859_v37 }
 0x3d4   : > { %3448 = vrcp.f32 %v660_v32 }
 0x3d5   : > { %3450 = vrcp.f32 %v1058_v33 }
 0x3dd   : > { %v3447_v55 = vpop.eup %3446 }
 0x3de   : > { %v3449_v15 = vpop.eup %3448 }
 0x3df   : > { %v3451_v16 = vpop.eup %3450 }
 0x3e5   : > { %v499_v24 = vpop.f32.mrb[4].mxu0 }
 0x3e6   : > { %v2991_v25 = vpop.f32.mrb[5].mxu0  ;;  %v506_v58 = vmul.f32 %v3445_v52, %v499_v24  ;;  %v3245_v52 = vld [vmem:[%s4414_s3 + $0x338] ss:$24 sps:$4 sm:$0xff]  }
 0x3e7   : > { %v502_v26 = vpop.f32.mrb[6].mxu0  ;;  %v561_v25 = vpop.xlane.xlu0 %560 }
 0x3e8   : > { %v2992_v27 = vpop.f32.mrb[7].mxu0  ;;  %v959_v26 = vpop.xlane.xlu1 %958 }
 0x3eb   : > { %v357_v27 = vpop.xlane.xlu0 %356 }
 0x3ec   : > { %3452 = vrcp.f32 %v357_v27  ;;  %v3296_v27 = vld [vmem:[%s4414_s3 + $0x1e8] ss:$24 sps:$4 sm:$0xff]  }
 0x3ed   : > { %v3874_v28 = vpop.f32.mrb[8].mxu0  ;;  %3454 = vrcp.f32 %v561_v25  ;;  %v3298_v25 = vld [vmem:[%s4414_s3 + $0x1ec] ss:$24 sps:$4 sm:$0xff]  }
 0x3ee   : > { %v3003_v29 = vpop.f32.mrb[9].mxu0 }
 0x3ef   : > { %v603_v30 = vpop.f32.mrb[10].mxu0  ;;  %v760_v29 = vpop.xlane.xlu1 %759 }
 0x3f0   : > { %v3004_v31 = vpop.f32.mrb[11].mxu0  ;;  %3456 = vrcp.f32 %v760_v29  ;;  %v3299_v29 = vld [vmem:[%s4414_s3 + $0x4e8] ss:$24 sps:$4 sm:$0xff]  }
 0x3f1   : > { %3458 = vrcp.f32 %v959_v26  ;;  %v3301_v26 = vld [vmem:[%s4414_s3 + $0x4ec] ss:$24 sps:$4 sm:$0xff]  }
 0x3f5   : > { %v3876_v34 = vpop.f32.mrb[12].mxu0 }
 0x3f6   : > { %v3015_v12 = vpop.f32.mrb[13].mxu0  ;;  %v706_v18 = vmul.f32 %v3449_v15, %v3876_v34  ;;  %v3453_v31 = vpop.eup %3452  ;;  %v3281_v15 = vld [vmem:[%s4414_s3 + $0x458] ss:$24 sps:$4 sm:$0xff]  }
 0x3f7   : > { %v702_v36 = vpop.f32.mrb[14].mxu0  ;;  %v3455_v32 = vpop.eup %3454  ;;  %v407_v37 = vmul.f32 %v3453_v31, %v3690_v21  ;;  %v3239_v21 = vld [vmem:[%s4414_s3 + $0x308] ss:$24 sps:$4 sm:$0xff]   ;;  %v3307_v31 = vld [vmem:[%s4414_s3 + $0x51c] ss:$24 sps:$4 sm:$0xff]  }
 0x3f8   : > { %v3016_v38 = vpop.f32.mrb[15].mxu0  ;;  %v607_v39 = vmul.f32 %v3455_v32, %v3874_v28  ;;  %v3302_v32 = vld [vmem:[%s4414_s3 + $0x218] ss:$24 sps:$4 sm:$0xff]  }
 0x3fa   : > { %v3457_v34 = vpop.eup %3456 }
 0x3fb   : > { %v3459_v35 = vpop.eup %3458 }
 0x3fd   : > { %v3884_v41 = vpop.f32.mrb[16].mxu0 }
 0x3fe   : > { %v3027_v42 = vpop.f32.mrb[17].mxu0  ;;  %v806_v36 = vmul.f32 %v3457_v34, %v3884_v41  ;;  %v3236_v41 = vld [vmem:[%s4414_s3 + $0x8] ss:$24 sps:$4 sm:$0xff]   ;;  %v3313_v34 = vld [vmem:[%s4414_s3 + $0x54c] ss:$24 sps:$4 sm:$0xff]  }
 0x3ff   : > { %v802_v43 = vpop.f32.mrb[18].mxu0 }
 0x400   : > { %v3028_v44 = vpop.f32.mrb[19].mxu0 }
 0x405   : > { %v898_v56 = vpop.f32.mrb[20].mxu0 }
 0x406   : > { %v905_v59 = vmul.f32 %v3447_v55, %v898_v56  ;;  %v3039_v60 = vpop.f32.mrb[21].mxu0  ;;  %v3248_v55 = vld [vmem:[%s4414_s3 + $0x68] ss:$24 sps:$4 sm:$0xff]  }
 0x407   : > { %v901_v61 = vpop.f32.mrb[22].mxu0  ;;  %v3251_v56 = vld [vmem:[%s4414_s3 + $0x368] ss:$24 sps:$4 sm:$0xff]   ;;  %v3257_v60 = vld [vmem:[%s4414_s3 + $0x398] ss:$24 sps:$4 sm:$0xff]  }
 0x408   : > { %v3131_v63 = vpack.i.bf16 %v905_v59, %v506_v58  ;;  %v3040_v1 = vpop.f32.mrb[23].mxu0  ;;  %v3259_v58 = vld [vmem:[%s4414_s3 + $0x39c] ss:$24 sps:$4 sm:$0xff]   ;;  %v3254_v59 = vld [vmem:[%s4414_s3 + $0x98] ss:$24 sps:$4 sm:$0xff]  }
 0x409   : > { %v3262_v61 = vld [vmem:[%s4414_s3 + $0xcc] ss:$24 sps:$4 sm:$0xff]   ;;  %v3263_v1 = vld [vmem:[%s4414_s3 + $0x3c8] ss:$24 sps:$4 sm:$0xff]  }
 0x40a   : > { %3132 = vrot.lane.b32.xlu1 %v3131_v63, %s3544_s10  ;;  %v3260_v63 = vld [vmem:[%s4414_s3 + $0xc8] ss:$24 sps:$4 sm:$0xff]  }
 0x40d   : > { %v998_v5 = vpop.f32.mrb[24].mxu0 }
 0x40e   : > { %v3051_v9 = vpop.f32.mrb[25].mxu0  ;;  %v1005_v40 = vmul.f32 %v3459_v35, %v998_v5  ;;  %v3269_v5 = vld [vmem:[%s4414_s3 + $0x3f8] ss:$24 sps:$4 sm:$0xff]   ;;  %v3308_v35 = vld [vmem:[%s4414_s3 + $0x248] ss:$24 sps:$4 sm:$0xff]  }
 0x40f   : > { %v1001_v10 = vpop.f32.mrb[26].mxu0  ;;  %v3272_v9 = vld [vmem:[%s4414_s3 + $0x128] ss:$24 sps:$4 sm:$0xff]  }
 0x410   : > { %v3052_v11 = vpop.f32.mrb[27].mxu0  ;;  %v3275_v10 = vld [vmem:[%s4414_s3 + $0x428] ss:$24 sps:$4 sm:$0xff]  }
 0x411   : > { %v3280_v11 = vld [vmem:[%s4414_s3 + $0x15c] ss:$24 sps:$4 sm:$0xff]  }
 0x415   : > { %v1097_v17 = vpop.f32.mrb[28].mxu0 }
 0x416   : > { %v1104_v19 = vmul.f32 %v3451_v16, %v1097_v17  ;;  %v3063_v20 = vpop.f32.mrb[29].mxu0  ;;  %v3286_v16 = vld [vmem:[%s4414_s3 + $0x18c] ss:$24 sps:$4 sm:$0xff]  }
 0x417   : > { %v1100_v22 = vpop.f32.mrb[30].mxu0  ;;  %v3289_v17 = vld [vmem:[%s4414_s3 + $0x48c] ss:$24 sps:$4 sm:$0xff]   ;;  %v3292_v20 = vld [vmem:[%s4414_s3 + $0x1bc] ss:$24 sps:$4 sm:$0xff]  }
 0x418   : > { %v3126_v23 = vpack.i.bf16 %v1104_v19, %v706_v18  ;;  %v3064_v24 = vpop.f32.mrb[31].mxu0  ;;  %v3284_v18 = vld [vmem:[%s4414_s3 + $0x188] ss:$24 sps:$4 sm:$0xff]   ;;  %v3295_v22 = vld [vmem:[%s4414_s3 + $0x4bc] ss:$24 sps:$4 sm:$0xff]  }
 0x419   : > { %v3287_v19 = vld [vmem:[%s4414_s3 + $0x488] ss:$24 sps:$4 sm:$0xff]   ;;  %v3293_v24 = vld [vmem:[%s4414_s3 + $0x4b8] ss:$24 sps:$4 sm:$0xff]  }
 0x41a   : > { %3127 = vrot.lane.b32.xlu0 %v3126_v23, %s3544_s10  ;;  %v3290_v23 = vld [vmem:[%s4414_s3 + $0x1b8] ss:$24 sps:$4 sm:$0xff]   ;;  %s3466_s10 = sshll.u32 %s3545_s9, 4  ;;  %s3467_s10 = int_to_ptr.vmem [resolvable:$false] %s3466_s10 }
 0x41b   : > { %s3468_s11 = scalar_lea.vmem %s3467_s10, 1536  ;;  %p3469_p1 = scmp.lt.s32.totalorder %s4364_s24, %s3467_s10 }
 0x41c   : > { %p3470_p2 = scmp.lt.s32.totalorder %s3468_s11, %s3462_s8 }
 0x41e   : > { %p3471_p3 = por %p3470_p2, %p3469_p1 }
 0x420   : > { %p3472_p5 = pnand %p3471_p3, %p3465_p0 }
 0x47c   : > { %v3133_v30 = vpop.permute.xlu1 %3132 }
 0x47d   : > { %v3135_v33 = vunpack.i.h.bf16 %v3133_v30  ;;  %v3134_v12 = vunpack.i.l.bf16 %v3133_v30  ;;  %v3304_v30 = vld [vmem:[%s4414_s3 + $0x21c] ss:$24 sps:$4 sm:$0xff]  }
 0x47f   : > { %v910_v42 = vsel %vm511_vm3, %v806_v36, %v3135_v33  ;;  %v512_v43 = vsel %vm511_vm3, %v407_v37, %v3134_v12  ;;  %v3305_v33 = vld [vmem:[%s4414_s3 + $0x518] ss:$24 sps:$4 sm:$0xff]   ;;  %v3310_v12 = vld [vmem:[%s4414_s3 + $0x24c] ss:$24 sps:$4 sm:$0xff]   ;;  %v3311_v36 = vld [vmem:[%s4414_s3 + $0x548] ss:$24 sps:$4 sm:$0xff]  }
 0x480   : > { %v3960_v28 = vpack.c.bf16 %v910_v42, %v910_v42  ;;  %v3962_v48 = vpack.c.bf16 %v512_v43, %v512_v43  ;;  %v3316_v37 = vld [vmem:[%s4414_s3 + $0x27c] ss:$24 sps:$4 sm:$0xff]   ;;  %v3320_v42 = vld [vmem:[%s4414_s3 + $0x2a8] ss:$24 sps:$4 sm:$0xff]  }
 0x481   : > { %v3323_v43 = vld [vmem:[%s4414_s3 + $0x5a8] ss:$24 sps:$4 sm:$0xff]  }
 0x48c   : > { %v3128_v38 = vpop.permute.xlu0 %3127 }
 0x48d   : > { %v3130_v0 = vunpack.i.h.bf16 %v3128_v38  ;;  %v3129_v8 = vunpack.i.l.bf16 %v3128_v38  ;;  %v3319_v38 = vld [vmem:[%s4414_s3 + $0x57c] ss:$24 sps:$4 sm:$0xff]  }
 0x48f   : > { %v711_v44 = vsel %vm511_vm3, %v607_v39, %v3129_v8  ;;  %v1109_v45 = vsel %vm511_vm3, %v1005_v40, %v3130_v0  ;;  %v3314_v39 = vld [vmem:[%s4414_s3 + $0x278] ss:$24 sps:$4 sm:$0xff]   ;;  %v3322_v0 = vld [vmem:[%s4414_s3 + $0x2ac] ss:$24 sps:$4 sm:$0xff]  }
 0x490   : > { %v3950_v46 = vpack.c.bf16 %v711_v44, %v711_v44  ;;  %v3952_v47 = vpack.c.bf16 %v1109_v45, %v1109_v45  ;;  %v3317_v40 = vld [vmem:[%s4414_s3 + $0x578] ss:$24 sps:$4 sm:$0xff]   ;;  %v3325_v8 = vld [vmem:[%s4414_s3 + $0x5ac] ss:$24 sps:$4 sm:$0xff]   ;;  %v3328_v44 = vld [vmem:[%s4414_s3 + $0x2dc] ss:$24 sps:$4 sm:$0xff]  }
 0x491   : > { %v3331_v45 = vld [vmem:[%s4414_s3 + $0x5dc] ss:$24 sps:$4 sm:$0xff]  }
 0x492   : > { %2298 = vmatprep.mubr.bf16.mxu1 %v3950_v46  ;;  %2339 = vmatprep.mubr.bf16.mxu0 %v3952_v47 }
 0x493   : > { %2299 = vmatmul.mubr.bf16.vlgmr.msra.gmra.mrb[32].mxu1 %v3962_v48  ;;  %2340 = vmatmul.mubr.bf16.vlgmr.msra.gmra.mrb[32].mxu0 %v3960_v28 }
 0x494   : > { %2349 = vmatpush1.bf16.msra.mxu1 %v3236_v41  ;;  %2390 = vmatpush1.bf16.msra.mxu0 %v3239_v21  ;;  %v3326_v41 = vld [vmem:[%s4414_s3 + $0x2d8] ss:$24 sps:$4 sm:$0xff]  }
 0x495   : > { %2380 = vmatprep.mubr.bf16.mxu1 %v3950_v46  ;;  %2421 = vmatprep.mubr.bf16.mxu0 %v3952_v47  ;;  %v3329_v21 = vld [vmem:[%s4414_s3 + $0x5d8] ss:$24 sps:$4 sm:$0xff]  }
 0x496   : > { %2350 = vmatprep.subr.bf16.mxu1 %v3244_v49  ;;  %2391 = vmatprep.subr.bf16.mxu0 %v3247_v50  ;;  %v3334_v49 = vld [vmem:[%s4414_s3 + $0x14] ss:$24 sps:$4 sm:$0xff]  }
 0x497   : > { %v3337_v50 = vld [vmem:[%s4414_s3 + $0x314] ss:$24 sps:$4 sm:$0xff]  }
 0x498   : > { %2351 = vmatpush1.bf16.msra.mxu1 %v3242_v51  ;;  %2392 = vmatpush1.bf16.msra.mxu0 %v3245_v52  ;;  %v3332_v51 = vld [vmem:[%s4414_s3 + $0x10] ss:$24 sps:$4 sm:$0xff]  }
 0x499   : > { %2352 = vmatprep.subr.bf16.mxu1 %v3250_v53  ;;  %2393 = vmatprep.subr.bf16.mxu0 %v3253_v54  ;;  %v3335_v52 = vld [vmem:[%s4414_s3 + $0x310] ss:$24 sps:$4 sm:$0xff]   ;;  %v3340_v53 = vld [vmem:[%s4414_s3 + $0x44] ss:$24 sps:$4 sm:$0xff]  }
 0x49a   : > { %v3343_v54 = vld [vmem:[%s4414_s3 + $0x344] ss:$24 sps:$4 sm:$0xff]  }
 0x49c   : > { %2353 = vmatpush1.bf16.msra.mxu1 %v3248_v55  ;;  %2394 = vmatpush1.bf16.msra.mxu0 %v3251_v56  ;;  %v3338_v55 = vld [vmem:[%s4414_s3 + $0x40] ss:$24 sps:$4 sm:$0xff]  }
 0x49d   : > { %2354 = vmatprep.subr.bf16.mxu1 %v3256_v57  ;;  %2395 = vmatprep.subr.bf16.mxu0 %v3259_v58  ;;  %v3341_v56 = vld [vmem:[%s4414_s3 + $0x340] ss:$24 sps:$4 sm:$0xff]   ;;  %v3346_v57 = vld [vmem:[%s4414_s3 + $0x74] ss:$24 sps:$4 sm:$0xff]   ;;  %v3344_v58 = vld [vmem:[%s4414_s3 + $0x70] ss:$24 sps:$4 sm:$0xff]  }
 0x4a0   : > { %2355 = vmatpush1.bf16.msra.mxu1 %v3254_v59  ;;  %2396 = vmatpush1.bf16.msra.mxu0 %v3257_v60  ;;  %v3352_v59 = vld [vmem:[%s4414_s3 + $0xa4] ss:$24 sps:$4 sm:$0xff]  }
 0x4a1   : > { %2356 = vmatprep.subr.bf16.mxu1 %v3262_v61  ;;  %2397 = vmatprep.subr.bf16.mxu0 %v3265_v62  ;;  %v3355_v60 = vld [vmem:[%s4414_s3 + $0x3a4] ss:$24 sps:$4 sm:$0xff]   ;;  %v3350_v61 = vld [vmem:[%s4414_s3 + $0xa0] ss:$24 sps:$4 sm:$0xff]  }
 0x4a2   : > { %v3353_v62 = vld [vmem:[%s4414_s3 + $0x3a0] ss:$24 sps:$4 sm:$0xff]  }
 0x4a4   : > { %2357 = vmatpush1.bf16.msra.mxu1 %v3260_v63  ;;  %2398 = vmatpush1.bf16.msra.mxu0 %v3263_v1  ;;  %v3358_v63 = vld [vmem:[%s4414_s3 + $0xd4] ss:$24 sps:$4 sm:$0xff]  }
 0x4a5   : > { %2358 = vmatprep.subr.bf16.mxu1 %v3268_v2  ;;  %2399 = vmatprep.subr.bf16.mxu0 %v3271_v3  ;;  %v3361_v1 = vld [vmem:[%s4414_s3 + $0x3d4] ss:$24 sps:$4 sm:$0xff]   ;;  %v3356_v2 = vld [vmem:[%s4414_s3 + $0xd0] ss:$24 sps:$4 sm:$0xff]  }
 0x4a6   : > { %v3359_v3 = vld [vmem:[%s4414_s3 + $0x3d0] ss:$24 sps:$4 sm:$0xff]  }
 0x4a8   : > { %2359 = vmatpush1.bf16.msra.mxu1 %v3266_v4  ;;  %2400 = vmatpush1.bf16.msra.mxu0 %v3269_v5  ;;  %v3364_v4 = vld [vmem:[%s4414_s3 + $0x104] ss:$24 sps:$4 sm:$0xff]  }
 0x4a9   : > { %2360 = vmatprep.subr.bf16.mxu1 %v3274_v6  ;;  %2401 = vmatprep.subr.bf16.mxu0 %v3277_v7  ;;  %v3367_v5 = vld [vmem:[%s4414_s3 + $0x404] ss:$24 sps:$4 sm:$0xff]   ;;  %v3362_v6 = vld [vmem:[%s4414_s3 + $0x100] ss:$24 sps:$4 sm:$0xff]  }
 0x4aa   : > { %v3365_v7 = vld [vmem:[%s4414_s3 + $0x400] ss:$24 sps:$4 sm:$0xff]  }
 0x4ac   : > { %2361 = vmatpush1.bf16.msra.mxu1 %v3272_v9  ;;  %2402 = vmatpush1.bf16.msra.mxu0 %v3275_v10  ;;  %v3370_v9 = vld [vmem:[%s4414_s3 + $0x134] ss:$24 sps:$4 sm:$0xff]  }
 0x4ad   : > { %2362 = vmatprep.subr.bf16.mxu1 %v3280_v11  ;;  %2403 = vmatprep.subr.bf16.mxu0 %v3283_v13  ;;  %v3373_v10 = vld [vmem:[%s4414_s3 + $0x434] ss:$24 sps:$4 sm:$0xff]   ;;  %v3368_v11 = vld [vmem:[%s4414_s3 + $0x130] ss:$24 sps:$4 sm:$0xff]  }
 0x4ae   : > { %v3371_v13 = vld [vmem:[%s4414_s3 + $0x430] ss:$24 sps:$4 sm:$0xff]  }
 0x4b0   : > { %2363 = vmatpush1.bf16.msra.mxu1 %v3278_v14  ;;  %2404 = vmatpush1.bf16.msra.mxu0 %v3281_v15  ;;  %v3376_v14 = vld [vmem:[%s4414_s3 + $0x164] ss:$24 sps:$4 sm:$0xff]  }
 0x4b1   : > { %2364 = vmatprep.subr.bf16.mxu1 %v3286_v16  ;;  %2405 = vmatprep.subr.bf16.mxu0 %v3289_v17  ;;  %v3379_v15 = vld [vmem:[%s4414_s3 + $0x464] ss:$24 sps:$4 sm:$0xff]   ;;  %v3374_v16 = vld [vmem:[%s4414_s3 + $0x160] ss:$24 sps:$4 sm:$0xff]  }
 0x4b2   : > { %v3377_v17 = vld [vmem:[%s4414_s3 + $0x460] ss:$24 sps:$4 sm:$0xff]  }
 0x4b4   : > { %2365 = vmatpush1.bf16.msra.mxu1 %v3284_v18  ;;  %2406 = vmatpush1.bf16.msra.mxu0 %v3287_v19  ;;  %v3382_v18 = vld [vmem:[%s4414_s3 + $0x194] ss:$24 sps:$4 sm:$0xff]  }
 0x4b5   : > { %2366 = vmatprep.subr.bf16.mxu1 %v3292_v20  ;;  %2407 = vmatprep.subr.bf16.mxu0 %v3295_v22  ;;  %v3385_v19 = vld [vmem:[%s4414_s3 + $0x494] ss:$24 sps:$4 sm:$0xff]   ;;  %v3380_v20 = vld [vmem:[%s4414_s3 + $0x190] ss:$24 sps:$4 sm:$0xff]  }
 0x4b6   : > { %v3383_v22 = vld [vmem:[%s4414_s3 + $0x490] ss:$24 sps:$4 sm:$0xff]  }
 0x4b8   : > { %2367 = vmatpush1.bf16.msra.mxu1 %v3290_v23  ;;  %2408 = vmatpush1.bf16.msra.mxu0 %v3293_v24  ;;  %v3388_v23 = vld [vmem:[%s4414_s3 + $0x1c4] ss:$24 sps:$4 sm:$0xff]  }
 0x4b9   : > { %2368 = vmatprep.subr.bf16.mxu1 %v3298_v25  ;;  %2409 = vmatprep.subr.bf16.mxu0 %v3301_v26  ;;  %v3391_v24 = vld [vmem:[%s4414_s3 + $0x4c4] ss:$24 sps:$4 sm:$0xff]   ;;  %v3386_v25 = vld [vmem:[%s4414_s3 + $0x1c0] ss:$24 sps:$4 sm:$0xff]  }
 0x4ba   : > { %v3389_v26 = vld [vmem:[%s4414_s3 + $0x4c0] ss:$24 sps:$4 sm:$0xff]  }
 0x4bc   : > { %2369 = vmatpush1.bf16.msra.mxu1 %v3296_v27  ;;  %2410 = vmatpush1.bf16.msra.mxu0 %v3299_v29  ;;  %v3394_v27 = vld [vmem:[%s4414_s3 + $0x1f4] ss:$24 sps:$4 sm:$0xff]  }
 0x4bd   : > { %2370 = vmatprep.subr.bf16.mxu1 %v3304_v30  ;;  %2411 = vmatprep.subr.bf16.mxu0 %v3307_v31  ;;  %v3397_v29 = vld [vmem:[%s4414_s3 + $0x4f4] ss:$24 sps:$4 sm:$0xff]   ;;  %v3392_v30 = vld [vmem:[%s4414_s3 + $0x1f0] ss:$24 sps:$4 sm:$0xff]  }
 0x4be   : > { %v3395_v31 = vld [vmem:[%s4414_s3 + $0x4f0] ss:$24 sps:$4 sm:$0xff]  }
 0x4c0   : > { %2371 = vmatpush1.bf16.msra.mxu1 %v3302_v32  ;;  %2412 = vmatpush1.bf16.msra.mxu0 %v3305_v33  ;;  %v3400_v32 = vld [vmem:[%s4414_s3 + $0x224] ss:$24 sps:$4 sm:$0xff]  }
 0x4c1   : > { %2372 = vmatprep.subr.bf16.mxu1 %v3310_v12  ;;  %2413 = vmatprep.subr.bf16.mxu0 %v3313_v34  ;;  %v3403_v33 = vld [vmem:[%s4414_s3 + $0x524] ss:$24 sps:$4 sm:$0xff]   ;;  %v3398_v12 = vld [vmem:[%s4414_s3 + $0x220] ss:$24 sps:$4 sm:$0xff]  }
 0x4c2   : > { %v3401_v34 = vld [vmem:[%s4414_s3 + $0x520] ss:$24 sps:$4 sm:$0xff]  }
 0x4c4   : > { %2373 = vmatpush1.bf16.msra.mxu1 %v3308_v35  ;;  %2414 = vmatpush1.bf16.msra.mxu0 %v3311_v36  ;;  %v3406_v35 = vld [vmem:[%s4414_s3 + $0x254] ss:$24 sps:$4 sm:$0xff]  }
 0x4c5   : > { %2374 = vmatprep.subr.bf16.mxu1 %v3316_v37  ;;  %2415 = vmatprep.subr.bf16.mxu0 %v3319_v38  ;;  %v3409_v36 = vld [vmem:[%s4414_s3 + $0x554] ss:$24 sps:$4 sm:$0xff]   ;;  %v3404_v37 = vld [vmem:[%s4414_s3 + $0x250] ss:$24 sps:$4 sm:$0xff]  }
 0x4c6   : > { %v3407_v38 = vld [vmem:[%s4414_s3 + $0x550] ss:$24 sps:$4 sm:$0xff]  }
 0x4c8   : > { %2375 = vmatpush1.bf16.msra.mxu1 %v3314_v39  ;;  %2416 = vmatpush1.bf16.msra.mxu0 %v3317_v40  ;;  %v3412_v39 = vld [vmem:[%s4414_s3 + $0x284] ss:$24 sps:$4 sm:$0xff]  }
 0x4c9   : > { %2376 = vmatprep.subr.bf16.mxu1 %v3322_v0  ;;  %2417 = vmatprep.subr.bf16.mxu0 %v3325_v8  ;;  %v3415_v40 = vld [vmem:[%s4414_s3 + $0x584] ss:$24 sps:$4 sm:$0xff]   ;;  %v3410_v0 = vld [vmem:[%s4414_s3 + $0x280] ss:$24 sps:$4 sm:$0xff]  }
 0x4ca   : > { %v3413_v8 = vld [vmem:[%s4414_s3 + $0x580] ss:$24 sps:$4 sm:$0xff]  }
 0x4cc   : > { %2377 = vmatpush1.bf16.msra.mxu1 %v3320_v42  ;;  %2418 = vmatpush1.bf16.msra.mxu0 %v3323_v43  ;;  %v3418_v42 = vld [vmem:[%s4414_s3 + $0x2b4] ss:$24 sps:$4 sm:$0xff]  }
 0x4cd   : > { %2378 = vmatprep.subr.bf16.mxu1 %v3328_v44  ;;  %2419 = vmatprep.subr.bf16.mxu0 %v3331_v45  ;;  %v3421_v43 = vld [vmem:[%s4414_s3 + $0x5b4] ss:$24 sps:$4 sm:$0xff]   ;;  %v3416_v44 = vld [vmem:[%s4414_s3 + $0x2b0] ss:$24 sps:$4 sm:$0xff]  }
 0x4ce   : > { %v3419_v45 = vld [vmem:[%s4414_s3 + $0x5b0] ss:$24 sps:$4 sm:$0xff]  }
 0x4d0   : > { %2379 = vmatpush1.bf16.msra.mxu1 %v3326_v41  ;;  %2420 = vmatpush1.bf16.msra.mxu0 %v3329_v21  ;;  %v3424_v41 = vld [vmem:[%s4414_s3 + $0x2e4] ss:$24 sps:$4 sm:$0xff]  }
 0x4d1   : > { %2430 = vmatprep.subr.bf16.mxu1 %v3334_v49  ;;  %2471 = vmatprep.subr.bf16.mxu0 %v3337_v50  ;;  %v3427_v21 = vld [vmem:[%s4414_s3 + $0x5e4] ss:$24 sps:$4 sm:$0xff]   ;;  %v3422_v49 = vld [vmem:[%s4414_s3 + $0x2e0] ss:$24 sps:$4 sm:$0xff]  }
 0x4d2   : > { %v3425_v50 = vld [vmem:[%s4414_s3 + $0x5e0] ss:$24 sps:$4 sm:$0xff]  }
 0x4d3   : > { %2381 = vmatmul.mubr.bf16.vlgmr.msra.gmra.mrb[36].mxu1 %v3962_v48  ;;  %2422 = vmatmul.mubr.bf16.vlgmr.msra.gmra.mrb[36].mxu0 %v3960_v28 }
 0x4d4   : > { %2431 = vmatpush1.bf16.msra.mxu1 %v3332_v51  ;;  %2462 = vmatprep.mubr.bf16.mxu1 %v3950_v46  ;;  %v3349_v46 = vld [vmem:[%s4414_s3 + $0x374] ss:$24 sps:$4 sm:$0xff]  }
 0x4d5   : > { %2472 = vmatpush1.bf16.msra.mxu0 %v3335_v52  ;;  %2503 = vmatprep.mubr.bf16.mxu0 %v3952_v47  ;;  %v3347_v47 = vld [vmem:[%s4414_s3 + $0x370] ss:$24 sps:$4 sm:$0xff]  }
 0x4d6   : > { %2432 = vmatprep.subr.bf16.mxu1 %v3340_v53  ;;  %2473 = vmatprep.subr.bf16.mxu0 %v3343_v54 }
 0x4d8   : > { %2433 = vmatpush1.bf16.msra.mxu1 %v3338_v55 }
 0x4d9   : > { %2474 = vmatpush1.bf16.msra.mxu0 %v3341_v56  ;;  %2434 = vmatprep.subr.bf16.mxu1 %v3346_v57 }
 0x4da   : > { %2475 = vmatprep.subr.bf16.mxu0 %v3349_v46 }
 0x4dc   : > { %2435 = vmatpush1.bf16.msra.mxu1 %v3344_v58 }
 0x4dd   : > { %2476 = vmatpush1.bf16.msra.mxu0 %v3347_v47  ;;  %2436 = vmatprep.subr.bf16.mxu1 %v3352_v59 }
 0x4de   : > { %2477 = vmatprep.subr.bf16.mxu0 %v3355_v60 }
 0x4e0   : > { %2437 = vmatpush1.bf16.msra.mxu1 %v3350_v61 }
 0x4e1   : > { %2478 = vmatpush1.bf16.msra.mxu0 %v3353_v62  ;;  %2438 = vmatprep.subr.bf16.mxu1 %v3358_v63 }
 0x4e2   : > { %2479 = vmatprep.subr.bf16.mxu0 %v3361_v1 }
 0x4e4   : > { %2439 = vmatpush1.bf16.msra.mxu1 %v3356_v2 }
 0x4e5   : > { %2480 = vmatpush1.bf16.msra.mxu0 %v3359_v3  ;;  %2440 = vmatprep.subr.bf16.mxu1 %v3364_v4  ;;  %v2512_v4 = vld [vmem:[%s301_s12] sm:$0xff] }
 0x4e6   : > { %2481 = vmatprep.subr.bf16.mxu0 %v3367_v5  ;;  %v2513_v5 = vld [vmem:[%s301_s12 + $0x8] sm:$0xff] }
 0x4e8   : > { %2441 = vmatpush1.bf16.msra.mxu1 %v3362_v6  ;;  %v2514_v6 = vld [vmem:[%s301_s12 + $0x10] sm:$0xff] }
 0x4e9   : > { %2482 = vmatpush1.bf16.msra.mxu0 %v3365_v7  ;;  %2442 = vmatprep.subr.bf16.mxu1 %v3370_v9 }
 0x4ea   : > { %2483 = vmatprep.subr.bf16.mxu0 %v3373_v10 }
 0x4ec   : > { %2443 = vmatpush1.bf16.msra.mxu1 %v3368_v11  ;;  %v2515_v11 = vld [vmem:[%s301_s12 + $0x18] sm:$0xff] }
 0x4ed   : > { %2484 = vmatpush1.bf16.msra.mxu0 %v3371_v13  ;;  %2444 = vmatprep.subr.bf16.mxu1 %v3376_v14 }
 0x4ee   : > { %2485 = vmatprep.subr.bf16.mxu0 %v3379_v15 }
 0x4f0   : > { %2445 = vmatpush1.bf16.msra.mxu1 %v3374_v16 }
 0x4f1   : > { %2486 = vmatpush1.bf16.msra.mxu0 %v3377_v17  ;;  %2446 = vmatprep.subr.bf16.mxu1 %v3382_v18 }
 0x4f2   : > { %2487 = vmatprep.subr.bf16.mxu0 %v3385_v19 }
 0x4f4   : > { %2447 = vmatpush1.bf16.msra.mxu1 %v3380_v20  ;;  %v2516_v20 = vld [vmem:[%s301_s12 + $0x20] sm:$0xff] }
 0x4f5   : > { %2488 = vmatpush1.bf16.msra.mxu0 %v3383_v22  ;;  %2448 = vmatprep.subr.bf16.mxu1 %v3388_v23 }
 0x4f6   : > { %2489 = vmatprep.subr.bf16.mxu0 %v3391_v24 }
 0x4f8   : > { %2449 = vmatpush1.bf16.msra.mxu1 %v3386_v25 }
 0x4f9   : > { %2490 = vmatpush1.bf16.msra.mxu0 %v3389_v26  ;;  %2450 = vmatprep.subr.bf16.mxu1 %v3394_v27  ;;  %v2517_v27 = vld [vmem:[%s301_s12 + $0x28] sm:$0xff] }
 0x4fa   : > { %2491 = vmatprep.subr.bf16.mxu0 %v3397_v29 }
 0x4fc   : > { %2451 = vmatpush1.bf16.msra.mxu1 %v3392_v30 }
 0x4fd   : > { %2492 = vmatpush1.bf16.msra.mxu0 %v3395_v31  ;;  %2452 = vmatprep.subr.bf16.mxu1 %v3400_v32 }
 0x4fe   : > { %2493 = vmatprep.subr.bf16.mxu0 %v3403_v33 }
 0x500   : > { %2453 = vmatpush1.bf16.msra.mxu1 %v3398_v12 }
 0x501   : > { %2494 = vmatpush1.bf16.msra.mxu0 %v3401_v34  ;;  %2454 = vmatprep.subr.bf16.mxu1 %v3406_v35 }
 0x502   : > { %2495 = vmatprep.subr.bf16.mxu0 %v3409_v36 }
 0x504   : > { %2455 = vmatpush1.bf16.msra.mxu1 %v3404_v37 }
 0x505   : > { %2496 = vmatpush1.bf16.msra.mxu0 %v3407_v38  ;;  %2456 = vmatprep.subr.bf16.mxu1 %v3412_v39 }
 0x506   : > { %2497 = vmatprep.subr.bf16.mxu0 %v3415_v40 }
 0x508   : > { %2457 = vmatpush1.bf16.msra.mxu1 %v3410_v0 }
 0x509   : > { %2498 = vmatpush1.bf16.msra.mxu0 %v3413_v8  ;;  %2458 = vmatprep.subr.bf16.mxu1 %v3418_v42  ;;  %v2549_v8 = vlaneseq }
 0x50a   : > { %2499 = vmatprep.subr.bf16.mxu0 %v3421_v43 }
 0x50b   : > { %v2550_v43 = vshrl.u32 %v2549_v8, 7 }
 0x50c   : > { %2459 = vmatpush1.bf16.msra.mxu1 %v3416_v44 }
 0x50d   : > { %2500 = vmatpush1.bf16.msra.mxu0 %v3419_v45  ;;  %2460 = vmatprep.subr.bf16.mxu1 %v3424_v41  ;;  %v2551_v44 = vsub.s32 0, %v2550_v43  ;;  %v2555_v45 = vsub.s32 1, %v2550_v43  ;;  %v2559_v41 = vsub.s32 2, %v2550_v43 }
 0x50e   : > { %2501 = vmatprep.subr.bf16.mxu0 %v3427_v21  ;;  %v2563_v21 = vsub.s32 3, %v2550_v43 }
 0x510   : > { %2461 = vmatpush1.bf16.msra.mxu1 %v3422_v49  ;;  %v2547_v49 = vld [vmem:[%s4415_s4] sm:$0x3f] }
 0x511   : > { %2502 = vmatpush1.bf16.msra.mxu0 %v3425_v50  ;;  %v2567_v50 = vsub.s32 4, %v2550_v43 }
 0x513   : > { %2463 = vmatmul.mubr.bf16.vlgmr.msra.gmra.mrb[40].mxu1 %v3962_v48 }
 0x514   : > { %2504 = vmatmul.mubr.bf16.vlgmr.msra.gmra.mrb[40].mxu0 %v3960_v28 }
 0x566   : > { %v2300_v51 = vpop.f32.mrb[32].mxu1  ;;  %v2341_v52 = vpop.f32.mrb[32].mxu0 }
 0x567   : > { %v2342_v53 = vadd.f32 %v2341_v52, %v2300_v51  ;;  %v2302_v54 = vpop.f32.mrb[33].mxu1  ;;  %v2343_v55 = vpop.f32.mrb[33].mxu0  ;;  %v2571_v51 = vsub.s32 5, %v2550_v43  ;;  %v2552_v52 = vrot.slane %v2547_v49, %v2551_v44 }
 0x568   : > { %v2344_v56 = vadd.f32 %v2343_v55, %v2302_v54  ;;  %v2304_v57 = vpop.f32.mrb[34].mxu1  ;;  %v2345_v46 = vpop.f32.mrb[34].mxu0  ;;  %v2560_v54 = vrot.slane %v2547_v49, %v2559_v41  ;;  %v2564_v55 = vrot.slane %v2547_v49, %v2563_v21 }
 0x569   : > { %v2305_v58 = vpop.f32.mrb[35].mxu1  ;;  %v2346_v47 = vpop.f32.mrb[35].mxu0  ;;  %v2518_v7 = vadd.f32 %v2512_v4, %v2342_v53  ;;  %v2556_v53 = vrot.slane %v2547_v49, %v2555_v45  ;;  %v2568_v57 = vrot.slane %v2547_v49, %v2567_v50  ;;  %v2572_v46 = vrot.slane %v2547_v49, %v2571_v51 }
 0x56a   : > { %v2519_v9 = vadd.f32 %v2513_v5, %v2344_v56 }
 0x56b   : > { %v2524_v13 = vmul.f32 %v2518_v7, %v2518_v7 }
 0x56c   : > { %v2525_v14 = vmul.f32 %v2519_v9, %v2519_v9 }
 0x56e   : > { %v2530_v17 = vadd.f32 %v2525_v14, %v2524_v13 }
 0x5a6   : > { %v2382_v59 = vpop.f32.mrb[36].mxu1  ;;  %v2423_v60 = vpop.f32.mrb[36].mxu0 }
 0x5a7   : > { %v2424_v61 = vadd.f32 %v2423_v60, %v2382_v59  ;;  %v2384_v62 = vpop.f32.mrb[37].mxu1  ;;  %v2425_v63 = vpop.f32.mrb[37].mxu0 }
 0x5a8   : > { %v2426_v1 = vadd.f32 %v2425_v63, %v2384_v62  ;;  %v2386_v48 = vpop.f32.mrb[38].mxu1  ;;  %v2427_v2 = vpop.f32.mrb[38].mxu0 }
 0x5a9   : > { %v2387_v28 = vpop.f32.mrb[39].mxu1  ;;  %v2428_v3 = vpop.f32.mrb[39].mxu0  ;;  %v2520_v10 = vadd.f32 %v2514_v6, %v2424_v61 }
 0x5aa   : > { %v2521_v16 = vadd.f32 %v2515_v11, %v2426_v1 }
 0x5ab   : > { %v2526_v15 = vmul.f32 %v2520_v10, %v2520_v10 }
 0x5ac   : > { %v2527_v24 = vmul.f32 %v2521_v16, %v2521_v16 }
 0x5ad   : > { %v2531_v23 = vadd.f32 %v2530_v17, %v2526_v15 }
 0x5af   : > { %v2532_v36 = vadd.f32 %v2531_v23, %v2527_v24 }
 0x5e6   : > { %v2464_v18 = vpop.f32.mrb[40].mxu1 }
 0x5e7   : > { %v2505_v19 = vpop.f32.mrb[40].mxu0  ;;  %v2466_v22 = vpop.f32.mrb[41].mxu1 }
 0x5e8   : > { %v2506_v25 = vadd.f32 %v2505_v19, %v2464_v18  ;;  %v2507_v26 = vpop.f32.mrb[41].mxu0  ;;  %v2468_v29 = vpop.f32.mrb[42].mxu1 }
 0x5e9   : > { %v2508_v30 = vadd.f32 %v2507_v26, %v2466_v22  ;;  %v2509_v31 = vpop.f32.mrb[42].mxu0  ;;  %v2469_v32 = vpop.f32.mrb[43].mxu1 }
 0x5ea   : > { %v2522_v33 = vadd.f32 %v2516_v20, %v2506_v25  ;;  %v2510_v12 = vpop.f32.mrb[43].mxu0 }
 0x5eb   : > { %v2523_v34 = vadd.f32 %v2517_v27, %v2508_v30 }
 0x5ec   : > { %v2528_v35 = vmul.f32 %v2522_v33, %v2522_v33 }
 0x5ed   : > { %v2529_v37 = vmul.f32 %v2523_v34, %v2523_v34 }
 0x5ee   : > { %v2533_v38 = vadd.f32 %v2532_v36, %v2528_v35 }
 0x5f0   : > { %v2534_v39 = vadd.f32 %v2533_v38, %v2529_v37 }
 0x5f2   : > { %2535 = vadd.xlane.f32.xlu1 %v2534_v39 }
 0x67f   : > { %v2536_v40 = vpop.xlane.xlu1 %2535 }
 0x680   : > { %v2538_v0 = vmul.f32 0.0013020834, %v2536_v40 }
 0x682   : > { %v2539_v42 = vadd.f32 1e-06, %v2538_v0 }
 0x684   : > { %3460 = vrsqrt.f32 %v2539_v42 }
 0x68e   : > { %v3461_v56 = vpop.eup %3460 }
 0x68f   : > { %v2541_v58 = vmul.f32 %v3461_v56, %v2518_v7  ;;  %v2542_v47 = vmul.f32 %v3461_v56, %v2519_v9  ;;  %v2543_v59 = vmul.f32 %v3461_v56, %v2520_v10  ;;  %v2544_v60 = vmul.f32 %v3461_v56, %v2521_v16 }
 0x690   : > { %v2545_v61 = vmul.f32 %v3461_v56, %v2522_v33  ;;  %v2546_v62 = vmul.f32 %v3461_v56, %v2523_v34 }
 0x691   : > { %v2579_v63 = vmul.f32 %v2552_v52, %v2541_v58  ;;  %v2580_v1 = vmul.f32 %v2556_v53, %v2542_v47  ;;  %v2581_v48 = vmul.f32 %v2560_v54, %v2543_v59  ;;  %v2582_v2 = vmul.f32 %v2564_v55, %v2544_v60 }
 0x692   : > { %v2583_v28 = vmul.f32 %v2568_v57, %v2545_v61  ;;  %v2584_v3 = vmul.f32 %v2572_v46, %v2546_v62 }
 0x693   : > { %2585 = vst [vmem:[%s279_s17] sm:$0xff] %v2579_v63  ;;  %2586 = vst [vmem:[%s279_s17 + $0x8] sm:$0xff] %v2580_v1 }
 0x694   : > { %2587 = vst [vmem:[%s279_s17 + $0x10] sm:$0xff] %v2581_v48  ;;  %2588 = vst [vmem:[%s279_s17 + $0x18] sm:$0xff] %v2582_v2 }
 0x695   : > { %2589 = vst [vmem:[%s279_s17 + $0x20] sm:$0xff] %v2583_v28  ;;  %2590 = vst [vmem:[%s279_s17 + $0x28] sm:$0xff] %v2584_v3 }
 0x696   : > { %3475 = shalt.err (!%p3472_p5)
}
 0x697   : > { %s3476_s12 = scalar_lea.hbm %s4362_s21, 768  ;;  %s3480_s14 = scalar_lea.hbm %s4416_s5, 1536 }
 0x698   : > { %p3477_p6 = scmp.ne.s32.totalorder %s4362_s21, %s3476_s12  ;;  %p3481_p10 = scmp.lt.u32.totalorder %s4362_s21, %s4416_s5 }
 0x699   : > { %p3482_p11 = scmp.lt.u32.totalorder %s3480_s14, %s3476_s12  ;;  %p3484_p13 = scmp.lt.u32.totalorder %s3476_s12, %s4362_s21 }
 0x69a   : > { %p3478_p7 = pnand %p3477_p6, %p3616_p4 }
 0x69b   : > { %p3483_p12 = por %p3482_p11, %p3481_p10 }
 0x69c   : > { %p3479_p9 = pneg %p3478_p7 }
 0x69d   : > { %p3485_p0 = por %p3484_p13, %p3483_p12 }
 0x69f   : > { %p3486_p1 = pnand %p3485_p0, %p3479_p9 }
 0x6a1   : > { %3489 = shalt.err (!%p3486_p1)
}
 0x6a2   : > { %3068 = dma.vmem_to_hbm [thread:$0]  (%p3616_p4), %s4364_s24, 768, %s4362_s21, %s2592_s29  }
 0x6a3 PF: > { %p3074_p2 = scmp.ge.s32.totalorder %s3540_s23, 2  ;;  %s2620_s17 = sand.u32 1, %s3520_s18  }
 0x6a4   : > { %s2621_s25 = scalar_lea.sflag [#allocation3], %s2620_s17 }
 0x6a5   : > { %p3071_p3 = pnand %p3074_p2, %p3623_p8 }
 0x6a7   : > { %3515 = dma.done.wait (!%p3071_p3), %s2621_s25, 768  }
 0x6a8   : > { %3517 = vsyncadd (!%p3071_p3), %s2621_s25, 4294966528  ;;  %s18_s23 = sadd.s32 1, %s3540_s23   ;;  %s4419_s18 = smov %s3524_s19 }
 0x6a9   : > { %p15_p5 = scmp.ge.s32.totalorder %s18_s23, 4   ;;  %s4420_s19 = smov %s3528_s20 }
 0x6aa   : > { %s4421_s20 = smov %s3629_s6  ;;  %s4422_s21 = smov %s3536_s22 }
 0x6ab   : > { %s4423_s22 = smov %s4425_s26  ;;  %17 = sbr.rel (!%p15_p5) target bundleno = 4 (0x4), region = 81 }
 0x6b2   :  { %2626 = vsyncpa [#allocation3], 1 }
 0x6b3   :  { %2628 = vsyncpa [#allocation3 + $0x1], 1 }

</bundles_post_ra>
